<compile_context>
chip_gen: v5e
topology: v5e:2x2
jax: 0.10.0
libtpu: 0.0.40
codegen_flags: <defaults>
</compile_context>

<pallas_src>
import math
import re
import functools
import numpy as np
import jax
import jax.numpy as jnp
from jax import lax
from jax.experimental import pallas as pl
from jax.experimental.pallas import tpu as pltpu

E_LANE = 128  # lane-dense embedding padding


def _round_up(x, m):
    return ((x + m - 1) // m) * m


def _detect_tpu_generation():
    try:
        kind = jax.devices()[0].device_kind
    except Exception:
        return 6
    m = re.search(r"(\d+)", kind)
    return int(m.group(1)) if m else 6


_TPU_GEN = _detect_tpu_generation()


def _vmem_capacity_bytes(gen):
    try:
        return int(pltpu.get_tpu_info().vmem_capacity_bytes)
    except Exception:
        return (64 << 20) if gen >= 7 else (128 << 20)


_VMEM_CAP = _vmem_capacity_bytes(_TPU_GEN)
# v7x has 64 MiB physical VMEM per TC -> keep headroom; v5e/v6e have 128 MiB.
_VMEM_LIMIT_CAP = min((48 << 20) if _TPU_GEN >= 7 else (100 << 20), int(0.75 * _VMEM_CAP))
_X_RESIDENT_BUDGET = (40 << 20) if _TPU_GEN >= 7 else (80 << 20)


def _select_tile(m_rows):
    """Adjacency tile edge (square tm=tk so square graphs chain hop-to-hop)."""
    if _TPU_GEN <= 5:
        return 128                      # v5e: 4x128x128 MXU, lowest HBM BW -> less pad waste
    t = 256
    if _TPU_GEN >= 7 and _round_up(m_rows, t) // t < 2:
        t = 128                         # give v7x's 2 TensorCores >= 2 row blocks when possible
    return t


def _pad2(x, rows, cols, dtype=jnp.bfloat16):
    x = x.astype(dtype)
    r, c = x.shape
    if r == rows and c == cols:
        return x
    return jnp.pad(x, ((0, rows - r), (0, cols - c)))


# --------------------------------------------------------------------------- #
# Block-sparse tiled matmul:  out = (A @ X + sum(residuals)) * scale
#   bf16 MXU inputs, f32 accumulation + f32 epilogue sum, bf16/f32 output.
# --------------------------------------------------------------------------- #
def _bs_mm_kernel(scale, n_res, resident, tk, kblk_ref, cnt_ref, a_ref, x_ref, *rest):
    c_refs = rest[:n_res]
    o_ref = rest[n_res]
    acc_ref = rest[n_res + 1]

    m = pl.program_id(0)
    s = pl.program_id(2)

    @pl.when(s == 0)
    def _():
        acc_ref[...] = jnp.zeros_like(acc_ref)

    @pl.when(s < cnt_ref[m])          # skip all-zero adjacency tiles (padded s-steps)
    def _():
        if resident:
            # X is fully VMEM-resident: slice the needed (tk, Ep) tile out of it.
            start = pl.multiple_of(kblk_ref[m, s] * tk, tk)
            x = x_ref[pl.ds(start, tk), :]
        else:
            x = x_ref[...]
        acc_ref[...] += jnp.dot(a_ref[...], x, preferred_element_type=jnp.float32)

    @pl.when(s == pl.num_programs(2) - 1)
    def _():
        out = acc_ref[...]
        for c in c_refs:                              # residual sum in f32 (fused epilogue)
            out = out + c[...].astype(jnp.float32)
        if scale != 1.0:
            out = out * scale
        o_ref[...] = out.astype(o_ref.dtype)


def pallas_bs_matmul(op, x, residuals=(), scale=1.0, out_dtype=jnp.bfloat16):
    """op: dict from make_bs_operand (padded bf16 adjacency + block-nnz metadata)."""
    a = op["a"]                                       # (Mp, Kp) bf16, tile-padded
    kblk, cnt, smax = op["kblk"], op["cnt"], op["smax"]
    tm, tk = op["tm"], op["tk"]
    Mp, Kp = a.shape
    Ep = _round_up(x.shape[1], E_LANE)
    x = _pad2(x, Kp, Ep)                              # bf16 MXU operand

    # Keep X VMEM-resident (single DMA for the whole grid) when it fits the budget.
    x_bytes = Kp * Ep * 2
    resident = (2 * x_bytes) <= _X_RESIDENT_BUDGET
    tn = Ep if resident else (256 if Ep % 256 == 0 else E_LANE)
    grid = (Mp // tm, Ep // tn, smax)

    a_spec = pl.BlockSpec((tm, tk), lambda m, n, s, kb, ct: (m, kb[m, s]))
    if resident:
        x_spec = pl.BlockSpec((Kp, Ep), lambda m, n, s, kb, ct: (0, 0))
    else:
        x_spec = pl.BlockSpec((tk, tn), lambda m, n, s, kb, ct: (kb[m, s], n))
    res_spec = pl.BlockSpec((tm, tn), lambda m, n, s, kb, ct: (m, n))
    o_spec = pl.BlockSpec((tm, tn), lambda m, n, s, kb, ct: (m, n))

    residuals = tuple(_pad2(c, Mp, Ep, c.dtype) for c in residuals)
    n_res = len(residuals)
    out_item = jnp.dtype(out_dtype).itemsize

    nnz = max(int(op["nnz_blocks"]), 1)
    x_traffic = x_bytes if resident else nnz * tk * tn * 2
    res_traffic = sum(int(Mp * Ep * jnp.dtype(c.dtype).itemsize) for c in residuals)
    cost = pl.CostEstimate(
        flops=2 * nnz * tm * tk * Ep,
        transcendentals=0,
        bytes_accessed=int(nnz * tm * tk * 2 + x_traffic + res_traffic + Mp * Ep * out_item),
    )

    # VMEM: double-buffered A / X / residual / output blocks + f32 accumulator + slack.
    need = (2 * tm * tk * 2
            + (2 * x_bytes if resident else 2 * tk * tn * 2)
            + sum(2 * tm * tn * jnp.dtype(c.dtype).itemsize for c in residuals)
            + 2 * tm * tn * out_item
            + tm * tn * 4
            + (2 << 20))
    vmem_limit = int(min(_VMEM_LIMIT_CAP, max(32 << 20, need)))

    kernel = functools.partial(_bs_mm_kernel, float(scale), n_res, resident, tk)

    return pl.pallas_call(
        kernel,
        out_shape=jax.ShapeDtypeStruct((Mp, Ep), out_dtype),
        grid_spec=pltpu.PrefetchScalarGridSpec(
            num_scalar_prefetch=2,
            grid=grid,
            in_specs=[a_spec, x_spec] + [res_spec] * n_res,
            out_specs=o_spec,
            scratch_shapes=[pltpu.VMEM((tm, tn), jnp.float32)],
        ),
        compiler_params=pltpu.CompilerParams(
            dimension_semantics=("parallel", "parallel", "arbitrary"),
            vmem_limit_bytes=vmem_limit,
        ),
        cost_estimate=cost,
    )(kblk, cnt, a, x, *residuals)


# --------------------------------------------------------------------------- #
# BPR / ranking loss: 5 lane-dense (2B, Ep) reps, pos rows first, neg rows last
# --------------------------------------------------------------------------- #
def _loss_kernel(alpha, margin, B,
                 u_id_ref, i_id_ref, u_kg_ref, ikg_ref, hat_u_ref, o_ref):
    u_id = u_id_ref[...].astype(jnp.float32)
    i_id = i_id_ref[...].astype(jnp.float32)
    u_kg = u_kg_ref[...].astype(jnp.float32)
    ikg = ikg_ref[...].astype(jnp.float32)     # i_kg and hat_i are the same tensor in the ref
    hat_u = hat_u_ref[...].astype(jnp.float32)

    cf = jnp.sum(u_id * i_id, axis=1, keepdims=True)      # (2B, 1)
    kg = jnp.sum(u_kg * ikg, axis=1, keepdims=True)
    hat = jnp.sum(hat_u * ikg, axis=1, keepdims=True)

    sig_hat = jax.nn.sigmoid(hat)
    t = cf + kg * sig_hat                                  # cf + kg * sigmoid(hat)
    diff = t[:B] - t[B:]                                   # pos - neg, (B, 1)
    score = jax.nn.sigmoid(diff)
    loss1 = -jnp.mean(jnp.log(jnp.maximum(score, 1e-6)))   # clamp(min=1e-6)

    chp = jnp.maximum(sig_hat[:B], 1e-6)
    chn = jnp.maximum(sig_hat[B:], 1e-6)
    loss2 = jnp.mean(jnp.maximum(chp - chn - margin, 0.0))

    o_ref[0] = loss1 + alpha * loss2


def pallas_bpr_loss(alpha, margin, B, *reps):
    # TODO(synk): for large B, fold the 5 row-gathers into this kernel with
    # PrefetchScalarGridSpec + pl.Element row-gather BlockSpecs over a B grid.
    kernel = functools.partial(_loss_kernel, float(alpha), float(margin), int(B))
    out = pl.pallas_call(
        kernel,
        out_shape=jax.ShapeDtypeStruct((1,), jnp.float32),
        in_specs=[pl.BlockSpec(memory_space=pltpu.MemorySpace.VMEM)] * len(reps),
        out_specs=pl.BlockSpec(memory_space=pltpu.MemorySpace.SMEM),
    )(*reps)
    return out[0]


# --------------------------------------------------------------------------- #
# Regularization loss: lane-dense sum of squares with f32 VMEM accumulation
# --------------------------------------------------------------------------- #
def _ssq_kernel(x_ref, o_ref, acc_ref):
    i = pl.program_id(0)

    @pl.when(i == 0)
    def _():
        acc_ref[...] = jnp.zeros_like(acc_ref)

    xb = x_ref[...]
    acc_ref[...] += xb * xb                       # no per-step cross-lane reduce

    @pl.when(i == pl.num_programs(0) - 1)
    def _():
        o_ref[0] = jnp.sum(acc_ref[...])


def pallas_mean_sq(x, max_block_rows=1024):
    n, d = x.shape
    total = n * d
    lane = E_LANE
    rows = -(-total // lane)
    br = _round_up(rows, 8) if rows <= max_block_rows else max_block_rows
    padded = _round_up(total, br * lane)          # zero pad: exact for sum of squares
    flat = jnp.ravel(x).astype(jnp.float32)
    if padded != total:
        flat = jnp.pad(flat, (0, padded - total))
    x2 = flat.reshape(padded // lane, lane)
    grid = (padded // (br * lane),)

    out = pl.pallas_call(
        _ssq_kernel,
        out_shape=jax.ShapeDtypeStruct((1,), jnp.float32),
        grid_spec=pltpu.PrefetchScalarGridSpec(
            num_scalar_prefetch=0,
            grid=grid,
            in_specs=[pl.BlockSpec((br, lane), lambda i: (i, 0))],
            out_specs=pl.BlockSpec((1,), lambda i: (0,),
                                   memory_space=pltpu.MemorySpace.SMEM),
            scratch_shapes=[pltpu.VMEM((br, lane), jnp.float32)],
        ),
        compiler_params=pltpu.CompilerParams(dimension_semantics=("arbitrary",)),
    )(x2)
    return out[0] / float(total)


# --------------------------------------------------------------------------- #
# KGCR forward (JAX glue + Pallas kernels)
# --------------------------------------------------------------------------- #
def kgcr_forward(params, user_tensor, item_tensor, *, graph, num_u, num_i, alpha, margin):
    id_emb = params["id_embedding"]               # (num_u + num_i, E) f32
    user_pre = params["user_pre"]                 # (num_u, E) f32
    item_pre = params["item_pre"]                 # (num_i, E) f32  (reg loss only)
    E = id_emb.shape[1]
    Ep = _round_up(E, E_LANE)

    ui = graph["ui_T"]
    ia = graph["ia_T"]
    ia_mean = graph["ia_mean"]

    # bf16 MXU operands (zero-padded to the K dimension of each adjacency)
    id_emb_p = _pad2(id_emb, ui["a"].shape[1], Ep)
    user_pre_kp = _pad2(user_pre, ia["a"].shape[1], Ep)
    # f32 residuals, zero-padded to the M (output-row) dimension
    id_emb_res = _pad2(id_emb, ui["a"].shape[0], Ep, jnp.float32)
    user_pre_res = _pad2(user_pre, ia["a"].shape[0], Ep, jnp.float32)

    # TODO(synk): the reference's UA branch (ua_rep_*) and trans_mlp never reach the
    # returned (loss, reg_loss); they are dropped here (dead MXU / HBM work).

    # UI branch: three GCN hops; the (id + r1 + r2 + r3)/4 average is fused into the
    # third hop's epilogue with f32 residual summation.
    r1 = pallas_bs_matmul(ui, id_emb_p)
    r2 = pallas_bs_matmul(ui, r1)
    ui_rep = pallas_bs_matmul(ui, r2, residuals=(id_emb_res, r1, r2),
                              scale=0.25, out_dtype=jnp.float32)

    # IA branch: (cat(user_pre,user_pre) + A_ia^T @ cat(user_pre,user_pre)) / 2, fused.
    # Only rows < num_u ever reach the loss, so the residual's upper (zero) rows are unused.
    ia_rep = pallas_bs_matmul(ia, user_pre_kp, residuals=(user_pre_res,),
                              scale=0.5, out_dtype=jnp.float32)

    # hat_u: scatter_('mean', ia_rep_0[col], row) == (D_row^{-1} A_ia) @ cat(user_pre, user_pre)
    hat_all = pallas_bs_matmul(ia_mean, user_pre_kp, out_dtype=jnp.float32)

    B = user_tensor.shape[0]
    u_ord = user_tensor.T.reshape(-1)             # [all pos users ; all neg users]
    i_ord = item_tensor.T.reshape(-1)

    u_id = ui_rep[u_ord]
    i_id = ui_rep[i_ord]
    u_kg = ia_rep[u_ord]
    # Replicates the reference exactly: ui_rep[item - num_u] is used both as the kg item
    # rep and as hat_i (they are literally the same tensor in the PyTorch code).
    ikg_hat = ui_rep[i_ord - num_u]
    hat_u = hat_all[u_ord]

    loss = pallas_bpr_loss(alpha, margin, B, u_id, i_id, u_kg, ikg_hat, hat_u)

    reg_loss = (pallas_mean_sq(id_emb)
                + pallas_mean_sq(user_pre)
                + pallas_mean_sq(item_pre))
    return loss, reg_loss


# --------------------------------------------------------------------------- #
# Deterministic host-side setup
# --------------------------------------------------------------------------- #
def xavier_normal(key, shape):
    fan_out, fan_in = shape
    std = math.sqrt(2.0 / (fan_in + fan_out))
    return std * jax.random.normal(key, shape, dtype=jnp.float32)


def dense_adj(edges, n):
    A = np.zeros((n, n), dtype=np.float32)
    for r, c in edges:
        A[int(r), int(c)] += 1.0
    return A


def make_bs_operand(a_np, tm, tk):
    """Pad a dense adjacency to tile multiples and build the block-nnz tables."""
    M, K = a_np.shape
    Mp, Kp = _round_up(M, tm), _round_up(K, tk)
    a_pad = np.zeros((Mp, Kp), np.float32)
    a_pad[:M, :K] = a_np
    Mb, Kb = Mp // tm, Kp // tk
    nz = (a_pad.reshape(Mb, tm, Kb, tk) != 0).any(axis=(1, 3))          # (Mb, Kb)
    cnt = nz.sum(axis=1).astype(np.int32)
    smax = max(1, int(cnt.max()))
    kblk = np.zeros((Mb, smax), np.int32)
    for mb in range(Mb):
        ks = np.flatnonzero(nz[mb])
        if ks.size:
            kblk[mb, :ks.size] = ks
            kblk[mb, ks.size:] = ks[-1]          # repeat last index -> no extra DMA on pad steps
    # TODO(synk): fp8(e4m3) adjacency storage on v7x would halve A-tile HBM traffic.
    return {
        "a": jnp.asarray(a_pad, dtype=jnp.bfloat16),
        "kblk": jnp.asarray(kblk),
        "cnt": jnp.asarray(cnt),
        "smax": smax,
        "nnz_blocks": int(cnt.sum()),
        "tm": tm,
        "tk": tk,
    }


def build_graph(ui_edges, ia_edges, num_u, num_i):
    N = num_u + num_i
    ui = dense_adj(ui_edges, N)
    ia = dense_adj(ia_edges, 2 * num_u)

    # scatter_('mean', x[col], row): unweighted mean over coalesced (unique) edges.
    ia_bin = (ia > 0).astype(np.float32)
    deg = np.maximum(ia_bin.sum(axis=1, keepdims=True), 1.0)
    ia_mean = ia_bin / deg

    # GCN aggregates x[row] onto col with edge_weight = coalesced multiplicity -> out = A^T @ x
    ui_T = ui.T
    ia_T = ia.T
    # Fold the duplicated halves of X (= cat(pre, pre)) into the adjacency columns:
    # A @ [X; X] == (A[:, :H] + A[:, H:]) @ X  -- avoids materializing the concat.
    ia_T_fold = ia_T[:, :num_u] + ia_T[:, num_u:]
    ia_mean_fold = ia_mean[:, :num_u] + ia_mean[:, num_u:]

    t_ui = _select_tile(N)
    t_ia = _select_tile(2 * num_u)
    # TODO(synk): RCM/METIS-style node reordering (or low/high-degree row-block splits)
    # would compact nonzero tiles and shrink smax on power-law graphs.
    return {
        "ui_T": make_bs_operand(ui_T, t_ui, t_ui),
        "ia_T": make_bs_operand(ia_T_fold, t_ia, t_ia),
        "ia_mean": make_bs_operand(ia_mean_fold, t_ia, t_ia),
    }


if __name__ == "__main__":
    num_u, num_i, num_a, dim_E, B = 8, 8, 4, 32, 4
    alpha, beta, margin, reg_weight = 0.5, 0.1, 0.2, 1e-4

    key = jax.random.PRNGKey(0)
    k1, k2, k3, k4, k5, k6 = jax.random.split(key, 6)

    params = {
        "id_embedding": xavier_normal(k1, (num_u + num_i, dim_E)),
        "user_pre": xavier_normal(k2, (num_u, dim_E)),
        "item_pre": xavier_normal(k3, (num_i, dim_E)),
        "attribute": xavier_normal(k4, (num_a, dim_E)),  # unused in forward (parity)
    }

    def bidir(pairs):
        return np.array([(r, c) for r, c in pairs] + [(c, r) for r, c in pairs],
                        dtype=np.int64)

    # deterministic synthetic edge lists (both directions so propagation is non-trivial)
    ui_edges = bidir([(u, num_u + (u % num_i)) for u in range(num_u)]
                     + [(u, num_u + ((u + 3) % num_i)) for u in range(num_u)])
    ia_edges = bidir([(u, num_u + ((u * 3 + 1) % num_u)) for u in range(num_u)])

    graph = build_graph(ui_edges, ia_edges, num_u, num_i)

    users = jax.random.randint(k5, (B,), 0, num_u)
    user_tensor = jnp.stack([users, users], axis=1)                      # (B, 2)
    item_tensor = jax.random.randint(k6, (B, 2), num_u, num_u + num_i)   # (B, 2)

    fwd = jax.jit(functools.partial(kgcr_forward, graph=graph,
                                    num_u=num_u, num_i=num_i,
                                    alpha=alpha, margin=margin))
    loss, reg_loss = fwd(params, user_tensor, item_tensor)
    jax.block_until_ready((loss, reg_loss))

    total = reg_weight * reg_loss + loss      # same combination as KGCR.loss()
    assert bool(jnp.isfinite(total))
    print("KERNEL_OK")
</pallas_src>

<mosaic_0001>
module attributes {stable_mosaic.version = 11 : i64} {
  func.func @_bs_mm_kernel(%arg0: i32, %arg1: i32, %arg2: i32, %arg3: memref<1x1xi32, #tpu.memory_space<smem>>, %arg4: memref<1xi32, #tpu.memory_space<smem>>, %arg5: memref<256x256xbf16, #tpu.memory_space<vmem>>, %arg6: memref<256x128xbf16, #tpu.memory_space<vmem>>, %arg7: memref<256x128xbf16, #tpu.memory_space<vmem>>, %arg8: memref<256x128xf32, #tpu.memory_space<vmem>>) attributes {dimension_semantics = [#tpu.dimension_semantics<parallel>, #tpu.dimension_semantics<parallel>, #tpu.dimension_semantics<arbitrary>], iteration_bounds = array<i64: 1, 1, 1>, scalar_prefetch = 2 : i64, scratch_operands = 1 : i64, tpu.core_type = #tpu.core_type<tc>, window_params = [{transform_indices = @transform_0, window_bounds = array<i64: 256, 256>}, {pipeline_mode = #tpu.pipeline_mode<synchronous>, transform_indices = @transform_1, window_bounds = array<i64: 256, 128>}, {transform_indices = @transform_2, window_bounds = array<i64: 256, 128>}]} {
    %c0_i32 = arith.constant 0 : i32
    %0 = arith.cmpi eq, %arg2, %c0_i32 : i32
    %1 = arith.extui %0 : i1 to i32
    %c0_i32_0 = arith.constant 0 : i32
    %2 = arith.cmpi ne, %1, %c0_i32_0 : i32
    scf.if %2 {
      %cst = arith.constant 0.000000e+00 : f32
      %11 = vector.broadcast %cst : f32 to vector<256x128xf32>
      %c0 = arith.constant 0 : index
      %c0_4 = arith.constant 0 : index
      %12 = vector.load %arg8[%c0, %c0_4] : memref<256x128xf32, #tpu.memory_space<vmem>>, vector<256x128xf32>
      tpu.vector_store %arg8[%c0, %c0_4], %11 {strides = array<i32>} : memref<256x128xf32, #tpu.memory_space<vmem>>, vector<256x128xf32>,
    } else {
    }
    %3 = arith.index_cast %arg0 : i32 to index
    %4 = memref.load %arg4[%3] : memref<1xi32, #tpu.memory_space<smem>>
    %5 = arith.cmpi slt, %arg2, %4 : i32
    %6 = arith.extui %5 : i1 to i32
    %c0_i32_1 = arith.constant 0 : i32
    %7 = arith.cmpi ne, %6, %c0_i32_1 : i32
    scf.if %7 {
      %11 = arith.index_cast %arg0 : i32 to index
      %12 = arith.index_cast %arg2 : i32 to index
      %13 = memref.load %arg3[%11, %12] : memref<1x1xi32, #tpu.memory_space<smem>>
      %c256_i32 = arith.constant 256 : i32
      %14 = arith.muli %13, %c256_i32 : i32
      %15 = tpu.assume_multiple %14, 256 : i32
      %16 = arith.index_cast %15 : i32 to index
      %c0 = arith.constant 0 : index
      %17 = vector.load %arg6[%16, %c0] : memref<256x128xbf16, #tpu.memory_space<vmem>>, vector<256x128xbf16>
      %c0_4 = arith.constant 0 : index
      %c0_5 = arith.constant 0 : index
      %18 = vector.load %arg8[%c0_4, %c0_5] : memref<256x128xf32, #tpu.memory_space<vmem>>, vector<256x128xf32>
      %c0_6 = arith.constant 0 : index
      %c0_7 = arith.constant 0 : index
      %19 = vector.load %arg5[%c0_6, %c0_7] : memref<256x256xbf16, #tpu.memory_space<vmem>>, vector<256x256xbf16>
      %cst = arith.constant dense<0.000000e+00> : vector<256x128xf32>
      %20 = tpu.matmul %19, %17, %cst {dimension_numbers = #tpu.dot_dimension_numbers<[1], [0], [0], [1], [0, 0, 1, 1], [], []>} : vector<256x256xbf16>, vector<256x128xbf16>, vector<256x128xf32> -> vector<256x128xf32>
      %21 = arith.addf %18, %20 : vector<256x128xf32>
      %c0_8 = arith.constant 0 : index
      %c0_9 = arith.constant 0 : index
      %22 = vector.load %arg8[%c0_8, %c0_9] : memref<256x128xf32, #tpu.memory_space<vmem>>, vector<256x128xf32>
      tpu.vector_store %arg8[%c0_8, %c0_9], %21 {strides = array<i32>} : memref<256x128xf32, #tpu.memory_space<vmem>>, vector<256x128xf32>,
    } else {
    }
    %c0_i32_2 = arith.constant 0 : i32
    %8 = arith.cmpi eq, %arg2, %c0_i32_2 : i32
    %9 = arith.extui %8 : i1 to i32
    %c0_i32_3 = arith.constant 0 : i32
    %10 = arith.cmpi ne, %9, %c0_i32_3 : i32
    scf.if %10 {
      %c0 = arith.constant 0 : index
      %c0_4 = arith.constant 0 : index
      %11 = vector.load %arg8[%c0, %c0_4] : memref<256x128xf32, #tpu.memory_space<vmem>>, vector<256x128xf32>
      %12 = arith.truncf %11 : vector<256x128xf32> to vector<256x128xbf16>
      %c0_5 = arith.constant 0 : index
      %c0_6 = arith.constant 0 : index
      %13 = vector.load %arg7[%c0_5, %c0_6] : memref<256x128xbf16, #tpu.memory_space<vmem>>, vector<256x128xbf16>
      tpu.vector_store %arg7[%c0_5, %c0_6], %12 {strides = array<i32>} : memref<256x128xbf16, #tpu.memory_space<vmem>>, vector<256x128xbf16>,
    } else {
    }
    return
  }
  func.func @transform_0(%arg0: i32, %arg1: i32, %arg2: i32, %arg3: memref<1x1xi32, #tpu.memory_space<smem>>, %arg4: memref<1xi32, #tpu.memory_space<smem>>) -> (i32, i32) {
    %0 = arith.index_cast %arg0 : i32 to index
    %1 = arith.index_cast %arg2 : i32 to index
    %2 = memref.load %arg3[%0, %1] : memref<1x1xi32, #tpu.memory_space<smem>>
    %c0_i32 = arith.constant 0 : i32
    return %arg0, %2 : i32, i32
  }
  func.func @transform_1(%arg0: i32, %arg1: i32, %arg2: i32, %arg3: memref<1x1xi32, #tpu.memory_space<smem>>, %arg4: memref<1xi32, #tpu.memory_space<smem>>) -> (i32, i32) {
    %c0_i32 = arith.constant 0 : i32
    %c0_i32_0 = arith.constant 0 : i32
    %c0_i32_1 = arith.constant 0 : i32
    return %c0_i32, %c0_i32_0 : i32, i32
  }
  func.func @transform_2(%arg0: i32, %arg1: i32, %arg2: i32, %arg3: memref<1x1xi32, #tpu.memory_space<smem>>, %arg4: memref<1xi32, #tpu.memory_space<smem>>) -> (i32, i32) {
    %c0_i32 = arith.constant 0 : i32
    return %arg0, %arg1 : i32, i32
  }
}

module attributes {stable_mosaic.version = 11 : i64} {
  func.func @_bs_mm_kernel(%arg0: i32, %arg1: i32, %arg2: i32, %arg3: memref<1x1xi32, #tpu.memory_space<smem>>, %arg4: memref<1xi32, #tpu.memory_space<smem>>, %arg5: memref<256x256xbf16, #tpu.memory_space<vmem>>, %arg6: memref<256x128xbf16, #tpu.memory_space<vmem>>, %arg7: memref<256x128xbf16, #tpu.memory_space<vmem>>, %arg8: memref<256x128xf32, #tpu.memory_space<vmem>>) attributes {dimension_semantics = [#tpu.dimension_semantics<parallel>, #tpu.dimension_semantics<parallel>, #tpu.dimension_semantics<arbitrary>], iteration_bounds = array<i64: 1, 1, 1>, scalar_prefetch = 2 : i64, scratch_operands = 1 : i64, tpu.core_type = #tpu.core_type<tc>, window_params = [{transform_indices = @transform_0, window_bounds = array<i64: 256, 256>}, {pipeline_mode = #tpu.pipeline_mode<synchronous>, transform_indices = @transform_1, window_bounds = array<i64: 256, 128>}, {transform_indices = @transform_2, window_bounds = array<i64: 256, 128>}]} {
    %c0_i32 = arith.constant 0 : i32
    %0 = arith.cmpi eq, %arg2, %c0_i32 : i32
    %1 = arith.extui %0 : i1 to i32
    %c0_i32_0 = arith.constant 0 : i32
    %2 = arith.cmpi ne, %1, %c0_i32_0 : i32
    scf.if %2 {
      %cst = arith.constant 0.000000e+00 : f32
      %11 = vector.broadcast %cst : f32 to vector<256x128xf32>
      %c0 = arith.constant 0 : index
      %c0_4 = arith.constant 0 : index
      %12 = vector.load %arg8[%c0, %c0_4] : memref<256x128xf32, #tpu.memory_space<vmem>>, vector<256x128xf32>
      tpu.vector_store %arg8[%c0, %c0_4], %11 {strides = array<i32>} : memref<256x128xf32, #tpu.memory_space<vmem>>, vector<256x128xf32>,
    } else {
    }
    %3 = arith.index_cast %arg0 : i32 to index
    %4 = memref.load %arg4[%3] : memref<1xi32, #tpu.memory_space<smem>>
    %5 = arith.cmpi slt, %arg2, %4 : i32
    %6 = arith.extui %5 : i1 to i32
    %c0_i32_1 = arith.constant 0 : i32
    %7 = arith.cmpi ne, %6, %c0_i32_1 : i32
    scf.if %7 {
      %11 = arith.index_cast %arg0 : i32 to index
      %12 = arith.index_cast %arg2 : i32 to index
      %13 = memref.load %arg3[%11, %12] : memref<1x1xi32, #tpu.memory_space<smem>>
      %c256_i32 = arith.constant 256 : i32
      %14 = arith.muli %13, %c256_i32 : i32
      %15 = tpu.assume_multiple %14, 256 : i32
      %16 = arith.index_cast %15 : i32 to index
      %c0 = arith.constant 0 : index
      %17 = vector.load %arg6[%16, %c0] : memref<256x128xbf16, #tpu.memory_space<vmem>>, vector<256x128xbf16>
      %c0_4 = arith.constant 0 : index
      %c0_5 = arith.constant 0 : index
      %18 = vector.load %arg8[%c0_4, %c0_5] : memref<256x128xf32, #tpu.memory_space<vmem>>, vector<256x128xf32>
      %c0_6 = arith.constant 0 : index
      %c0_7 = arith.constant 0 : index
      %19 = vector.load %arg5[%c0_6, %c0_7] : memref<256x256xbf16, #tpu.memory_space<vmem>>, vector<256x256xbf16>
      %cst = arith.constant dense<0.000000e+00> : vector<256x128xf32>
      %20 = tpu.matmul %19, %17, %cst {dimension_numbers = #tpu.dot_dimension_numbers<[1], [0], [0], [1], [0, 0, 1, 1], [], []>} : vector<256x256xbf16>, vector<256x128xbf16>, vector<256x128xf32> -> vector<256x128xf32>
      %21 = arith.addf %18, %20 : vector<256x128xf32>
      %c0_8 = arith.constant 0 : index
      %c0_9 = arith.constant 0 : index
      %22 = vector.load %arg8[%c0_8, %c0_9] : memref<256x128xf32, #tpu.memory_space<vmem>>, vector<256x128xf32>
      tpu.vector_store %arg8[%c0_8, %c0_9], %21 {strides = array<i32>} : memref<256x128xf32, #tpu.memory_space<vmem>>, vector<256x128xf32>,
    } else {
    }
    %c0_i32_2 = arith.constant 0 : i32
    %8 = arith.cmpi eq, %arg2, %c0_i32_2 : i32
    %9 = arith.extui %8 : i1 to i32
    %c0_i32_3 = arith.constant 0 : i32
    %10 = arith.cmpi ne, %9, %c0_i32_3 : i32
    scf.if %10 {
      %c0 = arith.constant 0 : index
      %c0_4 = arith.constant 0 : index
      %11 = vector.load %arg8[%c0, %c0_4] : memref<256x128xf32, #tpu.memory_space<vmem>>, vector<256x128xf32>
      %12 = arith.truncf %11 : vector<256x128xf32> to vector<256x128xbf16>
      %c0_5 = arith.constant 0 : index
      %c0_6 = arith.constant 0 : index
      %13 = vector.load %arg7[%c0_5, %c0_6] : memref<256x128xbf16, #tpu.memory_space<vmem>>, vector<256x128xbf16>
      tpu.vector_store %arg7[%c0_5, %c0_6], %12 {strides = array<i32>} : memref<256x128xbf16, #tpu.memory_space<vmem>>, vector<256x128xbf16>,
    } else {
    }
    return
  }
  func.func @transform_0(%arg0: i32, %arg1: i32, %arg2: i32, %arg3: memref<1x1xi32, #tpu.memory_space<smem>>, %arg4: memref<1xi32, #tpu.memory_space<smem>>) -> (i32, i32) {
    %0 = arith.index_cast %arg0 : i32 to index
    %1 = arith.index_cast %arg2 : i32 to index
    %2 = memref.load %arg3[%0, %1] : memref<1x1xi32, #tpu.memory_space<smem>>
    %c0_i32 = arith.constant 0 : i32
    return %arg0, %2 : i32, i32
  }
  func.func @transform_1(%arg0: i32, %arg1: i32, %arg2: i32, %arg3: memref<1x1xi32, #tpu.memory_space<smem>>, %arg4: memref<1xi32, #tpu.memory_space<smem>>) -> (i32, i32) {
    %c0_i32 = arith.constant 0 : i32
    %c0_i32_0 = arith.constant 0 : i32
    %c0_i32_1 = arith.constant 0 : i32
    return %c0_i32, %c0_i32_0 : i32, i32
  }
  func.func @transform_2(%arg0: i32, %arg1: i32, %arg2: i32, %arg3: memref<1x1xi32, #tpu.memory_space<smem>>, %arg4: memref<1xi32, #tpu.memory_space<smem>>) -> (i32, i32) {
    %c0_i32 = arith.constant 0 : i32
    return %arg0, %arg1 : i32, i32
  }
}

module attributes {stable_mosaic.version = 11 : i64} {
  func.func @_bs_mm_kernel(%arg0: i32, %arg1: i32, %arg2: i32, %arg3: memref<1x1xi32, #tpu.memory_space<smem>>, %arg4: memref<1xi32, #tpu.memory_space<smem>>, %arg5: memref<256x256xbf16, #tpu.memory_space<vmem>>, %arg6: memref<256x128xbf16, #tpu.memory_space<vmem>>, %arg7: memref<256x128xf32, #tpu.memory_space<vmem>>, %arg8: memref<256x128xbf16, #tpu.memory_space<vmem>>, %arg9: memref<256x128xbf16, #tpu.memory_space<vmem>>, %arg10: memref<256x128xf32, #tpu.memory_space<vmem>>, %arg11: memref<256x128xf32, #tpu.memory_space<vmem>>) attributes {dimension_semantics = [#tpu.dimension_semantics<parallel>, #tpu.dimension_semantics<parallel>, #tpu.dimension_semantics<arbitrary>], iteration_bounds = array<i64: 1, 1, 1>, scalar_prefetch = 2 : i64, scratch_operands = 1 : i64, tpu.core_type = #tpu.core_type<tc>, window_params = [{transform_indices = @transform_0, window_bounds = array<i64: 256, 256>}, {pipeline_mode = #tpu.pipeline_mode<synchronous>, transform_indices = @transform_1, window_bounds = array<i64: 256, 128>}, {transform_indices = @transform_2, window_bounds = array<i64: 256, 128>}, {transform_indices = @transform_3, window_bounds = array<i64: 256, 128>}, {transform_indices = @transform_4, window_bounds = array<i64: 256, 128>}, {transform_indices = @transform_5, window_bounds = array<i64: 256, 128>}]} {
    %c0_i32 = arith.constant 0 : i32
    %0 = arith.cmpi eq, %arg2, %c0_i32 : i32
    %1 = arith.extui %0 : i1 to i32
    %c0_i32_0 = arith.constant 0 : i32
    %2 = arith.cmpi ne, %1, %c0_i32_0 : i32
    scf.if %2 {
      %cst = arith.constant 0.000000e+00 : f32
      %11 = vector.broadcast %cst : f32 to vector<256x128xf32>
      %c0 = arith.constant 0 : index
      %c0_4 = arith.constant 0 : index
      %12 = vector.load %arg11[%c0, %c0_4] : memref<256x128xf32, #tpu.memory_space<vmem>>, vector<256x128xf32>
      tpu.vector_store %arg11[%c0, %c0_4], %11 {strides = array<i32>} : memref<256x128xf32, #tpu.memory_space<vmem>>, vector<256x128xf32>,
    } else {
    }
    %3 = arith.index_cast %arg0 : i32 to index
    %4 = memref.load %arg4[%3] : memref<1xi32, #tpu.memory_space<smem>>
    %5 = arith.cmpi slt, %arg2, %4 : i32
    %6 = arith.extui %5 : i1 to i32
    %c0_i32_1 = arith.constant 0 : i32
    %7 = arith.cmpi ne, %6, %c0_i32_1 : i32
    scf.if %7 {
      %11 = arith.index_cast %arg0 : i32 to index
      %12 = arith.index_cast %arg2 : i32 to index
      %13 = memref.load %arg3[%11, %12] : memref<1x1xi32, #tpu.memory_space<smem>>
      %c256_i32 = arith.constant 256 : i32
      %14 = arith.muli %13, %c256_i32 : i32
      %15 = tpu.assume_multiple %14, 256 : i32
      %16 = arith.index_cast %15 : i32 to index
      %c0 = arith.constant 0 : index
      %17 = vector.load %arg6[%16, %c0] : memref<256x128xbf16, #tpu.memory_space<vmem>>, vector<256x128xbf16>
      %c0_4 = arith.constant 0 : index
      %c0_5 = arith.constant 0 : index
      %18 = vector.load %arg11[%c0_4, %c0_5] : memref<256x128xf32, #tpu.memory_space<vmem>>, vector<256x128xf32>
      %c0_6 = arith.constant 0 : index
      %c0_7 = arith.constant 0 : index
      %19 = vector.load %arg5[%c0_6, %c0_7] : memref<256x256xbf16, #tpu.memory_space<vmem>>, vector<256x256xbf16>
      %cst = arith.constant dense<0.000000e+00> : vector<256x128xf32>
      %20 = tpu.matmul %19, %17, %cst {dimension_numbers = #tpu.dot_dimension_numbers<[1], [0], [0], [1], [0, 0, 1, 1], [], []>} : vector<256x256xbf16>, vector<256x128xbf16>, vector<256x128xf32> -> vector<256x128xf32>
      %21 = arith.addf %18, %20 : vector<256x128xf32>
      %c0_8 = arith.constant 0 : index
      %c0_9 = arith.constant 0 : index
      %22 = vector.load %arg11[%c0_8, %c0_9] : memref<256x128xf32, #tpu.memory_space<vmem>>, vector<256x128xf32>
      tpu.vector_store %arg11[%c0_8, %c0_9], %21 {strides = array<i32>} : memref<256x128xf32, #tpu.memory_space<vmem>>, vector<256x128xf32>,
    } else {
    }
    %c0_i32_2 = arith.constant 0 : i32
    %8 = arith.cmpi eq, %arg2, %c0_i32_2 : i32
    %9 = arith.extui %8 : i1 to i32
    %c0_i32_3 = arith.constant 0 : i32
    %10 = arith.cmpi ne, %9, %c0_i32_3 : i32
    scf.if %10 {
      %c0 = arith.constant 0 : index
      %c0_4 = arith.constant 0 : index
      %11 = vector.load %arg11[%c0, %c0_4] : memref<256x128xf32, #tpu.memory_space<vmem>>, vector<256x128xf32>
      %c0_5 = arith.constant 0 : index
      %c0_6 = arith.constant 0 : index
      %12 = vector.load %arg7[%c0_5, %c0_6] : memref<256x128xf32, #tpu.memory_space<vmem>>, vector<256x128xf32>
      %13 = arith.addf %11, %12 : vector<256x128xf32>
      %c0_7 = arith.constant 0 : index
      %c0_8 = arith.constant 0 : index
      %14 = vector.load %arg8[%c0_7, %c0_8] : memref<256x128xbf16, #tpu.memory_space<vmem>>, vector<256x128xbf16>
      %15 = arith.extf %14 : vector<256x128xbf16> to vector<256x128xf32>
      %16 = arith.addf %13, %15 : vector<256x128xf32>
      %c0_9 = arith.constant 0 : index
      %c0_10 = arith.constant 0 : index
      %17 = vector.load %arg9[%c0_9, %c0_10] : memref<256x128xbf16, #tpu.memory_space<vmem>>, vector<256x128xbf16>
      %18 = arith.extf %17 : vector<256x128xbf16> to vector<256x128xf32>
      %19 = arith.addf %16, %18 : vector<256x128xf32>
      %cst = arith.constant 2.500000e-01 : f32
      %20 = vector.broadcast %cst : f32 to vector<256x128xf32>
      %21 = arith.mulf %19, %20 : vector<256x128xf32>
      %c0_11 = arith.constant 0 : index
      %c0_12 = arith.constant 0 : index
      %22 = vector.load %arg10[%c0_11, %c0_12] : memref<256x128xf32, #tpu.memory_space<vmem>>, vector<256x128xf32>
      tpu.vector_store %arg10[%c0_11, %c0_12], %21 {strides = array<i32>} : memref<256x128xf32, #tpu.memory_space<vmem>>, vector<256x128xf32>,
    } else {
    }
    return
  }
  func.func @transform_0(%arg0: i32, %arg1: i32, %arg2: i32, %arg3: memref<1x1xi32, #tpu.memory_space<smem>>, %arg4: memref<1xi32, #tpu.memory_space<smem>>) -> (i32, i32) {
    %0 = arith.index_cast %arg0 : i32 to index
    %1 = arith.index_cast %arg2 : i32 to index
    %2 = memref.load %arg3[%0, %1] : memref<1x1xi32, #tpu.memory_space<smem>>
    %c0_i32 = arith.constant 0 : i32
    return %arg0, %2 : i32, i32
  }
  func.func @transform_1(%arg0: i32, %arg1: i32, %arg2: i32, %arg3: memref<1x1xi32, #tpu.memory_space<smem>>, %arg4: memref<1xi32, #tpu.memory_space<smem>>) -> (i32, i32) {
    %c0_i32 = arith.constant 0 : i32
    %c0_i32_0 = arith.constant 0 : i32
    %c0_i32_1 = arith.constant 0 : i32
    return %c0_i32, %c0_i32_0 : i32, i32
  }
  func.func @transform_2(%arg0: i32, %arg1: i32, %arg2: i32, %arg3: memref<1x1xi32, #tpu.memory_space<smem>>, %arg4: memref<1xi32, #tpu.memory_space<smem>>) -> (i32, i32) {
    %c0_i32 = arith.constant 0 : i32
    return %arg0, %arg1 : i32, i32
  }
  func.func @transform_3(%arg0: i32, %arg1: i32, %arg2: i32, %arg3: memref<1x1xi32, #tpu.memory_space<smem>>, %arg4: memref<1xi32, #tpu.memory_space<smem>>) -> (i32, i32) {
    %c0_i32 = arith.constant 0 : i32
    return %arg0, %arg1 : i32, i32
  }
  func.func @transform_4(%arg0: i32, %arg1: i32, %arg2: i32, %arg3: memref<1x1xi32, #tpu.memory_space<smem>>, %arg4: memref<1xi32, #tpu.memory_space<smem>>) -> (i32, i32) {
    %c0_i32 = arith.constant 0 : i32
    return %arg0, %arg1 : i32, i32
  }
  func.func @transform_5(%arg0: i32, %arg1: i32, %arg2: i32, %arg3: memref<1x1xi32, #tpu.memory_space<smem>>, %arg4: memref<1xi32, #tpu.memory_space<smem>>) -> (i32, i32) {
    %c0_i32 = arith.constant 0 : i32
    return %arg0, %arg1 : i32, i32
  }
}

module attributes {stable_mosaic.version = 11 : i64} {
  func.func @_bs_mm_kernel(%arg0: i32, %arg1: i32, %arg2: i32, %arg3: memref<1x1xi32, #tpu.memory_space<smem>>, %arg4: memref<1xi32, #tpu.memory_space<smem>>, %arg5: memref<256x256xbf16, #tpu.memory_space<vmem>>, %arg6: memref<256x128xbf16, #tpu.memory_space<vmem>>, %arg7: memref<256x128xf32, #tpu.memory_space<vmem>>, %arg8: memref<256x128xf32, #tpu.memory_space<vmem>>, %arg9: memref<256x128xf32, #tpu.memory_space<vmem>>) attributes {dimension_semantics = [#tpu.dimension_semantics<parallel>, #tpu.dimension_semantics<parallel>, #tpu.dimension_semantics<arbitrary>], iteration_bounds = array<i64: 1, 1, 1>, scalar_prefetch = 2 : i64, scratch_operands = 1 : i64, tpu.core_type = #tpu.core_type<tc>, window_params = [{transform_indices = @transform_0, window_bounds = array<i64: 256, 256>}, {pipeline_mode = #tpu.pipeline_mode<synchronous>, transform_indices = @transform_1, window_bounds = array<i64: 256, 128>}, {transform_indices = @transform_2, window_bounds = array<i64: 256, 128>}, {transform_indices = @transform_3, window_bounds = array<i64: 256, 128>}]} {
    %c0_i32 = arith.constant 0 : i32
    %0 = arith.cmpi eq, %arg2, %c0_i32 : i32
    %1 = arith.extui %0 : i1 to i32
    %c0_i32_0 = arith.constant 0 : i32
    %2 = arith.cmpi ne, %1, %c0_i32_0 : i32
    scf.if %2 {
      %cst = arith.constant 0.000000e+00 : f32
      %11 = vector.broadcast %cst : f32 to vector<256x128xf32>
      %c0 = arith.constant 0 : index
      %c0_4 = arith.constant 0 : index
      %12 = vector.load %arg9[%c0, %c0_4] : memref<256x128xf32, #tpu.memory_space<vmem>>, vector<256x128xf32>
      tpu.vector_store %arg9[%c0, %c0_4], %11 {strides = array<i32>} : memref<256x128xf32, #tpu.memory_space<vmem>>, vector<256x128xf32>,
    } else {
    }
    %3 = arith.index_cast %arg0 : i32 to index
    %4 = memref.load %arg4[%3] : memref<1xi32, #tpu.memory_space<smem>>
    %5 = arith.cmpi slt, %arg2, %4 : i32
    %6 = arith.extui %5 : i1 to i32
    %c0_i32_1 = arith.constant 0 : i32
    %7 = arith.cmpi ne, %6, %c0_i32_1 : i32
    scf.if %7 {
      %11 = arith.index_cast %arg0 : i32 to index
      %12 = arith.index_cast %arg2 : i32 to index
      %13 = memref.load %arg3[%11, %12] : memref<1x1xi32, #tpu.memory_space<smem>>
      %c256_i32 = arith.constant 256 : i32
      %14 = arith.muli %13, %c256_i32 : i32
      %15 = tpu.assume_multiple %14, 256 : i32
      %16 = arith.index_cast %15 : i32 to index
      %c0 = arith.constant 0 : index
      %17 = vector.load %arg6[%16, %c0] : memref<256x128xbf16, #tpu.memory_space<vmem>>, vector<256x128xbf16>
      %c0_4 = arith.constant 0 : index
      %c0_5 = arith.constant 0 : index
      %18 = vector.load %arg9[%c0_4, %c0_5] : memref<256x128xf32, #tpu.memory_space<vmem>>, vector<256x128xf32>
      %c0_6 = arith.constant 0 : index
      %c0_7 = arith.constant 0 : index
      %19 = vector.load %arg5[%c0_6, %c0_7] : memref<256x256xbf16, #tpu.memory_space<vmem>>, vector<256x256xbf16>
      %cst = arith.constant dense<0.000000e+00> : vector<256x128xf32>
      %20 = tpu.matmul %19, %17, %cst {dimension_numbers = #tpu.dot_dimension_numbers<[1], [0], [0], [1], [0, 0, 1, 1], [], []>} : vector<256x256xbf16>, vector<256x128xbf16>, vector<256x128xf32> -> vector<256x128xf32>
      %21 = arith.addf %18, %20 : vector<256x128xf32>
      %c0_8 = arith.constant 0 : index
      %c0_9 = arith.constant 0 : index
      %22 = vector.load %arg9[%c0_8, %c0_9] : memref<256x128xf32, #tpu.memory_space<vmem>>, vector<256x128xf32>
      tpu.vector_store %arg9[%c0_8, %c0_9], %21 {strides = array<i32>} : memref<256x128xf32, #tpu.memory_space<vmem>>, vector<256x128xf32>,
    } else {
    }
    %c0_i32_2 = arith.constant 0 : i32
    %8 = arith.cmpi eq, %arg2, %c0_i32_2 : i32
    %9 = arith.extui %8 : i1 to i32
    %c0_i32_3 = arith.constant 0 : i32
    %10 = arith.cmpi ne, %9, %c0_i32_3 : i32
    scf.if %10 {
      %c0 = arith.constant 0 : index
      %c0_4 = arith.constant 0 : index
      %11 = vector.load %arg9[%c0, %c0_4] : memref<256x128xf32, #tpu.memory_space<vmem>>, vector<256x128xf32>
      %c0_5 = arith.constant 0 : index
      %c0_6 = arith.constant 0 : index
      %12 = vector.load %arg7[%c0_5, %c0_6] : memref<256x128xf32, #tpu.memory_space<vmem>>, vector<256x128xf32>
      %13 = arith.addf %11, %12 : vector<256x128xf32>
      %cst = arith.constant 5.000000e-01 : f32
      %14 = vector.broadcast %cst : f32 to vector<256x128xf32>
      %15 = arith.mulf %13, %14 : vector<256x128xf32>
      %c0_7 = arith.constant 0 : index
      %c0_8 = arith.constant 0 : index
      %16 = vector.load %arg8[%c0_7, %c0_8] : memref<256x128xf32, #tpu.memory_space<vmem>>, vector<256x128xf32>
      tpu.vector_store %arg8[%c0_7, %c0_8], %15 {strides = array<i32>} : memref<256x128xf32, #tpu.memory_space<vmem>>, vector<256x128xf32>,
    } else {
    }
    return
  }
  func.func @transform_0(%arg0: i32, %arg1: i32, %arg2: i32, %arg3: memref<1x1xi32, #tpu.memory_space<smem>>, %arg4: memref<1xi32, #tpu.memory_space<smem>>) -> (i32, i32) {
    %0 = arith.index_cast %arg0 : i32 to index
    %1 = arith.index_cast %arg2 : i32 to index
    %2 = memref.load %arg3[%0, %1] : memref<1x1xi32, #tpu.memory_space<smem>>
    %c0_i32 = arith.constant 0 : i32
    return %arg0, %2 : i32, i32
  }
  func.func @transform_1(%arg0: i32, %arg1: i32, %arg2: i32, %arg3: memref<1x1xi32, #tpu.memory_space<smem>>, %arg4: memref<1xi32, #tpu.memory_space<smem>>) -> (i32, i32) {
    %c0_i32 = arith.constant 0 : i32
    %c0_i32_0 = arith.constant 0 : i32
    %c0_i32_1 = arith.constant 0 : i32
    return %c0_i32, %c0_i32_0 : i32, i32
  }
  func.func @transform_2(%arg0: i32, %arg1: i32, %arg2: i32, %arg3: memref<1x1xi32, #tpu.memory_space<smem>>, %arg4: memref<1xi32, #tpu.memory_space<smem>>) -> (i32, i32) {
    %c0_i32 = arith.constant 0 : i32
    return %arg0, %arg1 : i32, i32
  }
  func.func @transform_3(%arg0: i32, %arg1: i32, %arg2: i32, %arg3: memref<1x1xi32, #tpu.memory_space<smem>>, %arg4: memref<1xi32, #tpu.memory_space<smem>>) -> (i32, i32) {
    %c0_i32 = arith.constant 0 : i32
    return %arg0, %arg1 : i32, i32
  }
}

module attributes {stable_mosaic.version = 11 : i64} {
  func.func @_loss_kernel(%arg0: memref<8x128xf32, #tpu.memory_space<vmem>>, %arg1: memref<8x128xf32, #tpu.memory_space<vmem>>, %arg2: memref<8x128xf32, #tpu.memory_space<vmem>>, %arg3: memref<8x128xf32, #tpu.memory_space<vmem>>, %arg4: memref<8x128xf32, #tpu.memory_space<vmem>>, %arg5: memref<1xf32, #tpu.memory_space<smem>>) attributes {dimension_semantics = [], scalar_prefetch = 0 : i64, scratch_operands = 0 : i64, tpu.core_type = #tpu.core_type<tc>} {
    %c0 = arith.constant 0 : index
    %c0_0 = arith.constant 0 : index
    %0 = vector.load %arg0[%c0, %c0_0] : memref<8x128xf32, #tpu.memory_space<vmem>>, vector<8x128xf32>
    %c0_1 = arith.constant 0 : index
    %c0_2 = arith.constant 0 : index
    %1 = vector.load %arg1[%c0_1, %c0_2] : memref<8x128xf32, #tpu.memory_space<vmem>>, vector<8x128xf32>
    %c0_3 = arith.constant 0 : index
    %c0_4 = arith.constant 0 : index
    %2 = vector.load %arg2[%c0_3, %c0_4] : memref<8x128xf32, #tpu.memory_space<vmem>>, vector<8x128xf32>
    %c0_5 = arith.constant 0 : index
    %c0_6 = arith.constant 0 : index
    %3 = vector.load %arg3[%c0_5, %c0_6] : memref<8x128xf32, #tpu.memory_space<vmem>>, vector<8x128xf32>
    %c0_7 = arith.constant 0 : index
    %c0_8 = arith.constant 0 : index
    %4 = vector.load %arg4[%c0_7, %c0_8] : memref<8x128xf32, #tpu.memory_space<vmem>>, vector<8x128xf32>
    %5 = arith.mulf %0, %1 : vector<8x128xf32>
    %cst = arith.constant dense<0.000000e+00> : vector<8xf32>
    %6 = vector.multi_reduction <add>, %5, %cst [1] : vector<8x128xf32> to vector<8xf32>
    %7 = vector.shape_cast %6 : vector<8xf32> to vector<8x1xf32>
    %8 = arith.mulf %2, %3 : vector<8x128xf32>
    %cst_9 = arith.constant dense<0.000000e+00> : vector<8xf32>
    %9 = vector.multi_reduction <add>, %8, %cst_9 [1] : vector<8x128xf32> to vector<8xf32>
    %10 = vector.shape_cast %9 : vector<8xf32> to vector<8x1xf32>
    %11 = arith.mulf %4, %3 : vector<8x128xf32>
    %cst_10 = arith.constant dense<0.000000e+00> : vector<8xf32>
    %12 = vector.multi_reduction <add>, %11, %cst_10 [1] : vector<8x128xf32> to vector<8xf32>
    %13 = vector.shape_cast %12 : vector<8xf32> to vector<8x1xf32>
    %14 = arith.negf %13 : vector<8x1xf32>
    %15 = math.exp %14 : vector<8x1xf32>
    %cst_11 = arith.constant 1.000000e+00 : f32
    %16 = vector.broadcast %cst_11 : f32 to vector<8x1xf32>
    %17 = arith.addf %16, %15 : vector<8x1xf32>
    %18 = arith.divf %16, %17 : vector<8x1xf32>
    %19 = arith.mulf %10, %18 : vector<8x1xf32>
    %20 = arith.addf %7, %19 : vector<8x1xf32>
    %21 = vector.extract_strided_slice %20 {offsets = [0, 0], sizes = [4, 1], strides = [1, 1]} : vector<8x1xf32> to vector<4x1xf32>
    %22 = vector.extract_strided_slice %20 {offsets = [4, 0], sizes = [4, 1], strides = [1, 1]} : vector<8x1xf32> to vector<4x1xf32>
    %23 = arith.subf %21, %22 : vector<4x1xf32>
    %24 = arith.negf %23 : vector<4x1xf32>
    %25 = math.exp %24 : vector<4x1xf32>
    %cst_12 = arith.constant 1.000000e+00 : f32
    %26 = vector.broadcast %cst_12 : f32 to vector<4x1xf32>
    %27 = arith.addf %26, %25 : vector<4x1xf32>
    %28 = arith.divf %26, %27 : vector<4x1xf32>
    %cst_13 = arith.constant 9.99999997E-7 : f32
    %29 = vector.broadcast %cst_13 : f32 to vector<4x1xf32>
    %30 = arith.maximumf %28, %29 : vector<4x1xf32>
    %31 = math.log %30 : vector<4x1xf32>
    %32 = vector.shape_cast %31 : vector<4x1xf32> to vector<1x4x1xf32>
    %cst_14 = arith.constant dense<0.000000e+00> : vector<1xf32>
    %33 = vector.multi_reduction <add>, %32, %cst_14 [1, 2] : vector<1x4x1xf32> to vector<1xf32>
    %34 = vector.shape_cast %33 : vector<1xf32> to vector<1x1x1xf32>
    %35 = vector.extract %34[0, 0, 0] : f32 from vector<1x1x1xf32>
    %cst_15 = arith.constant 4.000000e+00 : f32
    %36 = arith.divf %35, %cst_15 : f32
    %cst_16 = arith.constant 0.000000e+00 : f32
    %37 = arith.subf %cst_16, %36 : f32
    %38 = vector.extract_strided_slice %18 {offsets = [0, 0], sizes = [4, 1], strides = [1, 1]} : vector<8x1xf32> to vector<4x1xf32>
    %cst_17 = arith.constant 9.99999997E-7 : f32
    %39 = vector.broadcast %cst_17 : f32 to vector<4x1xf32>
    %40 = arith.maximumf %38, %39 : vector<4x1xf32>
    %41 = vector.extract_strided_slice %18 {offsets = [4, 0], sizes = [4, 1], strides = [1, 1]} : vector<8x1xf32> to vector<4x1xf32>
    %cst_18 = arith.constant 9.99999997E-7 : f32
    %42 = vector.broadcast %cst_18 : f32 to vector<4x1xf32>
    %43 = arith.maximumf %41, %42 : vector<4x1xf32>
    %44 = arith.subf %40, %43 : vector<4x1xf32>
    %cst_19 = arith.constant 2.000000e-01 : f32
    %45 = vector.broadcast %cst_19 : f32 to vector<4x1xf32>
    %46 = arith.subf %44, %45 : vector<4x1xf32>
    %cst_20 = arith.constant 0.000000e+00 : f32
    %47 = vector.broadcast %cst_20 : f32 to vector<4x1xf32>
    %48 = arith.maximumf %46, %47 : vector<4x1xf32>
    %49 = vector.shape_cast %48 : vector<4x1xf32> to vector<1x4x1xf32>
    %cst_21 = arith.constant dense<0.000000e+00> : vector<1xf32>
    %50 = vector.multi_reduction <add>, %49, %cst_21 [1, 2] : vector<1x4x1xf32> to vector<1xf32>
    %51 = vector.shape_cast %50 : vector<1xf32> to vector<1x1x1xf32>
    %52 = vector.extract %51[0, 0, 0] : f32 from vector<1x1x1xf32>
    %cst_22 = arith.constant 4.000000e+00 : f32
    %53 = arith.divf %52, %cst_22 : f32
    %cst_23 = arith.constant 5.000000e-01 : f32
    %54 = arith.mulf %cst_23, %53 : f32
    %55 = arith.addf %37, %54 : f32
    %c0_24 = arith.constant 0 : index
    %56 = memref.load %arg5[%c0_24] : memref<1xf32, #tpu.memory_space<smem>>
    memref.store %55, %arg5[%c0_24] : memref<1xf32, #tpu.memory_space<smem>>
    return
  }
}

module attributes {stable_mosaic.version = 11 : i64} {
  func.func @_bs_mm_kernel(%arg0: i32, %arg1: i32, %arg2: i32, %arg3: memref<1x1xi32, #tpu.memory_space<smem>>, %arg4: memref<1xi32, #tpu.memory_space<smem>>, %arg5: memref<256x256xbf16, #tpu.memory_space<vmem>>, %arg6: memref<256x128xbf16, #tpu.memory_space<vmem>>, %arg7: memref<256x128xf32, #tpu.memory_space<vmem>>, %arg8: memref<256x128xf32, #tpu.memory_space<vmem>>) attributes {dimension_semantics = [#tpu.dimension_semantics<parallel>, #tpu.dimension_semantics<parallel>, #tpu.dimension_semantics<arbitrary>], iteration_bounds = array<i64: 1, 1, 1>, scalar_prefetch = 2 : i64, scratch_operands = 1 : i64, tpu.core_type = #tpu.core_type<tc>, window_params = [{transform_indices = @transform_0, window_bounds = array<i64: 256, 256>}, {pipeline_mode = #tpu.pipeline_mode<synchronous>, transform_indices = @transform_1, window_bounds = array<i64: 256, 128>}, {transform_indices = @transform_2, window_bounds = array<i64: 256, 128>}]} {
    %c0_i32 = arith.constant 0 : i32
    %0 = arith.cmpi eq, %arg2, %c0_i32 : i32
    %1 = arith.extui %0 : i1 to i32
    %c0_i32_0 = arith.constant 0 : i32
    %2 = arith.cmpi ne, %1, %c0_i32_0 : i32
    scf.if %2 {
      %cst = arith.constant 0.000000e+00 : f32
      %11 = vector.broadcast %cst : f32 to vector<256x128xf32>
      %c0 = arith.constant 0 : index
      %c0_4 = arith.constant 0 : index
      %12 = vector.load %arg8[%c0, %c0_4] : memref<256x128xf32, #tpu.memory_space<vmem>>, vector<256x128xf32>
      tpu.vector_store %arg8[%c0, %c0_4], %11 {strides = array<i32>} : memref<256x128xf32, #tpu.memory_space<vmem>>, vector<256x128xf32>,
    } else {
    }
    %3 = arith.index_cast %arg0 : i32 to index
    %4 = memref.load %arg4[%3] : memref<1xi32, #tpu.memory_space<smem>>
    %5 = arith.cmpi slt, %arg2, %4 : i32
    %6 = arith.extui %5 : i1 to i32
    %c0_i32_1 = arith.constant 0 : i32
    %7 = arith.cmpi ne, %6, %c0_i32_1 : i32
    scf.if %7 {
      %11 = arith.index_cast %arg0 : i32 to index
      %12 = arith.index_cast %arg2 : i32 to index
      %13 = memref.load %arg3[%11, %12] : memref<1x1xi32, #tpu.memory_space<smem>>
      %c256_i32 = arith.constant 256 : i32
      %14 = arith.muli %13, %c256_i32 : i32
      %15 = tpu.assume_multiple %14, 256 : i32
      %16 = arith.index_cast %15 : i32 to index
      %c0 = arith.constant 0 : index
      %17 = vector.load %arg6[%16, %c0] : memref<256x128xbf16, #tpu.memory_space<vmem>>, vector<256x128xbf16>
      %c0_4 = arith.constant 0 : index
      %c0_5 = arith.constant 0 : index
      %18 = vector.load %arg8[%c0_4, %c0_5] : memref<256x128xf32, #tpu.memory_space<vmem>>, vector<256x128xf32>
      %c0_6 = arith.constant 0 : index
      %c0_7 = arith.constant 0 : index
      %19 = vector.load %arg5[%c0_6, %c0_7] : memref<256x256xbf16, #tpu.memory_space<vmem>>, vector<256x256xbf16>
      %cst = arith.constant dense<0.000000e+00> : vector<256x128xf32>
      %20 = tpu.matmul %19, %17, %cst {dimension_numbers = #tpu.dot_dimension_numbers<[1], [0], [0], [1], [0, 0, 1, 1], [], []>} : vector<256x256xbf16>, vector<256x128xbf16>, vector<256x128xf32> -> vector<256x128xf32>
      %21 = arith.addf %18, %20 : vector<256x128xf32>
      %c0_8 = arith.constant 0 : index
      %c0_9 = arith.constant 0 : index
      %22 = vector.load %arg8[%c0_8, %c0_9] : memref<256x128xf32, #tpu.memory_space<vmem>>, vector<256x128xf32>
      tpu.vector_store %arg8[%c0_8, %c0_9], %21 {strides = array<i32>} : memref<256x128xf32, #tpu.memory_space<vmem>>, vector<256x128xf32>,
    } else {
    }
    %c0_i32_2 = arith.constant 0 : i32
    %8 = arith.cmpi eq, %arg2, %c0_i32_2 : i32
    %9 = arith.extui %8 : i1 to i32
    %c0_i32_3 = arith.constant 0 : i32
    %10 = arith.cmpi ne, %9, %c0_i32_3 : i32
    scf.if %10 {
      %c0 = arith.constant 0 : index
      %c0_4 = arith.constant 0 : index
      %11 = vector.load %arg8[%c0, %c0_4] : memref<256x128xf32, #tpu.memory_space<vmem>>, vector<256x128xf32>
      %c0_5 = arith.constant 0 : index
      %c0_6 = arith.constant 0 : index
      %12 = vector.load %arg7[%c0_5, %c0_6] : memref<256x128xf32, #tpu.memory_space<vmem>>, vector<256x128xf32>
      tpu.vector_store %arg7[%c0_5, %c0_6], %11 {strides = array<i32>} : memref<256x128xf32, #tpu.memory_space<vmem>>, vector<256x128xf32>,
    } else {
    }
    return
  }
  func.func @transform_0(%arg0: i32, %arg1: i32, %arg2: i32, %arg3: memref<1x1xi32, #tpu.memory_space<smem>>, %arg4: memref<1xi32, #tpu.memory_space<smem>>) -> (i32, i32) {
    %0 = arith.index_cast %arg0 : i32 to index
    %1 = arith.index_cast %arg2 : i32 to index
    %2 = memref.load %arg3[%0, %1] : memref<1x1xi32, #tpu.memory_space<smem>>
    %c0_i32 = arith.constant 0 : i32
    return %arg0, %2 : i32, i32
  }
  func.func @transform_1(%arg0: i32, %arg1: i32, %arg2: i32, %arg3: memref<1x1xi32, #tpu.memory_space<smem>>, %arg4: memref<1xi32, #tpu.memory_space<smem>>) -> (i32, i32) {
    %c0_i32 = arith.constant 0 : i32
    %c0_i32_0 = arith.constant 0 : i32
    %c0_i32_1 = arith.constant 0 : i32
    return %c0_i32, %c0_i32_0 : i32, i32
  }
  func.func @transform_2(%arg0: i32, %arg1: i32, %arg2: i32, %arg3: memref<1x1xi32, #tpu.memory_space<smem>>, %arg4: memref<1xi32, #tpu.memory_space<smem>>) -> (i32, i32) {
    %c0_i32 = arith.constant 0 : i32
    return %arg0, %arg1 : i32, i32
  }
}

module attributes {stable_mosaic.version = 11 : i64} {
  func.func @_ssq_kernel(%arg0: i32, %arg1: memref<8x128xf32, #tpu.memory_space<vmem>>, %arg2: memref<1xf32, #tpu.memory_space<smem>>, %arg3: memref<8x128xf32, #tpu.memory_space<vmem>>) attributes {dimension_semantics = [#tpu.dimension_semantics<arbitrary>], iteration_bounds = array<i64: 1>, scalar_prefetch = 0 : i64, scratch_operands = 1 : i64, tpu.core_type = #tpu.core_type<tc>, window_params = [{transform_indices = @transform_0, window_bounds = array<i64: 8, 128>}, {transform_indices = @transform_1, window_bounds = array<i64: 1>}]} {
    %c0_i32 = arith.constant 0 : i32
    %0 = arith.cmpi eq, %arg0, %c0_i32 : i32
    %1 = arith.extui %0 : i1 to i32
    %c0_i32_0 = arith.constant 0 : i32
    %2 = arith.cmpi ne, %1, %c0_i32_0 : i32
    scf.if %2 {
      %cst = arith.constant 0.000000e+00 : f32
      %11 = vector.broadcast %cst : f32 to vector<8x128xf32>
      %c0_8 = arith.constant 0 : index
      %c0_9 = arith.constant 0 : index
      %12 = vector.load %arg3[%c0_8, %c0_9] : memref<8x128xf32, #tpu.memory_space<vmem>>, vector<8x128xf32>
      tpu.vector_store %arg3[%c0_8, %c0_9], %11 {strides = array<i32>} : memref<8x128xf32, #tpu.memory_space<vmem>>, vector<8x128xf32>,
    } else {
    }
    %c0 = arith.constant 0 : index
    %c0_1 = arith.constant 0 : index
    %3 = vector.load %arg1[%c0, %c0_1] : memref<8x128xf32, #tpu.memory_space<vmem>>, vector<8x128xf32>
    %c0_2 = arith.constant 0 : index
    %c0_3 = arith.constant 0 : index
    %4 = vector.load %arg3[%c0_2, %c0_3] : memref<8x128xf32, #tpu.memory_space<vmem>>, vector<8x128xf32>
    %5 = arith.mulf %3, %3 : vector<8x128xf32>
    %6 = arith.addf %4, %5 : vector<8x128xf32>
    %c0_4 = arith.constant 0 : index
    %c0_5 = arith.constant 0 : index
    %7 = vector.load %arg3[%c0_4, %c0_5] : memref<8x128xf32, #tpu.memory_space<vmem>>, vector<8x128xf32>
    tpu.vector_store %arg3[%c0_4, %c0_5], %6 {strides = array<i32>} : memref<8x128xf32, #tpu.memory_space<vmem>>, vector<8x128xf32>,
    %c0_i32_6 = arith.constant 0 : i32
    %8 = arith.cmpi eq, %arg0, %c0_i32_6 : i32
    %9 = arith.extui %8 : i1 to i32
    %c0_i32_7 = arith.constant 0 : i32
    %10 = arith.cmpi ne, %9, %c0_i32_7 : i32
    scf.if %10 {
      %c0_8 = arith.constant 0 : index
      %c0_9 = arith.constant 0 : index
      %11 = vector.load %arg3[%c0_8, %c0_9] : memref<8x128xf32, #tpu.memory_space<vmem>>, vector<8x128xf32>
      %12 = vector.shape_cast %11 : vector<8x128xf32> to vector<1x8x128xf32>
      %cst = arith.constant dense<0.000000e+00> : vector<1xf32>
      %13 = vector.multi_reduction <add>, %12, %cst [1, 2] : vector<1x8x128xf32> to vector<1xf32>
      %14 = vector.shape_cast %13 : vector<1xf32> to vector<1x1x1xf32>
      %15 = vector.extract %14[0, 0, 0] : f32 from vector<1x1x1xf32>
      %c0_10 = arith.constant 0 : index
      %16 = memref.load %arg2[%c0_10] : memref<1xf32, #tpu.memory_space<smem>>
      memref.store %15, %arg2[%c0_10] : memref<1xf32, #tpu.memory_space<smem>>
    } else {
    }
    return
  }
  func.func @transform_0(%arg0: i32) -> (i32, i32) {
    %c0_i32 = arith.constant 0 : i32
    %c0_i32_0 = arith.constant 0 : i32
    return %arg0, %c0_i32 : i32, i32
  }
  func.func @transform_1(%arg0: i32) -> i32 {
    %c0_i32 = arith.constant 0 : i32
    %c0_i32_0 = arith.constant 0 : i32
    return %c0_i32 : i32
  }
}

</mosaic_0001>

<bundles_post_ra>
// kernel: kgcr_forward.9
= control target key start
LH: loop header
LB: loop body
LE: loop exit
PB: predicated region body
PF: predicated region fallthrough
CT: control target
= control target key end

     0   :  { %s1296_s0 = inlined_call_operand.<no memory space> [shape: s32[1,1], index: 0, kind: input, shape index: {}]   ;;  %s1297_s1 = inlined_call_operand.<no memory space> [shape: s32[1], index: 1, kind: input, shape index: {}]   ;;  %s1298_s2 = inlined_call_operand.hbm [shape: bf16[256,256], index: 2, kind: input, shape index: {}]   ;;  %s1299_s3 = inlined_call_operand.vmem [shape: bf16[256,128], index: 3, kind: input, shape index: {}]   ;;  %s1300_s4 = inlined_call_operand.vmem [shape: bf16[256,128], index: 4, kind: output, shape index: {}]  }
   0x1   :  { %9 = sst [smem:[#allocation4]] %s1296_s0 }
   0x2   :  { %11 = vsyncpa [#allocation7], 0  ;;  %s17_s17 = sld [smem:[#allocation4]]  ;;  %s1183_s18 = smov [#allocation6]  }
   0x3   :  { %s25_s19 = sshll.u32 %s1183_s18, 4  ;;  %s1161_s0 = scalar_lea.hbm %s1298_s2, 256  ;;  %s26_s19 = int_to_ptr.vmem [resolvable:$true] %s25_s19 }
   0x8   :  { %s993_s20 = sshll.u32 %s17_s17, 3 }
   0x9   :  { %s22_s23 = scalar_lea.hbm %s1298_s2, %s993_s20 }
   0xa   :  { %s23_s24 = sshll.u32 %s22_s23, 4  ;;  %s24_s24 = int_to_ptr.hbm [resolvable:$true] %s23_s24 }
   0xb   :  { %s1157_s25 = sshra.s32 %s24_s24, 4  ;;  %s1158_s25 = int_to_ptr.hbm [resolvable:$true] %s1157_s25 }
   0xc   :  { %s1159_s26 = scalar_lea.hbm %s1158_s25, 256  ;;  %p1162_p1 = scmp.lt.s32.totalorder %s1158_s25, %s1298_s2 }
   0xd   :  { %p1160_p0 = scmp.ne.s32.totalorder %s1158_s25, %s1159_s26  ;;  %p1163_p2 = scmp.lt.s32.totalorder %s1161_s0, %s1159_s26 }
   0xf   :  { %p1164_p3 = por %p1163_p2, %p1162_p1 }
  0x11   :  { %p1165_p4 = pnand %p1164_p3, %p1160_p0 }
  0x13   :  { %1168 = shalt.err (!%p1165_p4)
}
  0x14   :  { %s1184_s5 = smov 128   ;;  %s1185_s6 = smov 8  }
  0x15   :  { %31 = dma.hbm_to_vmem [thread:$0]  %s24_s24, 4096, %s26_s19, [#allocation7], %s1184_s5, %s1184_s5, %s1185_s6  }
  0x16   :  { %1181 = dma.done.wait [#allocation7], 4096  }
  0x17   :  { %1182 = vsyncadd [#allocation7], 4294963200  ;;  %v1186_v0 = vmov 0.0   ;;  %p798_p5 = scmp.le.s32.totalorder %s1297_s1, 0 }
  0x18   :  { %47 = vst [vmem:[#allocation2 + $0xb0] sm:$0xff] %v1186_v0  ;;  %s87_s8 = sld [smem:[#allocation4]] (!%p798_p5) }
  0x19   :  { %48 = vst [vmem:[#allocation2] sm:$0xff] %v1186_v0 }
  0x1a   :  { %49 = vst [vmem:[#allocation2 + $0xd8] sm:$0xff] %v1186_v0 }
  0x1b   :  { %50 = vst [vmem:[#allocation2 + $0x18] sm:$0xff] %v1186_v0 }
  0x1c   :  { %51 = vst [vmem:[#allocation2 + $0x50] sm:$0xff] %v1186_v0 }
  0x1d   :  { %52 = vst [vmem:[#allocation2 + $0x68] sm:$0xff] %v1186_v0 }
  0x1e   :  { %53 = vst [vmem:[#allocation2 + $0x30] sm:$0xff] %v1186_v0  ;;  %s799_s9 = sshll.u32 (!%p798_p5), %s87_s8, 8 }
  0x1f   :  { %54 = vst [vmem:[#allocation2 + $0x48] sm:$0xff] %v1186_v0  ;;  %s89_s10 = sshra.s32 (!%p798_p5), %s799_s9, 3 }
  0x20   :  { %55 = vst [vmem:[#allocation2 + $0x80] sm:$0xff] %v1186_v0  ;;  %s800_s11 = sshll.u32 (!%p798_p5), %s89_s10, 2 }
  0x21   :  { %56 = vst [vmem:[#allocation2 + $0x88] sm:$0xff] %v1186_v0  ;;  %s1230_s14 = scalar_lea.vmem (!%p798_p5), %s1299_s3, %s800_s11 }
  0x22   :  { %57 = vst [vmem:[#allocation2 + $0xe8] sm:$0xff] %v1186_v0 }
  0x23   :  { %58 = vst [vmem:[#allocation2 + $0xb8] sm:$0xff] %v1186_v0 }
  0x24   :  { %59 = vst [vmem:[#allocation2 + $0x60] sm:$0xff] %v1186_v0 }
  0x25   :  { %60 = vst [vmem:[#allocation2 + $0xf0] sm:$0xff] %v1186_v0 }
  0x26   :  { %61 = vst [vmem:[#allocation2 + $0x8] sm:$0xff] %v1186_v0 }
  0x27   :  { %62 = vst [vmem:[#allocation2 + $0x78] sm:$0xff] %v1186_v0 }
  0x28   :  { %63 = vst [vmem:[#allocation2 + $0x38] sm:$0xff] %v1186_v0 }
  0x29   :  { %64 = vst [vmem:[#allocation2 + $0x58] sm:$0xff] %v1186_v0 }
  0x2a   :  { %65 = vst [vmem:[#allocation2 + $0x40] sm:$0xff] %v1186_v0 }
  0x2b   :  { %66 = vst [vmem:[#allocation2 + $0xc8] sm:$0xff] %v1186_v0 }
  0x2c   :  { %67 = vst [vmem:[#allocation2 + $0xe0] sm:$0xff] %v1186_v0 }
  0x2d   :  { %68 = vst [vmem:[#allocation2 + $0x90] sm:$0xff] %v1186_v0 }
  0x2e   :  { %69 = vst [vmem:[#allocation2 + $0x70] sm:$0xff] %v1186_v0 }
  0x2f   :  { %70 = vst [vmem:[#allocation2 + $0xc0] sm:$0xff] %v1186_v0 }
  0x30   :  { %71 = vst [vmem:[#allocation2 + $0xa8] sm:$0xff] %v1186_v0 }
  0x31   :  { %72 = vst [vmem:[#allocation2 + $0xd0] sm:$0xff] %v1186_v0 }
  0x32   :  { %73 = vst [vmem:[#allocation2 + $0x10] sm:$0xff] %v1186_v0 }
  0x33   :  { %74 = vst [vmem:[#allocation2 + $0x28] sm:$0xff] %v1186_v0  ;;  %83 = sbr.rel (%p798_p5) target bundleno = 346 (0x15a), region = 21 }
  0x34   :  { %75 = vst [vmem:[#allocation2 + $0xa0] sm:$0xff] %v1186_v0 }
  0x35   :  { %76 = vst [vmem:[#allocation2 + $0xf8] sm:$0xff] %v1186_v0 }
  0x36   :  { %77 = vst [vmem:[#allocation2 + $0x20] sm:$0xff] %v1186_v0 }
  0x37   :  { %78 = vst [vmem:[#allocation2 + $0x98] sm:$0xff] %v1186_v0 }
  0x38   :  { %v1001_v1 = vld [vmem:[%s1230_s14 + $0x38] sm:$0xff]  ;;  %v1000_v3 = vld [vmem:[%s1230_s14 + $0x30] sm:$0xff]  ;;  %v999_v5 = vld [vmem:[%s1230_s14 + $0x28] sm:$0xff] }
  0x39   :  { %v1009_v2 = vld [vmem:[%s1230_s14 + $0x78] sm:$0xff]  ;;  %445 = vmatpush.bf16.msra.mxu0 %v1001_v1  ;;  %1137 = vmatpush.bf16.msra.mxu2 %v1001_v1  ;;  %v1008_v4 = vld [vmem:[%s1230_s14 + $0x70] sm:$0xff]  ;;  %v1007_v6 = vld [vmem:[%s1230_s14 + $0x68] sm:$0xff] }
  0x3a   :  { %534 = vmatpush.bf16.msra.mxu1 %v1009_v2  ;;  %1145 = vmatpush.bf16.msra.mxu3 %v1009_v2  ;;  %v998_v7 = vld [vmem:[%s1230_s14 + $0x20] sm:$0xff]  ;;  %v997_v9 = vld [vmem:[%s1230_s14 + $0x18] sm:$0xff]  ;;  %v996_v11 = vld [vmem:[%s1230_s14 + $0x10] sm:$0xff] }
  0x3b   :  { %v1006_v8 = vld [vmem:[%s1230_s14 + $0x60] sm:$0xff]  ;;  %v1005_v10 = vld [vmem:[%s1230_s14 + $0x58] sm:$0xff]  ;;  %v1004_v12 = vld [vmem:[%s1230_s14 + $0x50] sm:$0xff] }
  0x3c   :  { %v995_v13 = vld [vmem:[%s1230_s14 + $0x8] sm:$0xff]  ;;  %v803_v15 = vld [vmem:[#allocation6] sm:$0xf]  ;;  %v1010_v21 = vld [vmem:[#allocation6 + $0x4] sm:$0xf] }
  0x3d   :  { %446 = vmatpush.bf16.msra.mxu0 %v1000_v3  ;;  %1138 = vmatpush.bf16.msra.mxu2 %v1000_v3  ;;  %v1003_v14 = vld [vmem:[%s1230_s14 + $0x48] sm:$0xff]  ;;  %v994_v16 = vld [vmem:[%s1230_s14] sm:$0xff]  ;;  %v811_v29 = vld [vmem:[#allocation6 + $0x10] sm:$0xf] }
  0x3e   :  { %535 = vmatpush.bf16.msra.mxu1 %v1008_v4  ;;  %1146 = vmatpush.bf16.msra.mxu3 %v1008_v4  ;;  %v1011_v17 = vld [vmem:[#allocation6 + $0x4] sm:$0xf0]  ;;  %v867_v18 = vld [vmem:[#allocation6 + $0x80] sm:$0xf]  ;;  %v805_v22 = vld [vmem:[#allocation6 + $0x8] sm:$0xf0] }
  0x3f   :  { %v1002_v19 = vld [vmem:[%s1230_s14 + $0x40] sm:$0xff]  ;;  %v1027_v20 = vld [vmem:[#allocation6 + $0x84] sm:$0xf0]  ;;  %v869_v24 = vld [vmem:[#allocation6 + $0x88] sm:$0xf0]  ;;  %v804_v25 = vor.u32 %v1011_v17, %v803_v15  ;;  %v808_v27 = vor.u32 %v1010_v21, %v805_v22 }
  0x40   :  { %v1026_v23 = vld [vmem:[#allocation6 + $0x84] sm:$0xf]  ;;  %v868_v26 = vor.u32 %v1027_v20, %v867_v18  ;;  %v1013_v30 = vld [vmem:[#allocation6 + $0x14] sm:$0xf0]  ;;  %v875_v31 = vld [vmem:[#allocation6 + $0x90] sm:$0xf] }
  0x41   :  { %447 = vmatpush.bf16.msra.mxu0 %v999_v5  ;;  %1139 = vmatpush.bf16.msra.mxu2 %v999_v5  ;;  %v872_v28 = vor.u32 %v1026_v23, %v869_v24  ;;  %v1029_v32 = vld [vmem:[#allocation6 + $0x94] sm:$0xf0]  ;;  %v1012_v33 = vld [vmem:[#allocation6 + $0x14] sm:$0xf]  ;;  %v813_v34 = vld [vmem:[#allocation6 + $0x18] sm:$0xf0]  ;;  %v812_v37 = vor.u32 %v1013_v30, %v811_v29 }
  0x42   :  { %536 = vmatpush.bf16.msra.mxu1 %v1007_v6  ;;  %1147 = vmatpush.bf16.msra.mxu3 %v1007_v6  ;;  %v1028_v35 = vld [vmem:[#allocation6 + $0x94] sm:$0xf]  ;;  %v877_v36 = vld [vmem:[#allocation6 + $0x98] sm:$0xf0]  ;;  %v876_v38 = vor.u32 %v1029_v32, %v875_v31  ;;  %v816_v39 = vor.u32 %v1012_v33, %v813_v34  ;;  %v819_v41 = vld [vmem:[#allocation6 + $0x20] sm:$0xf] }
  0x43   :  { %v880_v40 = vor.u32 %v1028_v35, %v877_v36  ;;  %v1015_v42 = vld [vmem:[#allocation6 + $0x24] sm:$0xf0]  ;;  %v883_v43 = vld [vmem:[#allocation6 + $0xa0] sm:$0xf]  ;;  %v1014_v45 = vld [vmem:[#allocation6 + $0x24] sm:$0xf] }
  0x44   :  { %v1031_v44 = vld [vmem:[#allocation6 + $0xa4] sm:$0xf0]  ;;  %v821_v46 = vld [vmem:[#allocation6 + $0x28] sm:$0xf0]  ;;  %v1030_v47 = vld [vmem:[#allocation6 + $0xa4] sm:$0xf]  ;;  %v820_v49 = vor.u32 %v1015_v42, %v819_v41 }
  0x45   :  { %448 = vmatpush.bf16.msra.mxu0 %v998_v7  ;;  %1140 = vmatpush.bf16.msra.mxu2 %v998_v7  ;;  %v885_v48 = vld [vmem:[#allocation6 + $0xa8] sm:$0xf0]  ;;  %v884_v50 = vor.u32 %v1031_v44, %v883_v43  ;;  %v824_v51 = vor.u32 %v1014_v45, %v821_v46  ;;  %v827_v53 = vld [vmem:[#allocation6 + $0x30] sm:$0xf]  ;;  %v1017_v54 = vld [vmem:[#allocation6 + $0x34] sm:$0xf0] }
  0x46   :  { %537 = vmatpush.bf16.msra.mxu1 %v1006_v8  ;;  %1148 = vmatpush.bf16.msra.mxu3 %v1006_v8  ;;  %v888_v52 = vor.u32 %v1030_v47, %v885_v48  ;;  %v891_v55 = vld [vmem:[#allocation6 + $0xb0] sm:$0xf]  ;;  %v1033_v56 = vld [vmem:[#allocation6 + $0xb4] sm:$0xf0]  ;;  %v1016_v57 = vld [vmem:[#allocation6 + $0x34] sm:$0xf]  ;;  %v828_v61 = vor.u32 %v1017_v54, %v827_v53 }
  0x47   :  { %v829_v58 = vld [vmem:[#allocation6 + $0x38] sm:$0xf0]  ;;  %v1032_v59 = vld [vmem:[#allocation6 + $0xb4] sm:$0xf]  ;;  %v892_v62 = vor.u32 %v1033_v56, %v891_v55  ;;  %v835_v1 = vld [vmem:[#allocation6 + $0x40] sm:$0xf] }
  0x48   :  { %v893_v60 = vld [vmem:[#allocation6 + $0xb8] sm:$0xf0]  ;;  %v832_v63 = vor.u32 %v1016_v57, %v829_v58  ;;  %v1019_v2 = vld [vmem:[#allocation6 + $0x44] sm:$0xf0]  ;;  %v899_v3 = vld [vmem:[#allocation6 + $0xc0] sm:$0xf] }
  0x49   :  { %449 = vmatpush.bf16.msra.mxu0 %v997_v9  ;;  %1141 = vmatpush.bf16.msra.mxu2 %v997_v9  ;;  %v896_v0 = vor.u32 %v1032_v59, %v893_v60  ;;  %v1035_v4 = vld [vmem:[#allocation6 + $0xc4] sm:$0xf0]  ;;  %v1018_v5 = vld [vmem:[#allocation6 + $0x44] sm:$0xf]  ;;  %v837_v6 = vld [vmem:[#allocation6 + $0x48] sm:$0xf0]  ;;  %v836_v9 = vor.u32 %v1019_v2, %v835_v1 }
  0x4a   :  { %538 = vmatpush.bf16.msra.mxu1 %v1005_v10  ;;  %1149 = vmatpush.bf16.msra.mxu3 %v1005_v10  ;;  %v1034_v7 = vld [vmem:[#allocation6 + $0xc4] sm:$0xf]  ;;  %v901_v8 = vld [vmem:[#allocation6 + $0xc8] sm:$0xf0]  ;;  %v900_v10 = vor.u32 %v1035_v4, %v899_v3  ;;  %v907_v15 = vld [vmem:[#allocation6 + $0xd0] sm:$0xf] }
  0x4b   :  { %v1020_v17 = vld [vmem:[#allocation6 + $0x54] sm:$0xf]  ;;  %v845_v18 = vld [vmem:[#allocation6 + $0x58] sm:$0xf0]  ;;  %v1022_v29 = vld [vmem:[#allocation6 + $0x64] sm:$0xf] }
  0x4c   :  { %v909_v20 = vld [vmem:[#allocation6 + $0xd8] sm:$0xf0]  ;;  %v848_v23 = vor.u32 %v1020_v17, %v845_v18  ;;  %v853_v30 = vld [vmem:[#allocation6 + $0x68] sm:$0xf0]  ;;  %v1038_v31 = vld [vmem:[#allocation6 + $0xe4] sm:$0xf] }
  0x4d   :  { %450 = vmatpush.bf16.msra.mxu0 %v996_v11  ;;  %1142 = vmatpush.bf16.msra.mxu2 %v996_v11  ;;  %v840_v11 = vor.u32 %v1018_v5, %v837_v6  ;;  %v917_v32 = vld [vmem:[#allocation6 + $0xe8] sm:$0xf0]  ;;  %v856_v35 = vor.u32 %v1022_v29, %v853_v30  ;;  %v1024_v41 = vld [vmem:[#allocation6 + $0x74] sm:$0xf]  ;;  %v861_v42 = vld [vmem:[#allocation6 + $0x78] sm:$0xf0] }
  0x4e   :  { %539 = vmatpush.bf16.msra.mxu1 %v1004_v12  ;;  %1150 = vmatpush.bf16.msra.mxu3 %v1004_v12  ;;  %v904_v12 = vor.u32 %v1034_v7, %v901_v8  ;;  %v920_v36 = vor.u32 %v1038_v31, %v917_v32  ;;  %v1040_v43 = vld [vmem:[#allocation6 + $0xf4] sm:$0xf]  ;;  %v925_v44 = vld [vmem:[#allocation6 + $0xf8] sm:$0xf0]  ;;  %v864_v47 = vor.u32 %v1024_v41, %v861_v42  ;;  %v126_v59 = vld [vmem:[#allocation2] sm:$0xff] }
  0x4f   :  { %v928_v48 = vor.u32 %v1040_v43, %v925_v44  ;;  %v141_v55 = vld [vmem:[#allocation2 + $0x38] sm:$0xff]  ;;  %v145_v31 = vld [vmem:[#allocation2 + $0xe0] sm:$0xff]  ;;  %v146_v41 = vld [vmem:[#allocation2 + $0x90] sm:$0xff] }
  0x50   :  { %v142_v1 = vld [vmem:[#allocation2 + $0x58] sm:$0xff] }
  0x51   :  { %451 = vmatpush.bf16.msra.mxu0 %v995_v13  ;;  %1143 = vmatpush.bf16.msra.mxu2 %v995_v13  ;;  %v843_v13 = vld [vmem:[#allocation6 + $0x50] sm:$0xf]  ;;  %v127_v5 = vld [vmem:[#allocation2 + $0xd8] sm:$0xff] }
  0x52   :  { %540 = vmatpush.bf16.msra.mxu1 %v1003_v14  ;;  %1151 = vmatpush.bf16.msra.mxu3 %v1003_v14  ;;  %v1021_v14 = vld [vmem:[#allocation6 + $0x54] sm:$0xf0] }
  0x53   :  { %v844_v21 = vor.u32 %v1021_v14, %v843_v13 }
  0x55   :  { %452 = vmatpush.bf16.msra.mxu0 %v994_v16  ;;  %1144 = vmatpush.bf16.msra.mxu2 %v994_v16  ;;  %v1037_v16 = vld [vmem:[#allocation6 + $0xd4] sm:$0xf0] }
  0x56   :  { %541 = vmatpush.bf16.msra.mxu1 %v1002_v19  ;;  %1152 = vmatpush.bf16.msra.mxu3 %v1002_v19  ;;  %v1036_v19 = vld [vmem:[#allocation6 + $0xd4] sm:$0xf]  ;;  %v908_v22 = vor.u32 %v1037_v16, %v907_v15  ;;  %v128_v15 = vld [vmem:[#allocation2 + $0x18] sm:$0xff] }
  0x57   :  { %v912_v24 = vor.u32 %v1036_v19, %v909_v20 }
  0x58   :  { %453 = vmatmul.bf16.vlgmr.msra.gmra.mxu0 %v804_v25  ;;  %493 = vmatmul.bf16.vlgmr.msra.gmra.mxu2 %v868_v26  ;;  %v851_v25 = vld [vmem:[#allocation6 + $0x60] sm:$0xf]  ;;  %v1023_v26 = vld [vmem:[#allocation6 + $0x64] sm:$0xf0] }
  0x59   :  { %542 = vmatmul.bf16.vlgmr.msra.gmra.mxu1 %v808_v27  ;;  %582 = vmatmul.bf16.vlgmr.msra.gmra.mxu3 %v872_v28  ;;  %v915_v27 = vld [vmem:[#allocation6 + $0xe0] sm:$0xf]  ;;  %v1039_v28 = vld [vmem:[#allocation6 + $0xe4] sm:$0xf0]  ;;  %v852_v33 = vor.u32 %v1023_v26, %v851_v25  ;;  %v129_v25 = vld [vmem:[#allocation2 + $0x50] sm:$0xff] }
  0x5a   :  { %v916_v34 = vor.u32 %v1039_v28, %v915_v27 }
  0x68   :  { %458 = vmatmul.bf16.gmra.mxu0 %v812_v37  ;;  %498 = vmatmul.bf16.gmra.mxu2 %v876_v38  ;;  %v859_v37 = vld [vmem:[#allocation6 + $0x70] sm:$0xf]  ;;  %v1025_v38 = vld [vmem:[#allocation6 + $0x74] sm:$0xf0] }
  0x69   :  { %547 = vmatmul.bf16.gmra.mxu1 %v816_v39  ;;  %587 = vmatmul.bf16.gmra.mxu3 %v880_v40  ;;  %v923_v39 = vld [vmem:[#allocation6 + $0xf0] sm:$0xf]  ;;  %v1041_v40 = vld [vmem:[#allocation6 + $0xf4] sm:$0xf0]  ;;  %v860_v45 = vor.u32 %v1025_v38, %v859_v37 }
  0x6a   :  { %v924_v46 = vor.u32 %v1041_v40, %v923_v39 }
  0x78   :  { %463 = vmatmul.bf16.gmra.mxu0 %v820_v49  ;;  %503 = vmatmul.bf16.gmra.mxu2 %v884_v50  ;;  %v125_v50 = vld [vmem:[#allocation2 + $0xb0] sm:$0xff] }
  0x79   :  { %552 = vmatmul.bf16.gmra.mxu1 %v824_v51  ;;  %592 = vmatmul.bf16.gmra.mxu3 %v888_v52 }
  0x88   :  { %468 = vmatmul.bf16.gmra.mxu0 %v828_v61  ;;  %508 = vmatmul.bf16.gmra.mxu2 %v892_v62 }
  0x89   :  { %557 = vmatmul.bf16.gmra.mxu1 %v832_v63  ;;  %597 = vmatmul.bf16.gmra.mxu3 %v896_v0 }
  0x98   :  { %473 = vmatmul.bf16.gmra.mxu0 %v836_v9  ;;  %513 = vmatmul.bf16.gmra.mxu2 %v900_v10 }
  0x99   :  { %562 = vmatmul.bf16.gmra.mxu1 %v840_v11  ;;  %602 = vmatmul.bf16.gmra.mxu3 %v904_v12  ;;  %v143_v11 = vld [vmem:[#allocation2 + $0x40] sm:$0xff] }
  0xa8   :  { %478 = vmatmul.bf16.gmra.mxu0 %v844_v21  ;;  %518 = vmatmul.bf16.gmra.mxu2 %v908_v22  ;;  %v144_v21 = vld [vmem:[#allocation2 + $0xc8] sm:$0xff] }
  0xa9   :  { %567 = vmatmul.bf16.gmra.mxu1 %v848_v23  ;;  %607 = vmatmul.bf16.gmra.mxu3 %v912_v24 }
  0xb8   :  { %483 = vmatmul.bf16.gmra.mxu0 %v852_v33  ;;  %523 = vmatmul.bf16.gmra.mxu2 %v916_v34 }
  0xb9   :  { %572 = vmatmul.bf16.gmra.mxu1 %v856_v35  ;;  %612 = vmatmul.bf16.gmra.mxu3 %v920_v36  ;;  %v130_v35 = vld [vmem:[#allocation2 + $0x68] sm:$0xff] }
  0xc8   :  { %488 = vmatmul.bf16.gmra.mxu0 %v860_v45  ;;  %528 = vmatmul.bf16.gmra.mxu2 %v924_v46  ;;  %v131_v45 = vld [vmem:[#allocation2 + $0x30] sm:$0xff] }
  0xc9   :  { %577 = vmatmul.bf16.gmra.mxu1 %v864_v47  ;;  %617 = vmatmul.bf16.gmra.mxu3 %v928_v48 }
  0xd5   :  { %v454_v49 = vpop.f32.mrf.mxu0 }
  0xd6   :  { %v543_v51 = vpop.f32.mrf.mxu1 }
  0xd7   :  { %v544_v52 = vadd.f32 %v543_v51, %v454_v49  ;;  %v147_v51 = vld [vmem:[#allocation2 + $0x70] sm:$0xff] }
  0xd9   :  { %v623_v53 = vadd.f32 %v544_v52, %v125_v50 }
  0xdb   :  { %655 = vst [vmem:[#allocation2 + $0xb0] sm:$0xff] %v623_v53  ;;  %v494_v54 = vpop.f32.mrf.mxu2 }
  0xdc   :  { %v583_v56 = vpop.f32.mrf.mxu3 }
  0xdd   :  { %v584_v57 = vadd.f32 %v583_v56, %v494_v54  ;;  %v456_v58 = vpop.f32.mrf.mxu0 }
  0xde   :  { %v545_v60 = vpop.f32.mrf.mxu1 }
  0xdf   :  { %v639_v61 = vadd.f32 %v584_v57, %v141_v55  ;;  %v546_v62 = vadd.f32 %v545_v60, %v456_v58  ;;  %v132_v55 = vld [vmem:[#allocation2 + $0x48] sm:$0xff] }
  0xe1   :  { %671 = vst [vmem:[#allocation2 + $0x38] sm:$0xff] %v639_v61  ;;  %v624_v63 = vadd.f32 %v546_v62, %v126_v59  ;;  %v148_v61 = vld [vmem:[#allocation2 + $0xc0] sm:$0xff] }
  0xe3   :  { %656 = vst [vmem:[#allocation2] sm:$0xff] %v624_v63  ;;  %v496_v0 = vpop.f32.mrf.mxu2 }
  0xe4   :  { %v585_v2 = vpop.f32.mrf.mxu3 }
  0xe5   :  { %v586_v3 = vadd.f32 %v585_v2, %v496_v0  ;;  %v459_v4 = vpop.f32.mrf.mxu0 }
  0xe6   :  { %v548_v6 = vpop.f32.mrf.mxu1 }
  0xe7   :  { %v640_v7 = vadd.f32 %v586_v3, %v142_v1  ;;  %v549_v8 = vadd.f32 %v548_v6, %v459_v4  ;;  %v133_v1 = vld [vmem:[#allocation2 + $0x80] sm:$0xff] }
  0xe9   :  { %672 = vst [vmem:[#allocation2 + $0x58] sm:$0xff] %v640_v7  ;;  %v625_v9 = vadd.f32 %v549_v8, %v127_v5  ;;  %v149_v7 = vld [vmem:[#allocation2 + $0xa8] sm:$0xff] }
  0xeb   :  { %657 = vst [vmem:[#allocation2 + $0xd8] sm:$0xff] %v625_v9  ;;  %v499_v10 = vpop.f32.mrf.mxu2 }
  0xec   :  { %v588_v12 = vpop.f32.mrf.mxu3 }
  0xed   :  { %v589_v13 = vadd.f32 %v588_v12, %v499_v10  ;;  %v461_v14 = vpop.f32.mrf.mxu0 }
  0xee   :  { %v550_v16 = vpop.f32.mrf.mxu1 }
  0xef   :  { %v641_v17 = vadd.f32 %v589_v13, %v143_v11  ;;  %v551_v18 = vadd.f32 %v550_v16, %v461_v14  ;;  %v134_v11 = vld [vmem:[#allocation2 + $0x88] sm:$0xff] }
  0xf1   :  { %673 = vst [vmem:[#allocation2 + $0x40] sm:$0xff] %v641_v17  ;;  %v626_v19 = vadd.f32 %v551_v18, %v128_v15  ;;  %v150_v17 = vld [vmem:[#allocation2 + $0xd0] sm:$0xff] }
  0xf3   :  { %658 = vst [vmem:[#allocation2 + $0x18] sm:$0xff] %v626_v19  ;;  %v501_v20 = vpop.f32.mrf.mxu2 }
  0xf4   :  { %v590_v22 = vpop.f32.mrf.mxu3 }
  0xf5   :  { %v591_v23 = vadd.f32 %v590_v22, %v501_v20  ;;  %v464_v24 = vpop.f32.mrf.mxu0 }
  0xf6   :  { %v553_v26 = vpop.f32.mrf.mxu1 }
  0xf7   :  { %v642_v27 = vadd.f32 %v591_v23, %v144_v21  ;;  %v554_v28 = vadd.f32 %v553_v26, %v464_v24  ;;  %v135_v21 = vld [vmem:[#allocation2 + $0xe8] sm:$0xff] }
  0xf9   :  { %674 = vst [vmem:[#allocation2 + $0xc8] sm:$0xff] %v642_v27  ;;  %v627_v29 = vadd.f32 %v554_v28, %v129_v25  ;;  %v151_v27 = vld [vmem:[#allocation2 + $0x10] sm:$0xff] }
  0xfb   :  { %659 = vst [vmem:[#allocation2 + $0x50] sm:$0xff] %v627_v29  ;;  %v504_v30 = vpop.f32.mrf.mxu2 }
  0xfc   :  { %v593_v32 = vpop.f32.mrf.mxu3 }
  0xfd   :  { %v594_v33 = vadd.f32 %v593_v32, %v504_v30  ;;  %v466_v34 = vpop.f32.mrf.mxu0 }
  0xfe   :  { %v555_v36 = vpop.f32.mrf.mxu1 }
  0xff   :  { %v643_v37 = vadd.f32 %v594_v33, %v145_v31  ;;  %v556_v38 = vadd.f32 %v555_v36, %v466_v34  ;;  %v136_v31 = vld [vmem:[#allocation2 + $0xb8] sm:$0xff] }
 0x101   :  { %675 = vst [vmem:[#allocation2 + $0xe0] sm:$0xff] %v643_v37  ;;  %v628_v39 = vadd.f32 %v556_v38, %v130_v35  ;;  %v152_v37 = vld [vmem:[#allocation2 + $0x28] sm:$0xff] }
 0x103   :  { %660 = vst [vmem:[#allocation2 + $0x68] sm:$0xff] %v628_v39  ;;  %v506_v40 = vpop.f32.mrf.mxu2 }
 0x104   :  { %v595_v42 = vpop.f32.mrf.mxu3 }
 0x105   :  { %v596_v43 = vadd.f32 %v595_v42, %v506_v40  ;;  %v469_v44 = vpop.f32.mrf.mxu0 }
 0x106   :  { %v558_v46 = vpop.f32.mrf.mxu1 }
 0x107   :  { %v644_v47 = vadd.f32 %v596_v43, %v146_v41  ;;  %v559_v48 = vadd.f32 %v558_v46, %v469_v44  ;;  %v137_v41 = vld [vmem:[#allocation2 + $0x60] sm:$0xff] }
 0x109   :  { %676 = vst [vmem:[#allocation2 + $0x90] sm:$0xff] %v644_v47  ;;  %v629_v49 = vadd.f32 %v559_v48, %v131_v45  ;;  %v153_v47 = vld [vmem:[#allocation2 + $0xa0] sm:$0xff] }
 0x10b   :  { %661 = vst [vmem:[#allocation2 + $0x30] sm:$0xff] %v629_v49  ;;  %v509_v50 = vpop.f32.mrf.mxu2 }
 0x10c   :  { %v598_v52 = vpop.f32.mrf.mxu3 }
 0x10d   :  { %v599_v53 = vadd.f32 %v598_v52, %v509_v50  ;;  %v471_v54 = vpop.f32.mrf.mxu0 }
 0x10e   :  { %v560_v56 = vpop.f32.mrf.mxu1 }
 0x10f   :  { %v645_v57 = vadd.f32 %v599_v53, %v147_v51  ;;  %v561_v58 = vadd.f32 %v560_v56, %v471_v54  ;;  %v138_v51 = vld [vmem:[#allocation2 + $0xf0] sm:$0xff] }
 0x111   :  { %677 = vst [vmem:[#allocation2 + $0x70] sm:$0xff] %v645_v57  ;;  %v630_v59 = vadd.f32 %v561_v58, %v132_v55  ;;  %v154_v57 = vld [vmem:[#allocation2 + $0xf8] sm:$0xff] }
 0x113   :  { %662 = vst [vmem:[#allocation2 + $0x48] sm:$0xff] %v630_v59  ;;  %v511_v60 = vpop.f32.mrf.mxu2 }
 0x114   :  { %v600_v62 = vpop.f32.mrf.mxu3 }
 0x115   :  { %v601_v63 = vadd.f32 %v600_v62, %v511_v60  ;;  %v474_v0 = vpop.f32.mrf.mxu0 }
 0x116   :  { %v563_v2 = vpop.f32.mrf.mxu1 }
 0x117   :  { %v646_v3 = vadd.f32 %v601_v63, %v148_v61  ;;  %v564_v4 = vadd.f32 %v563_v2, %v474_v0  ;;  %v139_v61 = vld [vmem:[#allocation2 + $0x8] sm:$0xff] }
 0x119   :  { %678 = vst [vmem:[#allocation2 + $0xc0] sm:$0xff] %v646_v3  ;;  %v631_v5 = vadd.f32 %v564_v4, %v133_v1  ;;  %v155_v3 = vld [vmem:[#allocation2 + $0x20] sm:$0xff] }
 0x11b   :  { %663 = vst [vmem:[#allocation2 + $0x80] sm:$0xff] %v631_v5  ;;  %v514_v6 = vpop.f32.mrf.mxu2 }
 0x11c   :  { %v603_v8 = vpop.f32.mrf.mxu3 }
 0x11d   :  { %v604_v9 = vadd.f32 %v603_v8, %v514_v6  ;;  %v476_v10 = vpop.f32.mrf.mxu0 }
 0x11e   :  { %v565_v12 = vpop.f32.mrf.mxu1 }
 0x11f   :  { %v647_v13 = vadd.f32 %v604_v9, %v149_v7  ;;  %v566_v14 = vadd.f32 %v565_v12, %v476_v10  ;;  %v140_v7 = vld [vmem:[#allocation2 + $0x78] sm:$0xff] }
 0x121   :  { %679 = vst [vmem:[#allocation2 + $0xa8] sm:$0xff] %v647_v13  ;;  %v632_v15 = vadd.f32 %v566_v14, %v134_v11  ;;  %v156_v13 = vld [vmem:[#allocation2 + $0x98] sm:$0xff] }
 0x123   :  { %664 = vst [vmem:[#allocation2 + $0x88] sm:$0xff] %v632_v15  ;;  %v516_v16 = vpop.f32.mrf.mxu2 }
 0x124   :  { %v605_v18 = vpop.f32.mrf.mxu3 }
 0x125   :  { %v606_v19 = vadd.f32 %v605_v18, %v516_v16  ;;  %v479_v20 = vpop.f32.mrf.mxu0 }
 0x126   :  { %v568_v22 = vpop.f32.mrf.mxu1 }
 0x127   :  { %v648_v23 = vadd.f32 %v606_v19, %v150_v17  ;;  %v569_v24 = vadd.f32 %v568_v22, %v479_v20 }
 0x129   :  { %680 = vst [vmem:[#allocation2 + $0xd0] sm:$0xff] %v648_v23  ;;  %v633_v25 = vadd.f32 %v569_v24, %v135_v21 }
 0x12b   :  { %665 = vst [vmem:[#allocation2 + $0xe8] sm:$0xff] %v633_v25  ;;  %v519_v26 = vpop.f32.mrf.mxu2 }
 0x12c   :  { %v608_v28 = vpop.f32.mrf.mxu3 }
 0x12d   :  { %v609_v29 = vadd.f32 %v608_v28, %v519_v26  ;;  %v481_v30 = vpop.f32.mrf.mxu0 }
 0x12e   :  { %v570_v32 = vpop.f32.mrf.mxu1 }
 0x12f   :  { %v649_v33 = vadd.f32 %v609_v29, %v151_v27  ;;  %v571_v34 = vadd.f32 %v570_v32, %v481_v30 }
 0x131   :  { %681 = vst [vmem:[#allocation2 + $0x10] sm:$0xff] %v649_v33  ;;  %v634_v35 = vadd.f32 %v571_v34, %v136_v31 }
 0x133   :  { %666 = vst [vmem:[#allocation2 + $0xb8] sm:$0xff] %v634_v35  ;;  %v521_v36 = vpop.f32.mrf.mxu2 }
 0x134   :  { %v610_v38 = vpop.f32.mrf.mxu3 }
 0x135   :  { %v611_v39 = vadd.f32 %v610_v38, %v521_v36  ;;  %v484_v40 = vpop.f32.mrf.mxu0 }
 0x136   :  { %v573_v42 = vpop.f32.mrf.mxu1 }
 0x137   :  { %v650_v43 = vadd.f32 %v611_v39, %v152_v37  ;;  %v574_v44 = vadd.f32 %v573_v42, %v484_v40 }
 0x139   :  { %682 = vst [vmem:[#allocation2 + $0x28] sm:$0xff] %v650_v43  ;;  %v635_v45 = vadd.f32 %v574_v44, %v137_v41 }
 0x13b   :  { %667 = vst [vmem:[#allocation2 + $0x60] sm:$0xff] %v635_v45  ;;  %v524_v46 = vpop.f32.mrf.mxu2 }
 0x13c   :  { %v613_v48 = vpop.f32.mrf.mxu3 }
 0x13d   :  { %v614_v49 = vadd.f32 %v613_v48, %v524_v46  ;;  %v486_v50 = vpop.f32.mrf.mxu0 }
 0x13e   :  { %v575_v52 = vpop.f32.mrf.mxu1 }
 0x13f   :  { %v651_v53 = vadd.f32 %v614_v49, %v153_v47  ;;  %v576_v54 = vadd.f32 %v575_v52, %v486_v50 }
 0x141   :  { %683 = vst [vmem:[#allocation2 + $0xa0] sm:$0xff] %v651_v53  ;;  %v636_v55 = vadd.f32 %v576_v54, %v138_v51 }
 0x143   :  { %668 = vst [vmem:[#allocation2 + $0xf0] sm:$0xff] %v636_v55  ;;  %v526_v56 = vpop.f32.mrf.mxu2 }
 0x144   :  { %v615_v58 = vpop.f32.mrf.mxu3 }
 0x145   :  { %v616_v59 = vadd.f32 %v615_v58, %v526_v56  ;;  %v489_v60 = vpop.f32.mrf.mxu0 }
 0x146   :  { %v578_v62 = vpop.f32.mrf.mxu1 }
 0x147   :  { %v652_v63 = vadd.f32 %v616_v59, %v154_v57  ;;  %v579_v0 = vadd.f32 %v578_v62, %v489_v60 }
 0x149   :  { %684 = vst [vmem:[#allocation2 + $0xf8] sm:$0xff] %v652_v63  ;;  %v637_v1 = vadd.f32 %v579_v0, %v139_v61 }
 0x14b   :  { %669 = vst [vmem:[#allocation2 + $0x8] sm:$0xff] %v637_v1  ;;  %v529_v2 = vpop.f32.mrf.mxu2 }
 0x14c   :  { %v618_v4 = vpop.f32.mrf.mxu3 }
 0x14d   :  { %v619_v5 = vadd.f32 %v618_v4, %v529_v2  ;;  %v491_v6 = vpop.f32.mrf.mxu0 }
 0x14e   :  { %v580_v8 = vpop.f32.mrf.mxu1 }
 0x14f   :  { %v653_v9 = vadd.f32 %v619_v5, %v155_v3  ;;  %v581_v10 = vadd.f32 %v580_v8, %v491_v6 }
 0x151   :  { %685 = vst [vmem:[#allocation2 + $0x20] sm:$0xff] %v653_v9  ;;  %v638_v11 = vadd.f32 %v581_v10, %v140_v7 }
 0x153   :  { %670 = vst [vmem:[#allocation2 + $0x78] sm:$0xff] %v638_v11  ;;  %v531_v12 = vpop.f32.mrf.mxu2 }
 0x154   :  { %v620_v14 = vpop.f32.mrf.mxu3 }
 0x155   :  { %v621_v15 = vadd.f32 %v620_v14, %v531_v12 }
 0x157   :  { %v654_v16 = vadd.f32 %v621_v15, %v156_v13 }
 0x159   :  { %686 = vst [vmem:[#allocation2 + $0x98] sm:$0xff] %v654_v16 }
 0x15a PF:  { %v690_v17 = vld [vmem:[#allocation2 + $0xb0] sm:$0xff]  ;;  %v691_v18 = vld [vmem:[#allocation2] sm:$0xff]  ;;  %v692_v19 = vld [vmem:[#allocation2 + $0xd8] sm:$0xff] }
 0x15b   :  { %v1045_v20 = vpack.c.bf16 %v691_v18, %v690_v17  ;;  %v693_v21 = vld [vmem:[#allocation2 + $0x18] sm:$0xff]  ;;  %v694_v22 = vld [vmem:[#allocation2 + $0x50] sm:$0xff]  ;;  %v695_v23 = vld [vmem:[#allocation2 + $0x68] sm:$0xff] }
 0x15c   :  { %v1050_v24 = vpack.c.bf16 %v693_v21, %v692_v19  ;;  %v1055_v25 = vpack.c.bf16 %v695_v23, %v694_v22  ;;  %v696_v26 = vld [vmem:[#allocation2 + $0x30] sm:$0xff]  ;;  %v697_v27 = vld [vmem:[#allocation2 + $0x48] sm:$0xff]  ;;  %v698_v28 = vld [vmem:[#allocation2 + $0x80] sm:$0xff] }
 0x15d   :  { %1046 = vst [vmem:[%s1300_s4] sm:$0xff] %v1045_v20   ;;  %v1060_v29 = vpack.c.bf16 %v697_v27, %v696_v26  ;;  %v699_v30 = vld [vmem:[#allocation2 + $0x88] sm:$0xff]  ;;  %v701_v32 = vld [vmem:[#allocation2 + $0xb8] sm:$0xff]  ;;  %v702_v35 = vld [vmem:[#allocation2 + $0x60] sm:$0xff] }
 0x15e   :  { %v700_v31 = vld [vmem:[#allocation2 + $0xe8] sm:$0xff]  ;;  %1122 = vst [vmem:[%s1300_s4 + $0x8] sm:$0xff] %v1050_v24   ;;  %v1065_v33 = vpack.c.bf16 %v699_v30, %v698_v28  ;;  %v703_v36 = vld [vmem:[#allocation2 + $0xf0] sm:$0xff]  ;;  %v705_v39 = vld [vmem:[#allocation2 + $0x78] sm:$0xff] }
 0x15f   :  { %v1070_v34 = vpack.c.bf16 %v701_v32, %v700_v31  ;;  %v704_v37 = vld [vmem:[#allocation2 + $0x8] sm:$0xff]  ;;  %1123 = vst [vmem:[%s1300_s4 + $0x10] sm:$0xff] %v1055_v25   ;;  %v1075_v38 = vpack.c.bf16 %v703_v36, %v702_v35  ;;  %v706_v40 = vld [vmem:[#allocation2 + $0x38] sm:$0xff]  ;;  %v708_v43 = vld [vmem:[#allocation2 + $0x40] sm:$0xff] }
 0x160   :  { %v707_v41 = vld [vmem:[#allocation2 + $0x58] sm:$0xff]  ;;  %1124 = vst [vmem:[%s1300_s4 + $0x18] sm:$0xff] %v1060_v29   ;;  %v1080_v42 = vpack.c.bf16 %v705_v39, %v704_v37  ;;  %v709_v44 = vld [vmem:[#allocation2 + $0xc8] sm:$0xff]  ;;  %v710_v45 = vld [vmem:[#allocation2 + $0xe0] sm:$0xff] }
 0x161   :  { %1125 = vst [vmem:[%s1300_s4 + $0x20] sm:$0xff] %v1065_v33   ;;  %v1085_v46 = vpack.c.bf16 %v707_v41, %v706_v40  ;;  %v711_v47 = vld [vmem:[#allocation2 + $0x90] sm:$0xff]  ;;  %v713_v49 = vld [vmem:[#allocation2 + $0xc0] sm:$0xff]  ;;  %v1090_v50 = vpack.c.bf16 %v709_v44, %v708_v43  ;;  %v714_v51 = vld [vmem:[#allocation2 + $0xa8] sm:$0xff] }
 0x162   :  { %v712_v48 = vld [vmem:[#allocation2 + $0x70] sm:$0xff]  ;;  %1126 = vst [vmem:[%s1300_s4 + $0x28] sm:$0xff] %v1070_v34   ;;  %v1095_v53 = vpack.c.bf16 %v711_v47, %v710_v45  ;;  %v717_v55 = vld [vmem:[#allocation2 + $0x28] sm:$0xff]  ;;  %v718_v57 = vld [vmem:[#allocation2 + $0xa0] sm:$0xff] }
 0x163   :  { %v715_v52 = vld [vmem:[#allocation2 + $0xd0] sm:$0xff]  ;;  %1127 = vst [vmem:[%s1300_s4 + $0x30] sm:$0xff] %v1075_v38   ;;  %v1100_v56 = vpack.c.bf16 %v713_v49, %v712_v48  ;;  %v719_v58 = vld [vmem:[#allocation2 + $0xf8] sm:$0xff]  ;;  %v720_v60 = vld [vmem:[#allocation2 + $0x20] sm:$0xff] }
 0x164   :  { %v716_v54 = vld [vmem:[#allocation2 + $0x10] sm:$0xff]  ;;  %1128 = vst [vmem:[%s1300_s4 + $0x38] sm:$0xff] %v1080_v42   ;;  %v1105_v59 = vpack.c.bf16 %v715_v52, %v714_v51  ;;  %v721_v61 = vld [vmem:[#allocation2 + $0x98] sm:$0xff]  ;;  %v1115_v63 = vpack.c.bf16 %v719_v58, %v718_v57 }
 0x165   :  { %1129 = vst [vmem:[%s1300_s4 + $0x40] sm:$0xff] %v1085_v46   ;;  %v1110_v62 = vpack.c.bf16 %v717_v55, %v716_v54  ;;  %v1120_v0 = vpack.c.bf16 %v721_v61, %v720_v60 }
 0x166   :  { %1130 = vst [vmem:[%s1300_s4 + $0x48] sm:$0xff] %v1090_v50  }
 0x167   :  { %1131 = vst [vmem:[%s1300_s4 + $0x50] sm:$0xff] %v1095_v53  }
 0x168   :  { %1132 = vst [vmem:[%s1300_s4 + $0x58] sm:$0xff] %v1100_v56  }
 0x169   :  { %1133 = vst [vmem:[%s1300_s4 + $0x60] sm:$0xff] %v1105_v59  }
 0x16a   :  { %1134 = vst [vmem:[%s1300_s4 + $0x68] sm:$0xff] %v1110_v62  }
 0x16b   :  { %1135 = vst [vmem:[%s1300_s4 + $0x70] sm:$0xff] %v1115_v63  }
 0x16c   :  { %1136 = vst [vmem:[%s1300_s4 + $0x78] sm:$0xff] %v1120_v0  }
 0x16d   :  { %790 = vsyncpa [#allocation7], 1 }

// kernel: kgcr_forward.10
= control target key start
LH: loop header
LB: loop body
LE: loop exit
PB: predicated region body
PF: predicated region fallthrough
CT: control target
= control target key end

     0   :  { %v1165_v0 = vmov 0.0   ;;  %s1338_s0 = inlined_call_operand.<no memory space> [shape: s32[1,1], index: 0, kind: input, shape index: {}]   ;;  %s1339_s1 = inlined_call_operand.<no memory space> [shape: s32[1], index: 1, kind: input, shape index: {}]   ;;  %s1340_s3 = inlined_call_operand.vmem [shape: bf16[256,128], index: 3, kind: input, shape index: {}]   ;;  %s1341_s4 = inlined_call_operand.vmem [shape: bf16[256,128], index: 4, kind: output, shape index: {}]   ;;  %s1342_s2 = inlined_call_operand.vmem [shape: bf16[256,256], index: 2, kind: input, shape index: {}]  }
   0x1   :  { %9 = sst [smem:[#allocation4]] %s1338_s0  ;;  %s807_s19 = sshll.u32 %s1338_s0, 1  ;;  %56 = vst [vmem:[#allocation2 + $0xb0] sm:$0xff] %v1165_v0 }
   0x2   :  { %p43_p0 = scmp.lt.s32.totalorder %s807_s19, 1  ;;  %57 = vst [vmem:[#allocation2] sm:$0xff] %v1165_v0  ;;  %p810_p1 = scmp.le.s32.totalorder %s1339_s1, 0 }
   0x3   :  { %58 = vst [vmem:[#allocation2 + $0xd8] sm:$0xff] %v1165_v0  ;;  %s96_s24 = sld [smem:[#allocation4]] (!%p810_p1) }
   0x4   :  { %s1344_s19 = smov (!%p43_p0, %s807_s19), 1  ;;  %59 = vst [vmem:[#allocation2 + $0x18] sm:$0xff] %v1165_v0 }
   0x5   :  { %60 = vst [vmem:[#allocation2 + $0x50] sm:$0xff] %v1165_v0  ;;  %s808_s20 = sshll.u32 %s1344_s19, 2 }
   0x6   :  { %61 = vst [vmem:[#allocation2 + $0x68] sm:$0xff] %v1165_v0  ;;  %s1200_s23 = scalar_lea.vmem %s1342_s2, %s808_s20 }
   0x7   :  { %62 = vst [vmem:[#allocation2 + $0x30] sm:$0xff] %v1165_v0 }
   0x8   :  { %63 = vst [vmem:[#allocation2 + $0x48] sm:$0xff] %v1165_v0 }
   0x9   :  { %64 = vst [vmem:[#allocation2 + $0x80] sm:$0xff] %v1165_v0  ;;  %s811_s25 = sshll.u32 (!%p810_p1), %s96_s24, 8 }
   0xa   :  { %65 = vst [vmem:[#allocation2 + $0x88] sm:$0xff] %v1165_v0  ;;  %s98_s26 = sshra.s32 (!%p810_p1), %s811_s25, 3 }
   0xb   :  { %66 = vst [vmem:[#allocation2 + $0xe8] sm:$0xff] %v1165_v0  ;;  %s812_s27 = sshll.u32 (!%p810_p1), %s98_s26, 2 }
   0xc   :  { %67 = vst [vmem:[#allocation2 + $0xb8] sm:$0xff] %v1165_v0  ;;  %s1208_s30 = scalar_lea.vmem (!%p810_p1), %s1340_s3, %s812_s27 }
   0xd   :  { %68 = vst [vmem:[#allocation2 + $0x60] sm:$0xff] %v1165_v0 }
   0xe   :  { %69 = vst [vmem:[#allocation2 + $0xf0] sm:$0xff] %v1165_v0 }
   0xf   :  { %70 = vst [vmem:[#allocation2 + $0x8] sm:$0xff] %v1165_v0 }
  0x10   :  { %71 = vst [vmem:[#allocation2 + $0x78] sm:$0xff] %v1165_v0 }
  0x11   :  { %72 = vst [vmem:[#allocation2 + $0x38] sm:$0xff] %v1165_v0 }
  0x12   :  { %73 = vst [vmem:[#allocation2 + $0x58] sm:$0xff] %v1165_v0 }
  0x13   :  { %74 = vst [vmem:[#allocation2 + $0x40] sm:$0xff] %v1165_v0 }
  0x14   :  { %75 = vst [vmem:[#allocation2 + $0xc8] sm:$0xff] %v1165_v0 }
  0x15   :  { %76 = vst [vmem:[#allocation2 + $0xe0] sm:$0xff] %v1165_v0 }
  0x16   :  { %77 = vst [vmem:[#allocation2 + $0x90] sm:$0xff] %v1165_v0 }
  0x17   :  { %78 = vst [vmem:[#allocation2 + $0x70] sm:$0xff] %v1165_v0 }
  0x18   :  { %79 = vst [vmem:[#allocation2 + $0xc0] sm:$0xff] %v1165_v0 }
  0x19   :  { %80 = vst [vmem:[#allocation2 + $0xa8] sm:$0xff] %v1165_v0 }
  0x1a   :  { %81 = vst [vmem:[#allocation2 + $0xd0] sm:$0xff] %v1165_v0 }
  0x1b   :  { %82 = vst [vmem:[#allocation2 + $0x10] sm:$0xff] %v1165_v0 }
  0x1c   :  { %83 = vst [vmem:[#allocation2 + $0x28] sm:$0xff] %v1165_v0  ;;  %92 = sbr.rel (%p810_p1) target bundleno = 323 (0x143), region = 17 }
  0x1d   :  { %84 = vst [vmem:[#allocation2 + $0xa0] sm:$0xff] %v1165_v0 }
  0x1e   :  { %85 = vst [vmem:[#allocation2 + $0xf8] sm:$0xff] %v1165_v0 }
  0x1f   :  { %86 = vst [vmem:[#allocation2 + $0x20] sm:$0xff] %v1165_v0 }
  0x20   :  { %87 = vst [vmem:[#allocation2 + $0x98] sm:$0xff] %v1165_v0 }
  0x21   :  { %v1012_v1 = vld [vmem:[%s1208_s30 + $0x38] sm:$0xff]  ;;  %v1011_v3 = vld [vmem:[%s1208_s30 + $0x30] sm:$0xff]  ;;  %v1010_v5 = vld [vmem:[%s1208_s30 + $0x28] sm:$0xff] }
  0x22   :  { %v1020_v2 = vld [vmem:[%s1208_s30 + $0x78] sm:$0xff]  ;;  %454 = vmatpush.bf16.msra.mxu0 %v1012_v1  ;;  %1148 = vmatpush.bf16.msra.mxu2 %v1012_v1  ;;  %v1019_v4 = vld [vmem:[%s1208_s30 + $0x70] sm:$0xff]  ;;  %v1018_v6 = vld [vmem:[%s1208_s30 + $0x68] sm:$0xff] }
  0x23   :  { %543 = vmatpush.bf16.msra.mxu1 %v1020_v2  ;;  %1156 = vmatpush.bf16.msra.mxu3 %v1020_v2  ;;  %v1009_v7 = vld [vmem:[%s1208_s30 + $0x20] sm:$0xff]  ;;  %v1008_v9 = vld [vmem:[%s1208_s30 + $0x18] sm:$0xff]  ;;  %v1007_v11 = vld [vmem:[%s1208_s30 + $0x10] sm:$0xff] }
  0x24   :  { %v1017_v8 = vld [vmem:[%s1208_s30 + $0x60] sm:$0xff]  ;;  %v1016_v10 = vld [vmem:[%s1208_s30 + $0x58] sm:$0xff]  ;;  %v1015_v12 = vld [vmem:[%s1208_s30 + $0x50] sm:$0xff] }
  0x25   :  { %v1006_v13 = vld [vmem:[%s1208_s30 + $0x8] sm:$0xff]  ;;  %v815_v15 = vld [vmem:[%s1200_s23] sm:$0xf]  ;;  %v1021_v21 = vld [vmem:[%s1200_s23 + $0x4] sm:$0xf] }
  0x26   :  { %455 = vmatpush.bf16.msra.mxu0 %v1011_v3  ;;  %1149 = vmatpush.bf16.msra.mxu2 %v1011_v3  ;;  %v1014_v14 = vld [vmem:[%s1208_s30 + $0x48] sm:$0xff]  ;;  %v1005_v16 = vld [vmem:[%s1208_s30] sm:$0xff]  ;;  %v823_v29 = vld [vmem:[%s1200_s23 + $0x10] sm:$0xf] }
  0x27   :  { %544 = vmatpush.bf16.msra.mxu1 %v1019_v4  ;;  %1157 = vmatpush.bf16.msra.mxu3 %v1019_v4  ;;  %v1022_v17 = vld [vmem:[%s1200_s23 + $0x4] sm:$0xf0]  ;;  %v879_v18 = vld [vmem:[%s1200_s23 + $0x80] sm:$0xf]  ;;  %v817_v22 = vld [vmem:[%s1200_s23 + $0x8] sm:$0xf0] }
  0x28   :  { %v1013_v19 = vld [vmem:[%s1208_s30 + $0x40] sm:$0xff]  ;;  %v1038_v20 = vld [vmem:[%s1200_s23 + $0x84] sm:$0xf0]  ;;  %v881_v24 = vld [vmem:[%s1200_s23 + $0x88] sm:$0xf0]  ;;  %v816_v25 = vor.u32 %v1022_v17, %v815_v15  ;;  %v820_v27 = vor.u32 %v1021_v21, %v817_v22 }
  0x29   :  { %v1037_v23 = vld [vmem:[%s1200_s23 + $0x84] sm:$0xf]  ;;  %v880_v26 = vor.u32 %v1038_v20, %v879_v18  ;;  %v1024_v30 = vld [vmem:[%s1200_s23 + $0x14] sm:$0xf0]  ;;  %v887_v31 = vld [vmem:[%s1200_s23 + $0x90] sm:$0xf] }
  0x2a   :  { %456 = vmatpush.bf16.msra.mxu0 %v1010_v5  ;;  %1150 = vmatpush.bf16.msra.mxu2 %v1010_v5  ;;  %v884_v28 = vor.u32 %v1037_v23, %v881_v24  ;;  %v1040_v32 = vld [vmem:[%s1200_s23 + $0x94] sm:$0xf0]  ;;  %v1023_v33 = vld [vmem:[%s1200_s23 + $0x14] sm:$0xf]  ;;  %v825_v34 = vld [vmem:[%s1200_s23 + $0x18] sm:$0xf0]  ;;  %v824_v37 = vor.u32 %v1024_v30, %v823_v29 }
  0x2b   :  { %545 = vmatpush.bf16.msra.mxu1 %v1018_v6  ;;  %1158 = vmatpush.bf16.msra.mxu3 %v1018_v6  ;;  %v1039_v35 = vld [vmem:[%s1200_s23 + $0x94] sm:$0xf]  ;;  %v889_v36 = vld [vmem:[%s1200_s23 + $0x98] sm:$0xf0]  ;;  %v888_v38 = vor.u32 %v1040_v32, %v887_v31  ;;  %v828_v39 = vor.u32 %v1023_v33, %v825_v34  ;;  %v831_v41 = vld [vmem:[%s1200_s23 + $0x20] sm:$0xf] }
  0x2c   :  { %v892_v40 = vor.u32 %v1039_v35, %v889_v36  ;;  %v1026_v42 = vld [vmem:[%s1200_s23 + $0x24] sm:$0xf0]  ;;  %v895_v43 = vld [vmem:[%s1200_s23 + $0xa0] sm:$0xf]  ;;  %v1025_v45 = vld [vmem:[%s1200_s23 + $0x24] sm:$0xf] }
  0x2d   :  { %v1042_v44 = vld [vmem:[%s1200_s23 + $0xa4] sm:$0xf0]  ;;  %v833_v46 = vld [vmem:[%s1200_s23 + $0x28] sm:$0xf0]  ;;  %v1041_v47 = vld [vmem:[%s1200_s23 + $0xa4] sm:$0xf]  ;;  %v832_v49 = vor.u32 %v1026_v42, %v831_v41 }
  0x2e   :  { %457 = vmatpush.bf16.msra.mxu0 %v1009_v7  ;;  %1151 = vmatpush.bf16.msra.mxu2 %v1009_v7  ;;  %v897_v48 = vld [vmem:[%s1200_s23 + $0xa8] sm:$0xf0]  ;;  %v896_v50 = vor.u32 %v1042_v44, %v895_v43  ;;  %v836_v51 = vor.u32 %v1025_v45, %v833_v46  ;;  %v839_v53 = vld [vmem:[%s1200_s23 + $0x30] sm:$0xf]  ;;  %v1028_v54 = vld [vmem:[%s1200_s23 + $0x34] sm:$0xf0] }
  0x2f   :  { %546 = vmatpush.bf16.msra.mxu1 %v1017_v8  ;;  %1159 = vmatpush.bf16.msra.mxu3 %v1017_v8  ;;  %v900_v52 = vor.u32 %v1041_v47, %v897_v48  ;;  %v903_v55 = vld [vmem:[%s1200_s23 + $0xb0] sm:$0xf]  ;;  %v1044_v56 = vld [vmem:[%s1200_s23 + $0xb4] sm:$0xf0]  ;;  %v1027_v57 = vld [vmem:[%s1200_s23 + $0x34] sm:$0xf]  ;;  %v840_v61 = vor.u32 %v1028_v54, %v839_v53 }
  0x30   :  { %v841_v58 = vld [vmem:[%s1200_s23 + $0x38] sm:$0xf0]  ;;  %v1043_v59 = vld [vmem:[%s1200_s23 + $0xb4] sm:$0xf]  ;;  %v904_v62 = vor.u32 %v1044_v56, %v903_v55  ;;  %v847_v1 = vld [vmem:[%s1200_s23 + $0x40] sm:$0xf] }
  0x31   :  { %v905_v60 = vld [vmem:[%s1200_s23 + $0xb8] sm:$0xf0]  ;;  %v844_v63 = vor.u32 %v1027_v57, %v841_v58  ;;  %v1030_v2 = vld [vmem:[%s1200_s23 + $0x44] sm:$0xf0]  ;;  %v911_v3 = vld [vmem:[%s1200_s23 + $0xc0] sm:$0xf] }
  0x32   :  { %458 = vmatpush.bf16.msra.mxu0 %v1008_v9  ;;  %1152 = vmatpush.bf16.msra.mxu2 %v1008_v9  ;;  %v908_v0 = vor.u32 %v1043_v59, %v905_v60  ;;  %v1046_v4 = vld [vmem:[%s1200_s23 + $0xc4] sm:$0xf0]  ;;  %v1029_v5 = vld [vmem:[%s1200_s23 + $0x44] sm:$0xf]  ;;  %v849_v6 = vld [vmem:[%s1200_s23 + $0x48] sm:$0xf0]  ;;  %v848_v9 = vor.u32 %v1030_v2, %v847_v1 }
  0x33   :  { %547 = vmatpush.bf16.msra.mxu1 %v1016_v10  ;;  %1160 = vmatpush.bf16.msra.mxu3 %v1016_v10  ;;  %v1045_v7 = vld [vmem:[%s1200_s23 + $0xc4] sm:$0xf]  ;;  %v913_v8 = vld [vmem:[%s1200_s23 + $0xc8] sm:$0xf0]  ;;  %v912_v10 = vor.u32 %v1046_v4, %v911_v3  ;;  %v919_v15 = vld [vmem:[%s1200_s23 + $0xd0] sm:$0xf] }
  0x34   :  { %v1031_v17 = vld [vmem:[%s1200_s23 + $0x54] sm:$0xf]  ;;  %v857_v18 = vld [vmem:[%s1200_s23 + $0x58] sm:$0xf0]  ;;  %v1033_v29 = vld [vmem:[%s1200_s23 + $0x64] sm:$0xf] }
  0x35   :  { %v921_v20 = vld [vmem:[%s1200_s23 + $0xd8] sm:$0xf0]  ;;  %v860_v23 = vor.u32 %v1031_v17, %v857_v18  ;;  %v865_v30 = vld [vmem:[%s1200_s23 + $0x68] sm:$0xf0]  ;;  %v1049_v31 = vld [vmem:[%s1200_s23 + $0xe4] sm:$0xf] }
  0x36   :  { %459 = vmatpush.bf16.msra.mxu0 %v1007_v11  ;;  %1153 = vmatpush.bf16.msra.mxu2 %v1007_v11  ;;  %v852_v11 = vor.u32 %v1029_v5, %v849_v6  ;;  %v929_v32 = vld [vmem:[%s1200_s23 + $0xe8] sm:$0xf0]  ;;  %v868_v35 = vor.u32 %v1033_v29, %v865_v30  ;;  %v1035_v41 = vld [vmem:[%s1200_s23 + $0x74] sm:$0xf]  ;;  %v873_v42 = vld [vmem:[%s1200_s23 + $0x78] sm:$0xf0] }
  0x37   :  { %548 = vmatpush.bf16.msra.mxu1 %v1015_v12  ;;  %1161 = vmatpush.bf16.msra.mxu3 %v1015_v12  ;;  %v916_v12 = vor.u32 %v1045_v7, %v913_v8  ;;  %v932_v36 = vor.u32 %v1049_v31, %v929_v32  ;;  %v1051_v43 = vld [vmem:[%s1200_s23 + $0xf4] sm:$0xf]  ;;  %v937_v44 = vld [vmem:[%s1200_s23 + $0xf8] sm:$0xf0]  ;;  %v876_v47 = vor.u32 %v1035_v41, %v873_v42  ;;  %v135_v59 = vld [vmem:[#allocation2] sm:$0xff] }
  0x38   :  { %v940_v48 = vor.u32 %v1051_v43, %v937_v44  ;;  %v150_v55 = vld [vmem:[#allocation2 + $0x38] sm:$0xff]  ;;  %v154_v31 = vld [vmem:[#allocation2 + $0xe0] sm:$0xff]  ;;  %v155_v41 = vld [vmem:[#allocation2 + $0x90] sm:$0xff] }
  0x39   :  { %v151_v1 = vld [vmem:[#allocation2 + $0x58] sm:$0xff] }
  0x3a   :  { %460 = vmatpush.bf16.msra.mxu0 %v1006_v13  ;;  %1154 = vmatpush.bf16.msra.mxu2 %v1006_v13  ;;  %v855_v13 = vld [vmem:[%s1200_s23 + $0x50] sm:$0xf]  ;;  %v136_v5 = vld [vmem:[#allocation2 + $0xd8] sm:$0xff] }
  0x3b   :  { %549 = vmatpush.bf16.msra.mxu1 %v1014_v14  ;;  %1162 = vmatpush.bf16.msra.mxu3 %v1014_v14  ;;  %v1032_v14 = vld [vmem:[%s1200_s23 + $0x54] sm:$0xf0] }
  0x3c   :  { %v856_v21 = vor.u32 %v1032_v14, %v855_v13 }
  0x3e   :  { %461 = vmatpush.bf16.msra.mxu0 %v1005_v16  ;;  %1155 = vmatpush.bf16.msra.mxu2 %v1005_v16  ;;  %v1048_v16 = vld [vmem:[%s1200_s23 + $0xd4] sm:$0xf0] }
  0x3f   :  { %550 = vmatpush.bf16.msra.mxu1 %v1013_v19  ;;  %1163 = vmatpush.bf16.msra.mxu3 %v1013_v19  ;;  %v1047_v19 = vld [vmem:[%s1200_s23 + $0xd4] sm:$0xf]  ;;  %v920_v22 = vor.u32 %v1048_v16, %v919_v15  ;;  %v137_v15 = vld [vmem:[#allocation2 + $0x18] sm:$0xff] }
  0x40   :  { %v924_v24 = vor.u32 %v1047_v19, %v921_v20 }
  0x41   :  { %462 = vmatmul.bf16.vlgmr.msra.gmra.mxu0 %v816_v25  ;;  %502 = vmatmul.bf16.vlgmr.msra.gmra.mxu2 %v880_v26  ;;  %v863_v25 = vld [vmem:[%s1200_s23 + $0x60] sm:$0xf]  ;;  %v1034_v26 = vld [vmem:[%s1200_s23 + $0x64] sm:$0xf0] }
  0x42   :  { %551 = vmatmul.bf16.vlgmr.msra.gmra.mxu1 %v820_v27  ;;  %591 = vmatmul.bf16.vlgmr.msra.gmra.mxu3 %v884_v28  ;;  %v927_v27 = vld [vmem:[%s1200_s23 + $0xe0] sm:$0xf]  ;;  %v1050_v28 = vld [vmem:[%s1200_s23 + $0xe4] sm:$0xf0]  ;;  %v864_v33 = vor.u32 %v1034_v26, %v863_v25  ;;  %v138_v25 = vld [vmem:[#allocation2 + $0x50] sm:$0xff] }
  0x43   :  { %v928_v34 = vor.u32 %v1050_v28, %v927_v27 }
  0x51   :  { %467 = vmatmul.bf16.gmra.mxu0 %v824_v37  ;;  %507 = vmatmul.bf16.gmra.mxu2 %v888_v38  ;;  %v871_v37 = vld [vmem:[%s1200_s23 + $0x70] sm:$0xf]  ;;  %v1036_v38 = vld [vmem:[%s1200_s23 + $0x74] sm:$0xf0] }
  0x52   :  { %556 = vmatmul.bf16.gmra.mxu1 %v828_v39  ;;  %596 = vmatmul.bf16.gmra.mxu3 %v892_v40  ;;  %v935_v39 = vld [vmem:[%s1200_s23 + $0xf0] sm:$0xf]  ;;  %v1052_v40 = vld [vmem:[%s1200_s23 + $0xf4] sm:$0xf0]  ;;  %v872_v45 = vor.u32 %v1036_v38, %v871_v37 }
  0x53   :  { %v936_v46 = vor.u32 %v1052_v40, %v935_v39 }
  0x61   :  { %472 = vmatmul.bf16.gmra.mxu0 %v832_v49  ;;  %512 = vmatmul.bf16.gmra.mxu2 %v896_v50  ;;  %v134_v50 = vld [vmem:[#allocation2 + $0xb0] sm:$0xff] }
  0x62   :  { %561 = vmatmul.bf16.gmra.mxu1 %v836_v51  ;;  %601 = vmatmul.bf16.gmra.mxu3 %v900_v52 }
  0x71   :  { %477 = vmatmul.bf16.gmra.mxu0 %v840_v61  ;;  %517 = vmatmul.bf16.gmra.mxu2 %v904_v62 }
  0x72   :  { %566 = vmatmul.bf16.gmra.mxu1 %v844_v63  ;;  %606 = vmatmul.bf16.gmra.mxu3 %v908_v0 }
  0x81   :  { %482 = vmatmul.bf16.gmra.mxu0 %v848_v9  ;;  %522 = vmatmul.bf16.gmra.mxu2 %v912_v10 }
  0x82   :  { %571 = vmatmul.bf16.gmra.mxu1 %v852_v11  ;;  %611 = vmatmul.bf16.gmra.mxu3 %v916_v12  ;;  %v152_v11 = vld [vmem:[#allocation2 + $0x40] sm:$0xff] }
  0x91   :  { %487 = vmatmul.bf16.gmra.mxu0 %v856_v21  ;;  %527 = vmatmul.bf16.gmra.mxu2 %v920_v22  ;;  %v153_v21 = vld [vmem:[#allocation2 + $0xc8] sm:$0xff] }
  0x92   :  { %576 = vmatmul.bf16.gmra.mxu1 %v860_v23  ;;  %616 = vmatmul.bf16.gmra.mxu3 %v924_v24 }
  0xa1   :  { %492 = vmatmul.bf16.gmra.mxu0 %v864_v33  ;;  %532 = vmatmul.bf16.gmra.mxu2 %v928_v34 }
  0xa2   :  { %581 = vmatmul.bf16.gmra.mxu1 %v868_v35  ;;  %621 = vmatmul.bf16.gmra.mxu3 %v932_v36  ;;  %v139_v35 = vld [vmem:[#allocation2 + $0x68] sm:$0xff] }
  0xb1   :  { %497 = vmatmul.bf16.gmra.mxu0 %v872_v45  ;;  %537 = vmatmul.bf16.gmra.mxu2 %v936_v46  ;;  %v140_v45 = vld [vmem:[#allocation2 + $0x30] sm:$0xff] }
  0xb2   :  { %586 = vmatmul.bf16.gmra.mxu1 %v876_v47  ;;  %626 = vmatmul.bf16.gmra.mxu3 %v940_v48 }
  0xbe   :  { %v463_v49 = vpop.f32.mrf.mxu0 }
  0xbf   :  { %v552_v51 = vpop.f32.mrf.mxu1 }
  0xc0   :  { %v553_v52 = vadd.f32 %v552_v51, %v463_v49  ;;  %v156_v51 = vld [vmem:[#allocation2 + $0x70] sm:$0xff] }
  0xc2   :  { %v632_v53 = vadd.f32 %v553_v52, %v134_v50 }
  0xc4   :  { %664 = vst [vmem:[#allocation2 + $0xb0] sm:$0xff] %v632_v53  ;;  %v503_v54 = vpop.f32.mrf.mxu2 }
  0xc5   :  { %v592_v56 = vpop.f32.mrf.mxu3 }
  0xc6   :  { %v593_v57 = vadd.f32 %v592_v56, %v503_v54  ;;  %v465_v58 = vpop.f32.mrf.mxu0 }
  0xc7   :  { %v554_v60 = vpop.f32.mrf.mxu1 }
  0xc8   :  { %v648_v61 = vadd.f32 %v593_v57, %v150_v55  ;;  %v555_v62 = vadd.f32 %v554_v60, %v465_v58  ;;  %v141_v55 = vld [vmem:[#allocation2 + $0x48] sm:$0xff] }
  0xca   :  { %680 = vst [vmem:[#allocation2 + $0x38] sm:$0xff] %v648_v61  ;;  %v633_v63 = vadd.f32 %v555_v62, %v135_v59  ;;  %v157_v61 = vld [vmem:[#allocation2 + $0xc0] sm:$0xff] }
  0xcc   :  { %665 = vst [vmem:[#allocation2] sm:$0xff] %v633_v63  ;;  %v505_v0 = vpop.f32.mrf.mxu2 }
  0xcd   :  { %v594_v2 = vpop.f32.mrf.mxu3 }
  0xce   :  { %v595_v3 = vadd.f32 %v594_v2, %v505_v0  ;;  %v468_v4 = vpop.f32.mrf.mxu0 }
  0xcf   :  { %v557_v6 = vpop.f32.mrf.mxu1 }
  0xd0   :  { %v649_v7 = vadd.f32 %v595_v3, %v151_v1  ;;  %v558_v8 = vadd.f32 %v557_v6, %v468_v4  ;;  %v142_v1 = vld [vmem:[#allocation2 + $0x80] sm:$0xff] }
  0xd2   :  { %681 = vst [vmem:[#allocation2 + $0x58] sm:$0xff] %v649_v7  ;;  %v634_v9 = vadd.f32 %v558_v8, %v136_v5  ;;  %v158_v7 = vld [vmem:[#allocation2 + $0xa8] sm:$0xff] }
  0xd4   :  { %666 = vst [vmem:[#allocation2 + $0xd8] sm:$0xff] %v634_v9  ;;  %v508_v10 = vpop.f32.mrf.mxu2 }
  0xd5   :  { %v597_v12 = vpop.f32.mrf.mxu3 }
  0xd6   :  { %v598_v13 = vadd.f32 %v597_v12, %v508_v10  ;;  %v470_v14 = vpop.f32.mrf.mxu0 }
  0xd7   :  { %v559_v16 = vpop.f32.mrf.mxu1 }
  0xd8   :  { %v650_v17 = vadd.f32 %v598_v13, %v152_v11  ;;  %v560_v18 = vadd.f32 %v559_v16, %v470_v14  ;;  %v143_v11 = vld [vmem:[#allocation2 + $0x88] sm:$0xff] }
  0xda   :  { %682 = vst [vmem:[#allocation2 + $0x40] sm:$0xff] %v650_v17  ;;  %v635_v19 = vadd.f32 %v560_v18, %v137_v15  ;;  %v159_v17 = vld [vmem:[#allocation2 + $0xd0] sm:$0xff] }
  0xdc   :  { %667 = vst [vmem:[#allocation2 + $0x18] sm:$0xff] %v635_v19  ;;  %v510_v20 = vpop.f32.mrf.mxu2 }
  0xdd   :  { %v599_v22 = vpop.f32.mrf.mxu3 }
  0xde   :  { %v600_v23 = vadd.f32 %v599_v22, %v510_v20  ;;  %v473_v24 = vpop.f32.mrf.mxu0 }
  0xdf   :  { %v562_v26 = vpop.f32.mrf.mxu1 }
  0xe0   :  { %v651_v27 = vadd.f32 %v600_v23, %v153_v21  ;;  %v563_v28 = vadd.f32 %v562_v26, %v473_v24  ;;  %v144_v21 = vld [vmem:[#allocation2 + $0xe8] sm:$0xff] }
  0xe2   :  { %683 = vst [vmem:[#allocation2 + $0xc8] sm:$0xff] %v651_v27  ;;  %v636_v29 = vadd.f32 %v563_v28, %v138_v25  ;;  %v160_v27 = vld [vmem:[#allocation2 + $0x10] sm:$0xff] }
  0xe4   :  { %668 = vst [vmem:[#allocation2 + $0x50] sm:$0xff] %v636_v29  ;;  %v513_v30 = vpop.f32.mrf.mxu2 }
  0xe5   :  { %v602_v32 = vpop.f32.mrf.mxu3 }
  0xe6   :  { %v603_v33 = vadd.f32 %v602_v32, %v513_v30  ;;  %v475_v34 = vpop.f32.mrf.mxu0 }
  0xe7   :  { %v564_v36 = vpop.f32.mrf.mxu1 }
  0xe8   :  { %v652_v37 = vadd.f32 %v603_v33, %v154_v31  ;;  %v565_v38 = vadd.f32 %v564_v36, %v475_v34  ;;  %v145_v31 = vld [vmem:[#allocation2 + $0xb8] sm:$0xff] }
  0xea   :  { %684 = vst [vmem:[#allocation2 + $0xe0] sm:$0xff] %v652_v37  ;;  %v637_v39 = vadd.f32 %v565_v38, %v139_v35  ;;  %v161_v37 = vld [vmem:[#allocation2 + $0x28] sm:$0xff] }
  0xec   :  { %669 = vst [vmem:[#allocation2 + $0x68] sm:$0xff] %v637_v39  ;;  %v515_v40 = vpop.f32.mrf.mxu2 }
  0xed   :  { %v604_v42 = vpop.f32.mrf.mxu3 }
  0xee   :  { %v605_v43 = vadd.f32 %v604_v42, %v515_v40  ;;  %v478_v44 = vpop.f32.mrf.mxu0 }
  0xef   :  { %v567_v46 = vpop.f32.mrf.mxu1 }
  0xf0   :  { %v653_v47 = vadd.f32 %v605_v43, %v155_v41  ;;  %v568_v48 = vadd.f32 %v567_v46, %v478_v44  ;;  %v146_v41 = vld [vmem:[#allocation2 + $0x60] sm:$0xff] }
  0xf2   :  { %685 = vst [vmem:[#allocation2 + $0x90] sm:$0xff] %v653_v47  ;;  %v638_v49 = vadd.f32 %v568_v48, %v140_v45  ;;  %v162_v47 = vld [vmem:[#allocation2 + $0xa0] sm:$0xff] }
  0xf4   :  { %670 = vst [vmem:[#allocation2 + $0x30] sm:$0xff] %v638_v49  ;;  %v518_v50 = vpop.f32.mrf.mxu2 }
  0xf5   :  { %v607_v52 = vpop.f32.mrf.mxu3 }
  0xf6   :  { %v608_v53 = vadd.f32 %v607_v52, %v518_v50  ;;  %v480_v54 = vpop.f32.mrf.mxu0 }
  0xf7   :  { %v569_v56 = vpop.f32.mrf.mxu1 }
  0xf8   :  { %v654_v57 = vadd.f32 %v608_v53, %v156_v51  ;;  %v570_v58 = vadd.f32 %v569_v56, %v480_v54  ;;  %v147_v51 = vld [vmem:[#allocation2 + $0xf0] sm:$0xff] }
  0xfa   :  { %686 = vst [vmem:[#allocation2 + $0x70] sm:$0xff] %v654_v57  ;;  %v639_v59 = vadd.f32 %v570_v58, %v141_v55  ;;  %v163_v57 = vld [vmem:[#allocation2 + $0xf8] sm:$0xff] }
  0xfc   :  { %671 = vst [vmem:[#allocation2 + $0x48] sm:$0xff] %v639_v59  ;;  %v520_v60 = vpop.f32.mrf.mxu2 }
  0xfd   :  { %v609_v62 = vpop.f32.mrf.mxu3 }
  0xfe   :  { %v610_v63 = vadd.f32 %v609_v62, %v520_v60  ;;  %v483_v0 = vpop.f32.mrf.mxu0 }
  0xff   :  { %v572_v2 = vpop.f32.mrf.mxu1 }
 0x100   :  { %v655_v3 = vadd.f32 %v610_v63, %v157_v61  ;;  %v573_v4 = vadd.f32 %v572_v2, %v483_v0  ;;  %v148_v61 = vld [vmem:[#allocation2 + $0x8] sm:$0xff] }
 0x102   :  { %687 = vst [vmem:[#allocation2 + $0xc0] sm:$0xff] %v655_v3  ;;  %v640_v5 = vadd.f32 %v573_v4, %v142_v1  ;;  %v164_v3 = vld [vmem:[#allocation2 + $0x20] sm:$0xff] }
 0x104   :  { %672 = vst [vmem:[#allocation2 + $0x80] sm:$0xff] %v640_v5  ;;  %v523_v6 = vpop.f32.mrf.mxu2 }
 0x105   :  { %v612_v8 = vpop.f32.mrf.mxu3 }
 0x106   :  { %v613_v9 = vadd.f32 %v612_v8, %v523_v6  ;;  %v485_v10 = vpop.f32.mrf.mxu0 }
 0x107   :  { %v574_v12 = vpop.f32.mrf.mxu1 }
 0x108   :  { %v656_v13 = vadd.f32 %v613_v9, %v158_v7  ;;  %v575_v14 = vadd.f32 %v574_v12, %v485_v10  ;;  %v149_v7 = vld [vmem:[#allocation2 + $0x78] sm:$0xff] }
 0x10a   :  { %688 = vst [vmem:[#allocation2 + $0xa8] sm:$0xff] %v656_v13  ;;  %v641_v15 = vadd.f32 %v575_v14, %v143_v11  ;;  %v165_v13 = vld [vmem:[#allocation2 + $0x98] sm:$0xff] }
 0x10c   :  { %673 = vst [vmem:[#allocation2 + $0x88] sm:$0xff] %v641_v15  ;;  %v525_v16 = vpop.f32.mrf.mxu2 }
 0x10d   :  { %v614_v18 = vpop.f32.mrf.mxu3 }
 0x10e   :  { %v615_v19 = vadd.f32 %v614_v18, %v525_v16  ;;  %v488_v20 = vpop.f32.mrf.mxu0 }
 0x10f   :  { %v577_v22 = vpop.f32.mrf.mxu1 }
 0x110   :  { %v657_v23 = vadd.f32 %v615_v19, %v159_v17  ;;  %v578_v24 = vadd.f32 %v577_v22, %v488_v20 }
 0x112   :  { %689 = vst [vmem:[#allocation2 + $0xd0] sm:$0xff] %v657_v23  ;;  %v642_v25 = vadd.f32 %v578_v24, %v144_v21 }
 0x114   :  { %674 = vst [vmem:[#allocation2 + $0xe8] sm:$0xff] %v642_v25  ;;  %v528_v26 = vpop.f32.mrf.mxu2 }
 0x115   :  { %v617_v28 = vpop.f32.mrf.mxu3 }
 0x116   :  { %v618_v29 = vadd.f32 %v617_v28, %v528_v26  ;;  %v490_v30 = vpop.f32.mrf.mxu0 }
 0x117   :  { %v579_v32 = vpop.f32.mrf.mxu1 }
 0x118   :  { %v658_v33 = vadd.f32 %v618_v29, %v160_v27  ;;  %v580_v34 = vadd.f32 %v579_v32, %v490_v30 }
 0x11a   :  { %690 = vst [vmem:[#allocation2 + $0x10] sm:$0xff] %v658_v33  ;;  %v643_v35 = vadd.f32 %v580_v34, %v145_v31 }
 0x11c   :  { %675 = vst [vmem:[#allocation2 + $0xb8] sm:$0xff] %v643_v35  ;;  %v530_v36 = vpop.f32.mrf.mxu2 }
 0x11d   :  { %v619_v38 = vpop.f32.mrf.mxu3 }
 0x11e   :  { %v620_v39 = vadd.f32 %v619_v38, %v530_v36  ;;  %v493_v40 = vpop.f32.mrf.mxu0 }
 0x11f   :  { %v582_v42 = vpop.f32.mrf.mxu1 }
 0x120   :  { %v659_v43 = vadd.f32 %v620_v39, %v161_v37  ;;  %v583_v44 = vadd.f32 %v582_v42, %v493_v40 }
 0x122   :  { %691 = vst [vmem:[#allocation2 + $0x28] sm:$0xff] %v659_v43  ;;  %v644_v45 = vadd.f32 %v583_v44, %v146_v41 }
 0x124   :  { %676 = vst [vmem:[#allocation2 + $0x60] sm:$0xff] %v644_v45  ;;  %v533_v46 = vpop.f32.mrf.mxu2 }
 0x125   :  { %v622_v48 = vpop.f32.mrf.mxu3 }
 0x126   :  { %v623_v49 = vadd.f32 %v622_v48, %v533_v46  ;;  %v495_v50 = vpop.f32.mrf.mxu0 }
 0x127   :  { %v584_v52 = vpop.f32.mrf.mxu1 }
 0x128   :  { %v660_v53 = vadd.f32 %v623_v49, %v162_v47  ;;  %v585_v54 = vadd.f32 %v584_v52, %v495_v50 }
 0x12a   :  { %692 = vst [vmem:[#allocation2 + $0xa0] sm:$0xff] %v660_v53  ;;  %v645_v55 = vadd.f32 %v585_v54, %v147_v51 }
 0x12c   :  { %677 = vst [vmem:[#allocation2 + $0xf0] sm:$0xff] %v645_v55  ;;  %v535_v56 = vpop.f32.mrf.mxu2 }
 0x12d   :  { %v624_v58 = vpop.f32.mrf.mxu3 }
 0x12e   :  { %v625_v59 = vadd.f32 %v624_v58, %v535_v56  ;;  %v498_v60 = vpop.f32.mrf.mxu0 }
 0x12f   :  { %v587_v62 = vpop.f32.mrf.mxu1 }
 0x130   :  { %v661_v63 = vadd.f32 %v625_v59, %v163_v57  ;;  %v588_v0 = vadd.f32 %v587_v62, %v498_v60 }
 0x132   :  { %693 = vst [vmem:[#allocation2 + $0xf8] sm:$0xff] %v661_v63  ;;  %v646_v1 = vadd.f32 %v588_v0, %v148_v61 }
 0x134   :  { %678 = vst [vmem:[#allocation2 + $0x8] sm:$0xff] %v646_v1  ;;  %v538_v2 = vpop.f32.mrf.mxu2 }
 0x135   :  { %v627_v4 = vpop.f32.mrf.mxu3 }
 0x136   :  { %v628_v5 = vadd.f32 %v627_v4, %v538_v2  ;;  %v500_v6 = vpop.f32.mrf.mxu0 }
 0x137   :  { %v589_v8 = vpop.f32.mrf.mxu1 }
 0x138   :  { %v662_v9 = vadd.f32 %v628_v5, %v164_v3  ;;  %v590_v10 = vadd.f32 %v589_v8, %v500_v6 }
 0x13a   :  { %694 = vst [vmem:[#allocation2 + $0x20] sm:$0xff] %v662_v9  ;;  %v647_v11 = vadd.f32 %v590_v10, %v149_v7 }
 0x13c   :  { %679 = vst [vmem:[#allocation2 + $0x78] sm:$0xff] %v647_v11  ;;  %v540_v12 = vpop.f32.mrf.mxu2 }
 0x13d   :  { %v629_v14 = vpop.f32.mrf.mxu3 }
 0x13e   :  { %v630_v15 = vadd.f32 %v629_v14, %v540_v12 }
 0x140   :  { %v663_v16 = vadd.f32 %v630_v15, %v165_v13 }
 0x142   :  { %695 = vst [vmem:[#allocation2 + $0x98] sm:$0xff] %v663_v16 }
 0x143 PF:  { %v699_v17 = vld [vmem:[#allocation2 + $0xb0] sm:$0xff]  ;;  %v700_v18 = vld [vmem:[#allocation2] sm:$0xff]  ;;  %v701_v19 = vld [vmem:[#allocation2 + $0xd8] sm:$0xff] }
 0x144   :  { %v1056_v20 = vpack.c.bf16 %v700_v18, %v699_v17  ;;  %v702_v21 = vld [vmem:[#allocation2 + $0x18] sm:$0xff]  ;;  %v703_v22 = vld [vmem:[#allocation2 + $0x50] sm:$0xff]  ;;  %v704_v23 = vld [vmem:[#allocation2 + $0x68] sm:$0xff] }
 0x145   :  { %v1061_v24 = vpack.c.bf16 %v702_v21, %v701_v19  ;;  %v1066_v25 = vpack.c.bf16 %v704_v23, %v703_v22  ;;  %v705_v26 = vld [vmem:[#allocation2 + $0x30] sm:$0xff]  ;;  %v706_v27 = vld [vmem:[#allocation2 + $0x48] sm:$0xff]  ;;  %v707_v28 = vld [vmem:[#allocation2 + $0x80] sm:$0xff] }
 0x146   :  { %1057 = vst [vmem:[%s1341_s4] sm:$0xff] %v1056_v20   ;;  %v1071_v29 = vpack.c.bf16 %v706_v27, %v705_v26  ;;  %v708_v30 = vld [vmem:[#allocation2 + $0x88] sm:$0xff]  ;;  %v710_v32 = vld [vmem:[#allocation2 + $0xb8] sm:$0xff]  ;;  %v711_v35 = vld [vmem:[#allocation2 + $0x60] sm:$0xff] }
 0x147   :  { %v709_v31 = vld [vmem:[#allocation2 + $0xe8] sm:$0xff]  ;;  %1133 = vst [vmem:[%s1341_s4 + $0x8] sm:$0xff] %v1061_v24   ;;  %v1076_v33 = vpack.c.bf16 %v708_v30, %v707_v28  ;;  %v712_v36 = vld [vmem:[#allocation2 + $0xf0] sm:$0xff]  ;;  %v714_v39 = vld [vmem:[#allocation2 + $0x78] sm:$0xff] }
 0x148   :  { %v1081_v34 = vpack.c.bf16 %v710_v32, %v709_v31  ;;  %v713_v37 = vld [vmem:[#allocation2 + $0x8] sm:$0xff]  ;;  %1134 = vst [vmem:[%s1341_s4 + $0x10] sm:$0xff] %v1066_v25   ;;  %v1086_v38 = vpack.c.bf16 %v712_v36, %v711_v35  ;;  %v715_v40 = vld [vmem:[#allocation2 + $0x38] sm:$0xff]  ;;  %v717_v43 = vld [vmem:[#allocation2 + $0x40] sm:$0xff] }
 0x149   :  { %v716_v41 = vld [vmem:[#allocation2 + $0x58] sm:$0xff]  ;;  %1135 = vst [vmem:[%s1341_s4 + $0x18] sm:$0xff] %v1071_v29   ;;  %v1091_v42 = vpack.c.bf16 %v714_v39, %v713_v37  ;;  %v718_v44 = vld [vmem:[#allocation2 + $0xc8] sm:$0xff]  ;;  %v719_v45 = vld [vmem:[#allocation2 + $0xe0] sm:$0xff] }
 0x14a   :  { %1136 = vst [vmem:[%s1341_s4 + $0x20] sm:$0xff] %v1076_v33   ;;  %v1096_v46 = vpack.c.bf16 %v716_v41, %v715_v40  ;;  %v720_v47 = vld [vmem:[#allocation2 + $0x90] sm:$0xff]  ;;  %v722_v49 = vld [vmem:[#allocation2 + $0xc0] sm:$0xff]  ;;  %v1101_v50 = vpack.c.bf16 %v718_v44, %v717_v43  ;;  %v723_v51 = vld [vmem:[#allocation2 + $0xa8] sm:$0xff] }
 0x14b   :  { %v721_v48 = vld [vmem:[#allocation2 + $0x70] sm:$0xff]  ;;  %1137 = vst [vmem:[%s1341_s4 + $0x28] sm:$0xff] %v1081_v34   ;;  %v1106_v53 = vpack.c.bf16 %v720_v47, %v719_v45  ;;  %v726_v55 = vld [vmem:[#allocation2 + $0x28] sm:$0xff]  ;;  %v727_v57 = vld [vmem:[#allocation2 + $0xa0] sm:$0xff] }
 0x14c   :  { %v724_v52 = vld [vmem:[#allocation2 + $0xd0] sm:$0xff]  ;;  %1138 = vst [vmem:[%s1341_s4 + $0x30] sm:$0xff] %v1086_v38   ;;  %v1111_v56 = vpack.c.bf16 %v722_v49, %v721_v48  ;;  %v728_v58 = vld [vmem:[#allocation2 + $0xf8] sm:$0xff]  ;;  %v729_v60 = vld [vmem:[#allocation2 + $0x20] sm:$0xff] }
 0x14d   :  { %v725_v54 = vld [vmem:[#allocation2 + $0x10] sm:$0xff]  ;;  %1139 = vst [vmem:[%s1341_s4 + $0x38] sm:$0xff] %v1091_v42   ;;  %v1116_v59 = vpack.c.bf16 %v724_v52, %v723_v51  ;;  %v730_v61 = vld [vmem:[#allocation2 + $0x98] sm:$0xff]  ;;  %v1126_v63 = vpack.c.bf16 %v728_v58, %v727_v57 }
 0x14e   :  { %1140 = vst [vmem:[%s1341_s4 + $0x40] sm:$0xff] %v1096_v46   ;;  %v1121_v62 = vpack.c.bf16 %v726_v55, %v725_v54  ;;  %v1131_v0 = vpack.c.bf16 %v730_v61, %v729_v60 }
 0x14f   :  { %1141 = vst [vmem:[%s1341_s4 + $0x48] sm:$0xff] %v1101_v50  }
 0x150   :  { %1142 = vst [vmem:[%s1341_s4 + $0x50] sm:$0xff] %v1106_v53  }
 0x151   :  { %1143 = vst [vmem:[%s1341_s4 + $0x58] sm:$0xff] %v1111_v56  }
 0x152   :  { %1144 = vst [vmem:[%s1341_s4 + $0x60] sm:$0xff] %v1116_v59  }
 0x153   :  { %1145 = vst [vmem:[%s1341_s4 + $0x68] sm:$0xff] %v1121_v62  }
 0x154   :  { %1146 = vst [vmem:[%s1341_s4 + $0x70] sm:$0xff] %v1126_v63  }
 0x155   :  { %1147 = vst [vmem:[%s1341_s4 + $0x78] sm:$0xff] %v1131_v0  }

// kernel: kgcr_forward.11
= control target key start
LH: loop header
LB: loop body
LE: loop exit
PB: predicated region body
PF: predicated region fallthrough
CT: control target
= control target key end

     0   :  { %v1493_v0 = vmov 0.0   ;;  %s1921_s0 = inlined_call_operand.<no memory space> [shape: s32[1,1], index: 0, kind: input, shape index: {}]   ;;  %s1922_s1 = inlined_call_operand.<no memory space> [shape: s32[1], index: 1, kind: input, shape index: {}]   ;;  %s1923_s3 = inlined_call_operand.vmem [shape: bf16[256,128], index: 3, kind: input, shape index: {}, may-alias: {3,6}]   ;;  %s1924_s4 = inlined_call_operand.vmem [shape: f32[256,128], index: 4, kind: input, shape index: {}]   ;;  %s1925_s5 = inlined_call_operand.vmem [shape: bf16[256,128], index: 5, kind: input, shape index: {}]   ;;  %s1926_s6 = inlined_call_operand.vmem [shape: bf16[256,128], index: 6, kind: input, shape index: {}, may-alias: {3,6}]   ;;  %s1927_s7 = inlined_call_operand.vmem [shape: f32[256,128], index: 7, kind: output, shape index: {}]   ;;  %s1928_s2 = inlined_call_operand.vmem [shape: bf16[256,256], index: 2, kind: input, shape index: {}]  }
   0x1   :  { %12 = sst [smem:[#allocation4]] %s1921_s0  ;;  %s1072_s28 = sshll.u32 %s1921_s0, 1  ;;  %65 = vst [vmem:[#allocation2 + $0xb0] sm:$0xff] %v1493_v0 }
   0x2   :  { %p52_p0 = scmp.lt.s32.totalorder %s1072_s28, 1  ;;  %66 = vst [vmem:[#allocation2] sm:$0xff] %v1493_v0  ;;  %p1075_p1 = scmp.le.s32.totalorder %s1922_s1, 0 }
   0x3   :  { %67 = vst [vmem:[#allocation2 + $0xd8] sm:$0xff] %v1493_v0  ;;  %s105_s10 = sld [smem:[#allocation4]] (!%p1075_p1) }
   0x4   :  { %s1930_s28 = smov (!%p52_p0, %s1072_s28), 1  ;;  %68 = vst [vmem:[#allocation2 + $0x18] sm:$0xff] %v1493_v0 }
   0x5   :  { %69 = vst [vmem:[#allocation2 + $0x50] sm:$0xff] %v1493_v0  ;;  %s1073_s29 = sshll.u32 %s1930_s28, 2 }
   0x6   :  { %70 = vst [vmem:[#allocation2 + $0x68] sm:$0xff] %v1493_v0  ;;  %s1543_s9 = scalar_lea.vmem %s1928_s2, %s1073_s29 }
   0x7   :  { %71 = vst [vmem:[#allocation2 + $0x30] sm:$0xff] %v1493_v0 }
   0x8   :  { %72 = vst [vmem:[#allocation2 + $0x48] sm:$0xff] %v1493_v0 }
   0x9   :  { %73 = vst [vmem:[#allocation2 + $0x80] sm:$0xff] %v1493_v0  ;;  %s1076_s11 = sshll.u32 (!%p1075_p1), %s105_s10, 8 }
   0xa   :  { %74 = vst [vmem:[#allocation2 + $0x88] sm:$0xff] %v1493_v0  ;;  %s107_s12 = sshra.s32 (!%p1075_p1), %s1076_s11, 3 }
   0xb   :  { %75 = vst [vmem:[#allocation2 + $0xe8] sm:$0xff] %v1493_v0  ;;  %s1077_s13 = sshll.u32 (!%p1075_p1), %s107_s12, 2 }
   0xc   :  { %76 = vst [vmem:[#allocation2 + $0xb8] sm:$0xff] %v1493_v0  ;;  %s1551_s16 = scalar_lea.vmem (!%p1075_p1), %s1923_s3, %s1077_s13 }
   0xd   :  { %77 = vst [vmem:[#allocation2 + $0x60] sm:$0xff] %v1493_v0 }
   0xe   :  { %78 = vst [vmem:[#allocation2 + $0xf0] sm:$0xff] %v1493_v0 }
   0xf   :  { %79 = vst [vmem:[#allocation2 + $0x8] sm:$0xff] %v1493_v0 }
  0x10   :  { %80 = vst [vmem:[#allocation2 + $0x78] sm:$0xff] %v1493_v0 }
  0x11   :  { %81 = vst [vmem:[#allocation2 + $0x38] sm:$0xff] %v1493_v0 }
  0x12   :  { %82 = vst [vmem:[#allocation2 + $0x58] sm:$0xff] %v1493_v0 }
  0x13   :  { %83 = vst [vmem:[#allocation2 + $0x40] sm:$0xff] %v1493_v0 }
  0x14   :  { %84 = vst [vmem:[#allocation2 + $0xc8] sm:$0xff] %v1493_v0 }
  0x15   :  { %85 = vst [vmem:[#allocation2 + $0xe0] sm:$0xff] %v1493_v0 }
  0x16   :  { %86 = vst [vmem:[#allocation2 + $0x90] sm:$0xff] %v1493_v0 }
  0x17   :  { %87 = vst [vmem:[#allocation2 + $0x70] sm:$0xff] %v1493_v0 }
  0x18   :  { %88 = vst [vmem:[#allocation2 + $0xc0] sm:$0xff] %v1493_v0 }
  0x19   :  { %89 = vst [vmem:[#allocation2 + $0xa8] sm:$0xff] %v1493_v0 }
  0x1a   :  { %90 = vst [vmem:[#allocation2 + $0xd0] sm:$0xff] %v1493_v0 }
  0x1b   :  { %91 = vst [vmem:[#allocation2 + $0x10] sm:$0xff] %v1493_v0 }
  0x1c   :  { %92 = vst [vmem:[#allocation2 + $0x28] sm:$0xff] %v1493_v0  ;;  %101 = sbr.rel (%p1075_p1) target bundleno = 323 (0x143), region = 29 }
  0x1d   :  { %93 = vst [vmem:[#allocation2 + $0xa0] sm:$0xff] %v1493_v0 }
  0x1e   :  { %94 = vst [vmem:[#allocation2 + $0xf8] sm:$0xff] %v1493_v0 }
  0x1f   :  { %95 = vst [vmem:[#allocation2 + $0x20] sm:$0xff] %v1493_v0 }
  0x20   :  { %96 = vst [vmem:[#allocation2 + $0x98] sm:$0xff] %v1493_v0 }
  0x21   :  { %v1277_v1 = vld [vmem:[%s1551_s16 + $0x38] sm:$0xff]  ;;  %v1276_v3 = vld [vmem:[%s1551_s16 + $0x30] sm:$0xff]  ;;  %v1275_v5 = vld [vmem:[%s1551_s16 + $0x28] sm:$0xff] }
  0x22   :  { %v1285_v2 = vld [vmem:[%s1551_s16 + $0x78] sm:$0xff]  ;;  %463 = vmatpush.bf16.msra.mxu0 %v1277_v1  ;;  %1476 = vmatpush.bf16.msra.mxu2 %v1277_v1  ;;  %v1284_v4 = vld [vmem:[%s1551_s16 + $0x70] sm:$0xff]  ;;  %v1283_v6 = vld [vmem:[%s1551_s16 + $0x68] sm:$0xff] }
  0x23   :  { %552 = vmatpush.bf16.msra.mxu1 %v1285_v2  ;;  %1484 = vmatpush.bf16.msra.mxu3 %v1285_v2  ;;  %v1274_v7 = vld [vmem:[%s1551_s16 + $0x20] sm:$0xff]  ;;  %v1273_v9 = vld [vmem:[%s1551_s16 + $0x18] sm:$0xff]  ;;  %v1272_v11 = vld [vmem:[%s1551_s16 + $0x10] sm:$0xff] }
  0x24   :  { %v1282_v8 = vld [vmem:[%s1551_s16 + $0x60] sm:$0xff]  ;;  %v1281_v10 = vld [vmem:[%s1551_s16 + $0x58] sm:$0xff]  ;;  %v1280_v12 = vld [vmem:[%s1551_s16 + $0x50] sm:$0xff] }
  0x25   :  { %v1271_v13 = vld [vmem:[%s1551_s16 + $0x8] sm:$0xff]  ;;  %v1080_v15 = vld [vmem:[%s1543_s9] sm:$0xf]  ;;  %v1286_v21 = vld [vmem:[%s1543_s9 + $0x4] sm:$0xf] }
  0x26   :  { %464 = vmatpush.bf16.msra.mxu0 %v1276_v3  ;;  %1477 = vmatpush.bf16.msra.mxu2 %v1276_v3  ;;  %v1279_v14 = vld [vmem:[%s1551_s16 + $0x48] sm:$0xff]  ;;  %v1270_v16 = vld [vmem:[%s1551_s16] sm:$0xff]  ;;  %v1088_v29 = vld [vmem:[%s1543_s9 + $0x10] sm:$0xf] }
  0x27   :  { %553 = vmatpush.bf16.msra.mxu1 %v1284_v4  ;;  %1485 = vmatpush.bf16.msra.mxu3 %v1284_v4  ;;  %v1287_v17 = vld [vmem:[%s1543_s9 + $0x4] sm:$0xf0]  ;;  %v1144_v18 = vld [vmem:[%s1543_s9 + $0x80] sm:$0xf]  ;;  %v1082_v22 = vld [vmem:[%s1543_s9 + $0x8] sm:$0xf0] }
  0x28   :  { %v1278_v19 = vld [vmem:[%s1551_s16 + $0x40] sm:$0xff]  ;;  %v1303_v20 = vld [vmem:[%s1543_s9 + $0x84] sm:$0xf0]  ;;  %v1146_v24 = vld [vmem:[%s1543_s9 + $0x88] sm:$0xf0]  ;;  %v1081_v25 = vor.u32 %v1287_v17, %v1080_v15  ;;  %v1085_v27 = vor.u32 %v1286_v21, %v1082_v22 }
  0x29   :  { %v1302_v23 = vld [vmem:[%s1543_s9 + $0x84] sm:$0xf]  ;;  %v1145_v26 = vor.u32 %v1303_v20, %v1144_v18  ;;  %v1289_v30 = vld [vmem:[%s1543_s9 + $0x14] sm:$0xf0]  ;;  %v1152_v31 = vld [vmem:[%s1543_s9 + $0x90] sm:$0xf] }
  0x2a   :  { %465 = vmatpush.bf16.msra.mxu0 %v1275_v5  ;;  %1478 = vmatpush.bf16.msra.mxu2 %v1275_v5  ;;  %v1149_v28 = vor.u32 %v1302_v23, %v1146_v24  ;;  %v1305_v32 = vld [vmem:[%s1543_s9 + $0x94] sm:$0xf0]  ;;  %v1288_v33 = vld [vmem:[%s1543_s9 + $0x14] sm:$0xf]  ;;  %v1090_v34 = vld [vmem:[%s1543_s9 + $0x18] sm:$0xf0]  ;;  %v1089_v37 = vor.u32 %v1289_v30, %v1088_v29 }
  0x2b   :  { %554 = vmatpush.bf16.msra.mxu1 %v1283_v6  ;;  %1486 = vmatpush.bf16.msra.mxu3 %v1283_v6  ;;  %v1304_v35 = vld [vmem:[%s1543_s9 + $0x94] sm:$0xf]  ;;  %v1154_v36 = vld [vmem:[%s1543_s9 + $0x98] sm:$0xf0]  ;;  %v1153_v38 = vor.u32 %v1305_v32, %v1152_v31  ;;  %v1093_v39 = vor.u32 %v1288_v33, %v1090_v34  ;;  %v1096_v41 = vld [vmem:[%s1543_s9 + $0x20] sm:$0xf] }
  0x2c   :  { %v1157_v40 = vor.u32 %v1304_v35, %v1154_v36  ;;  %v1291_v42 = vld [vmem:[%s1543_s9 + $0x24] sm:$0xf0]  ;;  %v1160_v43 = vld [vmem:[%s1543_s9 + $0xa0] sm:$0xf]  ;;  %v1290_v45 = vld [vmem:[%s1543_s9 + $0x24] sm:$0xf] }
  0x2d   :  { %v1307_v44 = vld [vmem:[%s1543_s9 + $0xa4] sm:$0xf0]  ;;  %v1098_v46 = vld [vmem:[%s1543_s9 + $0x28] sm:$0xf0]  ;;  %v1306_v47 = vld [vmem:[%s1543_s9 + $0xa4] sm:$0xf]  ;;  %v1097_v49 = vor.u32 %v1291_v42, %v1096_v41 }
  0x2e   :  { %466 = vmatpush.bf16.msra.mxu0 %v1274_v7  ;;  %1479 = vmatpush.bf16.msra.mxu2 %v1274_v7  ;;  %v1162_v48 = vld [vmem:[%s1543_s9 + $0xa8] sm:$0xf0]  ;;  %v1161_v50 = vor.u32 %v1307_v44, %v1160_v43  ;;  %v1101_v51 = vor.u32 %v1290_v45, %v1098_v46  ;;  %v1104_v53 = vld [vmem:[%s1543_s9 + $0x30] sm:$0xf]  ;;  %v1293_v54 = vld [vmem:[%s1543_s9 + $0x34] sm:$0xf0] }
  0x2f   :  { %555 = vmatpush.bf16.msra.mxu1 %v1282_v8  ;;  %1487 = vmatpush.bf16.msra.mxu3 %v1282_v8  ;;  %v1165_v52 = vor.u32 %v1306_v47, %v1162_v48  ;;  %v1168_v55 = vld [vmem:[%s1543_s9 + $0xb0] sm:$0xf]  ;;  %v1309_v56 = vld [vmem:[%s1543_s9 + $0xb4] sm:$0xf0]  ;;  %v1292_v57 = vld [vmem:[%s1543_s9 + $0x34] sm:$0xf]  ;;  %v1105_v61 = vor.u32 %v1293_v54, %v1104_v53 }
  0x30   :  { %v1106_v58 = vld [vmem:[%s1543_s9 + $0x38] sm:$0xf0]  ;;  %v1308_v59 = vld [vmem:[%s1543_s9 + $0xb4] sm:$0xf]  ;;  %v1169_v62 = vor.u32 %v1309_v56, %v1168_v55  ;;  %v1112_v1 = vld [vmem:[%s1543_s9 + $0x40] sm:$0xf] }
  0x31   :  { %v1170_v60 = vld [vmem:[%s1543_s9 + $0xb8] sm:$0xf0]  ;;  %v1109_v63 = vor.u32 %v1292_v57, %v1106_v58  ;;  %v1295_v2 = vld [vmem:[%s1543_s9 + $0x44] sm:$0xf0]  ;;  %v1176_v3 = vld [vmem:[%s1543_s9 + $0xc0] sm:$0xf] }
  0x32   :  { %467 = vmatpush.bf16.msra.mxu0 %v1273_v9  ;;  %1480 = vmatpush.bf16.msra.mxu2 %v1273_v9  ;;  %v1173_v0 = vor.u32 %v1308_v59, %v1170_v60  ;;  %v1311_v4 = vld [vmem:[%s1543_s9 + $0xc4] sm:$0xf0]  ;;  %v1294_v5 = vld [vmem:[%s1543_s9 + $0x44] sm:$0xf]  ;;  %v1114_v6 = vld [vmem:[%s1543_s9 + $0x48] sm:$0xf0]  ;;  %v1113_v9 = vor.u32 %v1295_v2, %v1112_v1 }
  0x33   :  { %556 = vmatpush.bf16.msra.mxu1 %v1281_v10  ;;  %1488 = vmatpush.bf16.msra.mxu3 %v1281_v10  ;;  %v1310_v7 = vld [vmem:[%s1543_s9 + $0xc4] sm:$0xf]  ;;  %v1178_v8 = vld [vmem:[%s1543_s9 + $0xc8] sm:$0xf0]  ;;  %v1177_v10 = vor.u32 %v1311_v4, %v1176_v3  ;;  %v1184_v15 = vld [vmem:[%s1543_s9 + $0xd0] sm:$0xf] }
  0x34   :  { %v1296_v17 = vld [vmem:[%s1543_s9 + $0x54] sm:$0xf]  ;;  %v1122_v18 = vld [vmem:[%s1543_s9 + $0x58] sm:$0xf0]  ;;  %v1298_v29 = vld [vmem:[%s1543_s9 + $0x64] sm:$0xf] }
  0x35   :  { %v1186_v20 = vld [vmem:[%s1543_s9 + $0xd8] sm:$0xf0]  ;;  %v1125_v23 = vor.u32 %v1296_v17, %v1122_v18  ;;  %v1130_v30 = vld [vmem:[%s1543_s9 + $0x68] sm:$0xf0]  ;;  %v1314_v31 = vld [vmem:[%s1543_s9 + $0xe4] sm:$0xf] }
  0x36   :  { %468 = vmatpush.bf16.msra.mxu0 %v1272_v11  ;;  %1481 = vmatpush.bf16.msra.mxu2 %v1272_v11  ;;  %v1117_v11 = vor.u32 %v1294_v5, %v1114_v6  ;;  %v1194_v32 = vld [vmem:[%s1543_s9 + $0xe8] sm:$0xf0]  ;;  %v1133_v35 = vor.u32 %v1298_v29, %v1130_v30  ;;  %v1300_v41 = vld [vmem:[%s1543_s9 + $0x74] sm:$0xf]  ;;  %v1138_v42 = vld [vmem:[%s1543_s9 + $0x78] sm:$0xf0] }
  0x37   :  { %557 = vmatpush.bf16.msra.mxu1 %v1280_v12  ;;  %1489 = vmatpush.bf16.msra.mxu3 %v1280_v12  ;;  %v1181_v12 = vor.u32 %v1310_v7, %v1178_v8  ;;  %v1197_v36 = vor.u32 %v1314_v31, %v1194_v32  ;;  %v1316_v43 = vld [vmem:[%s1543_s9 + $0xf4] sm:$0xf]  ;;  %v1202_v44 = vld [vmem:[%s1543_s9 + $0xf8] sm:$0xf0]  ;;  %v1141_v47 = vor.u32 %v1300_v41, %v1138_v42  ;;  %v144_v59 = vld [vmem:[#allocation2] sm:$0xff] }
  0x38   :  { %v1205_v48 = vor.u32 %v1316_v43, %v1202_v44  ;;  %v159_v55 = vld [vmem:[#allocation2 + $0x38] sm:$0xff]  ;;  %v163_v31 = vld [vmem:[#allocation2 + $0xe0] sm:$0xff]  ;;  %v164_v41 = vld [vmem:[#allocation2 + $0x90] sm:$0xff] }
  0x39   :  { %v160_v1 = vld [vmem:[#allocation2 + $0x58] sm:$0xff] }
  0x3a   :  { %469 = vmatpush.bf16.msra.mxu0 %v1271_v13  ;;  %1482 = vmatpush.bf16.msra.mxu2 %v1271_v13  ;;  %v1120_v13 = vld [vmem:[%s1543_s9 + $0x50] sm:$0xf]  ;;  %v145_v5 = vld [vmem:[#allocation2 + $0xd8] sm:$0xff] }
  0x3b   :  { %558 = vmatpush.bf16.msra.mxu1 %v1279_v14  ;;  %1490 = vmatpush.bf16.msra.mxu3 %v1279_v14  ;;  %v1297_v14 = vld [vmem:[%s1543_s9 + $0x54] sm:$0xf0] }
  0x3c   :  { %v1121_v21 = vor.u32 %v1297_v14, %v1120_v13 }
  0x3e   :  { %470 = vmatpush.bf16.msra.mxu0 %v1270_v16  ;;  %1483 = vmatpush.bf16.msra.mxu2 %v1270_v16  ;;  %v1313_v16 = vld [vmem:[%s1543_s9 + $0xd4] sm:$0xf0] }
  0x3f   :  { %559 = vmatpush.bf16.msra.mxu1 %v1278_v19  ;;  %1491 = vmatpush.bf16.msra.mxu3 %v1278_v19  ;;  %v1312_v19 = vld [vmem:[%s1543_s9 + $0xd4] sm:$0xf]  ;;  %v1185_v22 = vor.u32 %v1313_v16, %v1184_v15  ;;  %v146_v15 = vld [vmem:[#allocation2 + $0x18] sm:$0xff] }
  0x40   :  { %v1189_v24 = vor.u32 %v1312_v19, %v1186_v20 }
  0x41   :  { %471 = vmatmul.bf16.vlgmr.msra.gmra.mxu0 %v1081_v25  ;;  %511 = vmatmul.bf16.vlgmr.msra.gmra.mxu2 %v1145_v26  ;;  %v1128_v25 = vld [vmem:[%s1543_s9 + $0x60] sm:$0xf]  ;;  %v1299_v26 = vld [vmem:[%s1543_s9 + $0x64] sm:$0xf0] }
  0x42   :  { %560 = vmatmul.bf16.vlgmr.msra.gmra.mxu1 %v1085_v27  ;;  %600 = vmatmul.bf16.vlgmr.msra.gmra.mxu3 %v1149_v28  ;;  %v1192_v27 = vld [vmem:[%s1543_s9 + $0xe0] sm:$0xf]  ;;  %v1315_v28 = vld [vmem:[%s1543_s9 + $0xe4] sm:$0xf0]  ;;  %v1129_v33 = vor.u32 %v1299_v26, %v1128_v25  ;;  %v147_v25 = vld [vmem:[#allocation2 + $0x50] sm:$0xff] }
  0x43   :  { %v1193_v34 = vor.u32 %v1315_v28, %v1192_v27 }
  0x51   :  { %476 = vmatmul.bf16.gmra.mxu0 %v1089_v37  ;;  %516 = vmatmul.bf16.gmra.mxu2 %v1153_v38  ;;  %v1136_v37 = vld [vmem:[%s1543_s9 + $0x70] sm:$0xf]  ;;  %v1301_v38 = vld [vmem:[%s1543_s9 + $0x74] sm:$0xf0] }
  0x52   :  { %565 = vmatmul.bf16.gmra.mxu1 %v1093_v39  ;;  %605 = vmatmul.bf16.gmra.mxu3 %v1157_v40  ;;  %v1200_v39 = vld [vmem:[%s1543_s9 + $0xf0] sm:$0xf]  ;;  %v1317_v40 = vld [vmem:[%s1543_s9 + $0xf4] sm:$0xf0]  ;;  %v1137_v45 = vor.u32 %v1301_v38, %v1136_v37 }
  0x53   :  { %v1201_v46 = vor.u32 %v1317_v40, %v1200_v39 }
  0x61   :  { %481 = vmatmul.bf16.gmra.mxu0 %v1097_v49  ;;  %521 = vmatmul.bf16.gmra.mxu2 %v1161_v50  ;;  %v143_v50 = vld [vmem:[#allocation2 + $0xb0] sm:$0xff] }
  0x62   :  { %570 = vmatmul.bf16.gmra.mxu1 %v1101_v51  ;;  %610 = vmatmul.bf16.gmra.mxu3 %v1165_v52 }
  0x71   :  { %486 = vmatmul.bf16.gmra.mxu0 %v1105_v61  ;;  %526 = vmatmul.bf16.gmra.mxu2 %v1169_v62 }
  0x72   :  { %575 = vmatmul.bf16.gmra.mxu1 %v1109_v63  ;;  %615 = vmatmul.bf16.gmra.mxu3 %v1173_v0 }
  0x81   :  { %491 = vmatmul.bf16.gmra.mxu0 %v1113_v9  ;;  %531 = vmatmul.bf16.gmra.mxu2 %v1177_v10 }
  0x82   :  { %580 = vmatmul.bf16.gmra.mxu1 %v1117_v11  ;;  %620 = vmatmul.bf16.gmra.mxu3 %v1181_v12  ;;  %v161_v11 = vld [vmem:[#allocation2 + $0x40] sm:$0xff] }
  0x91   :  { %496 = vmatmul.bf16.gmra.mxu0 %v1121_v21  ;;  %536 = vmatmul.bf16.gmra.mxu2 %v1185_v22  ;;  %v162_v21 = vld [vmem:[#allocation2 + $0xc8] sm:$0xff] }
  0x92   :  { %585 = vmatmul.bf16.gmra.mxu1 %v1125_v23  ;;  %625 = vmatmul.bf16.gmra.mxu3 %v1189_v24 }
  0xa1   :  { %501 = vmatmul.bf16.gmra.mxu0 %v1129_v33  ;;  %541 = vmatmul.bf16.gmra.mxu2 %v1193_v34 }
  0xa2   :  { %590 = vmatmul.bf16.gmra.mxu1 %v1133_v35  ;;  %630 = vmatmul.bf16.gmra.mxu3 %v1197_v36  ;;  %v148_v35 = vld [vmem:[#allocation2 + $0x68] sm:$0xff] }
  0xb1   :  { %506 = vmatmul.bf16.gmra.mxu0 %v1137_v45  ;;  %546 = vmatmul.bf16.gmra.mxu2 %v1201_v46  ;;  %v149_v45 = vld [vmem:[#allocation2 + $0x30] sm:$0xff] }
  0xb2   :  { %595 = vmatmul.bf16.gmra.mxu1 %v1141_v47  ;;  %635 = vmatmul.bf16.gmra.mxu3 %v1205_v48 }
  0xbe   :  { %v472_v49 = vpop.f32.mrf.mxu0 }
  0xbf   :  { %v561_v51 = vpop.f32.mrf.mxu1 }
  0xc0   :  { %v562_v52 = vadd.f32 %v561_v51, %v472_v49  ;;  %v165_v51 = vld [vmem:[#allocation2 + $0x70] sm:$0xff] }
  0xc2   :  { %v641_v53 = vadd.f32 %v562_v52, %v143_v50 }
  0xc4   :  { %673 = vst [vmem:[#allocation2 + $0xb0] sm:$0xff] %v641_v53  ;;  %v512_v54 = vpop.f32.mrf.mxu2 }
  0xc5   :  { %v601_v56 = vpop.f32.mrf.mxu3 }
  0xc6   :  { %v602_v57 = vadd.f32 %v601_v56, %v512_v54  ;;  %v474_v58 = vpop.f32.mrf.mxu0 }
  0xc7   :  { %v563_v60 = vpop.f32.mrf.mxu1 }
  0xc8   :  { %v657_v61 = vadd.f32 %v602_v57, %v159_v55  ;;  %v564_v62 = vadd.f32 %v563_v60, %v474_v58  ;;  %v150_v55 = vld [vmem:[#allocation2 + $0x48] sm:$0xff] }
  0xca   :  { %689 = vst [vmem:[#allocation2 + $0x38] sm:$0xff] %v657_v61  ;;  %v642_v63 = vadd.f32 %v564_v62, %v144_v59  ;;  %v166_v61 = vld [vmem:[#allocation2 + $0xc0] sm:$0xff] }
  0xcc   :  { %674 = vst [vmem:[#allocation2] sm:$0xff] %v642_v63  ;;  %v514_v0 = vpop.f32.mrf.mxu2 }
  0xcd   :  { %v603_v2 = vpop.f32.mrf.mxu3 }
  0xce   :  { %v604_v3 = vadd.f32 %v603_v2, %v514_v0  ;;  %v477_v4 = vpop.f32.mrf.mxu0 }
  0xcf   :  { %v566_v6 = vpop.f32.mrf.mxu1 }
  0xd0   :  { %v658_v7 = vadd.f32 %v604_v3, %v160_v1  ;;  %v567_v8 = vadd.f32 %v566_v6, %v477_v4  ;;  %v151_v1 = vld [vmem:[#allocation2 + $0x80] sm:$0xff] }
  0xd2   :  { %690 = vst [vmem:[#allocation2 + $0x58] sm:$0xff] %v658_v7  ;;  %v643_v9 = vadd.f32 %v567_v8, %v145_v5  ;;  %v167_v7 = vld [vmem:[#allocation2 + $0xa8] sm:$0xff] }
  0xd4   :  { %675 = vst [vmem:[#allocation2 + $0xd8] sm:$0xff] %v643_v9  ;;  %v517_v10 = vpop.f32.mrf.mxu2 }
  0xd5   :  { %v606_v12 = vpop.f32.mrf.mxu3 }
  0xd6   :  { %v607_v13 = vadd.f32 %v606_v12, %v517_v10  ;;  %v479_v14 = vpop.f32.mrf.mxu0 }
  0xd7   :  { %v568_v16 = vpop.f32.mrf.mxu1 }
  0xd8   :  { %v659_v17 = vadd.f32 %v607_v13, %v161_v11  ;;  %v569_v18 = vadd.f32 %v568_v16, %v479_v14  ;;  %v152_v11 = vld [vmem:[#allocation2 + $0x88] sm:$0xff] }
  0xda   :  { %691 = vst [vmem:[#allocation2 + $0x40] sm:$0xff] %v659_v17  ;;  %v644_v19 = vadd.f32 %v569_v18, %v146_v15  ;;  %v168_v17 = vld [vmem:[#allocation2 + $0xd0] sm:$0xff] }
  0xdc   :  { %676 = vst [vmem:[#allocation2 + $0x18] sm:$0xff] %v644_v19  ;;  %v519_v20 = vpop.f32.mrf.mxu2 }
  0xdd   :  { %v608_v22 = vpop.f32.mrf.mxu3 }
  0xde   :  { %v609_v23 = vadd.f32 %v608_v22, %v519_v20  ;;  %v482_v24 = vpop.f32.mrf.mxu0 }
  0xdf   :  { %v571_v26 = vpop.f32.mrf.mxu1 }
  0xe0   :  { %v660_v27 = vadd.f32 %v609_v23, %v162_v21  ;;  %v572_v28 = vadd.f32 %v571_v26, %v482_v24  ;;  %v153_v21 = vld [vmem:[#allocation2 + $0xe8] sm:$0xff] }
  0xe2   :  { %692 = vst [vmem:[#allocation2 + $0xc8] sm:$0xff] %v660_v27  ;;  %v645_v29 = vadd.f32 %v572_v28, %v147_v25  ;;  %v169_v27 = vld [vmem:[#allocation2 + $0x10] sm:$0xff] }
  0xe4   :  { %677 = vst [vmem:[#allocation2 + $0x50] sm:$0xff] %v645_v29  ;;  %v522_v30 = vpop.f32.mrf.mxu2 }
  0xe5   :  { %v611_v32 = vpop.f32.mrf.mxu3 }
  0xe6   :  { %v612_v33 = vadd.f32 %v611_v32, %v522_v30  ;;  %v484_v34 = vpop.f32.mrf.mxu0 }
  0xe7   :  { %v573_v36 = vpop.f32.mrf.mxu1 }
  0xe8   :  { %v661_v37 = vadd.f32 %v612_v33, %v163_v31  ;;  %v574_v38 = vadd.f32 %v573_v36, %v484_v34  ;;  %v154_v31 = vld [vmem:[#allocation2 + $0xb8] sm:$0xff] }
  0xea   :  { %693 = vst [vmem:[#allocation2 + $0xe0] sm:$0xff] %v661_v37  ;;  %v646_v39 = vadd.f32 %v574_v38, %v148_v35  ;;  %v170_v37 = vld [vmem:[#allocation2 + $0x28] sm:$0xff] }
  0xec   :  { %678 = vst [vmem:[#allocation2 + $0x68] sm:$0xff] %v646_v39  ;;  %v524_v40 = vpop.f32.mrf.mxu2 }
  0xed   :  { %v613_v42 = vpop.f32.mrf.mxu3 }
  0xee   :  { %v614_v43 = vadd.f32 %v613_v42, %v524_v40  ;;  %v487_v44 = vpop.f32.mrf.mxu0 }
  0xef   :  { %v576_v46 = vpop.f32.mrf.mxu1 }
  0xf0   :  { %v662_v47 = vadd.f32 %v614_v43, %v164_v41  ;;  %v577_v48 = vadd.f32 %v576_v46, %v487_v44  ;;  %v155_v41 = vld [vmem:[#allocation2 + $0x60] sm:$0xff] }
  0xf2   :  { %694 = vst [vmem:[#allocation2 + $0x90] sm:$0xff] %v662_v47  ;;  %v647_v49 = vadd.f32 %v577_v48, %v149_v45  ;;  %v171_v47 = vld [vmem:[#allocation2 + $0xa0] sm:$0xff] }
  0xf4   :  { %679 = vst [vmem:[#allocation2 + $0x30] sm:$0xff] %v647_v49  ;;  %v527_v50 = vpop.f32.mrf.mxu2 }
  0xf5   :  { %v616_v52 = vpop.f32.mrf.mxu3 }
  0xf6   :  { %v617_v53 = vadd.f32 %v616_v52, %v527_v50  ;;  %v489_v54 = vpop.f32.mrf.mxu0 }
  0xf7   :  { %v578_v56 = vpop.f32.mrf.mxu1 }
  0xf8   :  { %v663_v57 = vadd.f32 %v617_v53, %v165_v51  ;;  %v579_v58 = vadd.f32 %v578_v56, %v489_v54  ;;  %v156_v51 = vld [vmem:[#allocation2 + $0xf0] sm:$0xff] }
  0xfa   :  { %695 = vst [vmem:[#allocation2 + $0x70] sm:$0xff] %v663_v57  ;;  %v648_v59 = vadd.f32 %v579_v58, %v150_v55  ;;  %v172_v57 = vld [vmem:[#allocation2 + $0xf8] sm:$0xff] }
  0xfc   :  { %680 = vst [vmem:[#allocation2 + $0x48] sm:$0xff] %v648_v59  ;;  %v529_v60 = vpop.f32.mrf.mxu2 }
  0xfd   :  { %v618_v62 = vpop.f32.mrf.mxu3 }
  0xfe   :  { %v619_v63 = vadd.f32 %v618_v62, %v529_v60  ;;  %v492_v0 = vpop.f32.mrf.mxu0 }
  0xff   :  { %v581_v2 = vpop.f32.mrf.mxu1 }
 0x100   :  { %v664_v3 = vadd.f32 %v619_v63, %v166_v61  ;;  %v582_v4 = vadd.f32 %v581_v2, %v492_v0  ;;  %v157_v61 = vld [vmem:[#allocation2 + $0x8] sm:$0xff] }
 0x102   :  { %696 = vst [vmem:[#allocation2 + $0xc0] sm:$0xff] %v664_v3  ;;  %v649_v5 = vadd.f32 %v582_v4, %v151_v1  ;;  %v173_v3 = vld [vmem:[#allocation2 + $0x20] sm:$0xff] }
 0x104   :  { %681 = vst [vmem:[#allocation2 + $0x80] sm:$0xff] %v649_v5  ;;  %v532_v6 = vpop.f32.mrf.mxu2 }
 0x105   :  { %v621_v8 = vpop.f32.mrf.mxu3 }
 0x106   :  { %v622_v9 = vadd.f32 %v621_v8, %v532_v6  ;;  %v494_v10 = vpop.f32.mrf.mxu0 }
 0x107   :  { %v583_v12 = vpop.f32.mrf.mxu1 }
 0x108   :  { %v665_v13 = vadd.f32 %v622_v9, %v167_v7  ;;  %v584_v14 = vadd.f32 %v583_v12, %v494_v10  ;;  %v158_v7 = vld [vmem:[#allocation2 + $0x78] sm:$0xff] }
 0x10a   :  { %697 = vst [vmem:[#allocation2 + $0xa8] sm:$0xff] %v665_v13  ;;  %v650_v15 = vadd.f32 %v584_v14, %v152_v11  ;;  %v174_v13 = vld [vmem:[#allocation2 + $0x98] sm:$0xff] }
 0x10c   :  { %682 = vst [vmem:[#allocation2 + $0x88] sm:$0xff] %v650_v15  ;;  %v534_v16 = vpop.f32.mrf.mxu2 }
 0x10d   :  { %v623_v18 = vpop.f32.mrf.mxu3 }
 0x10e   :  { %v624_v19 = vadd.f32 %v623_v18, %v534_v16  ;;  %v497_v20 = vpop.f32.mrf.mxu0 }
 0x10f   :  { %v586_v22 = vpop.f32.mrf.mxu1 }
 0x110   :  { %v666_v23 = vadd.f32 %v624_v19, %v168_v17  ;;  %v587_v24 = vadd.f32 %v586_v22, %v497_v20 }
 0x112   :  { %698 = vst [vmem:[#allocation2 + $0xd0] sm:$0xff] %v666_v23  ;;  %v651_v25 = vadd.f32 %v587_v24, %v153_v21 }
 0x114   :  { %683 = vst [vmem:[#allocation2 + $0xe8] sm:$0xff] %v651_v25  ;;  %v537_v26 = vpop.f32.mrf.mxu2 }
 0x115   :  { %v626_v28 = vpop.f32.mrf.mxu3 }
 0x116   :  { %v627_v29 = vadd.f32 %v626_v28, %v537_v26  ;;  %v499_v30 = vpop.f32.mrf.mxu0 }
 0x117   :  { %v588_v32 = vpop.f32.mrf.mxu1 }
 0x118   :  { %v667_v33 = vadd.f32 %v627_v29, %v169_v27  ;;  %v589_v34 = vadd.f32 %v588_v32, %v499_v30 }
 0x11a   :  { %699 = vst [vmem:[#allocation2 + $0x10] sm:$0xff] %v667_v33  ;;  %v652_v35 = vadd.f32 %v589_v34, %v154_v31 }
 0x11c   :  { %684 = vst [vmem:[#allocation2 + $0xb8] sm:$0xff] %v652_v35  ;;  %v539_v36 = vpop.f32.mrf.mxu2 }
 0x11d   :  { %v628_v38 = vpop.f32.mrf.mxu3 }
 0x11e   :  { %v629_v39 = vadd.f32 %v628_v38, %v539_v36  ;;  %v502_v40 = vpop.f32.mrf.mxu0 }
 0x11f   :  { %v591_v42 = vpop.f32.mrf.mxu1 }
 0x120   :  { %v668_v43 = vadd.f32 %v629_v39, %v170_v37  ;;  %v592_v44 = vadd.f32 %v591_v42, %v502_v40 }
 0x122   :  { %700 = vst [vmem:[#allocation2 + $0x28] sm:$0xff] %v668_v43  ;;  %v653_v45 = vadd.f32 %v592_v44, %v155_v41 }
 0x124   :  { %685 = vst [vmem:[#allocation2 + $0x60] sm:$0xff] %v653_v45  ;;  %v542_v46 = vpop.f32.mrf.mxu2 }
 0x125   :  { %v631_v48 = vpop.f32.mrf.mxu3 }
 0x126   :  { %v632_v49 = vadd.f32 %v631_v48, %v542_v46  ;;  %v504_v50 = vpop.f32.mrf.mxu0 }
 0x127   :  { %v593_v52 = vpop.f32.mrf.mxu1 }
 0x128   :  { %v669_v53 = vadd.f32 %v632_v49, %v171_v47  ;;  %v594_v54 = vadd.f32 %v593_v52, %v504_v50 }
 0x12a   :  { %701 = vst [vmem:[#allocation2 + $0xa0] sm:$0xff] %v669_v53  ;;  %v654_v55 = vadd.f32 %v594_v54, %v156_v51 }
 0x12c   :  { %686 = vst [vmem:[#allocation2 + $0xf0] sm:$0xff] %v654_v55  ;;  %v544_v56 = vpop.f32.mrf.mxu2 }
 0x12d   :  { %v633_v58 = vpop.f32.mrf.mxu3 }
 0x12e   :  { %v634_v59 = vadd.f32 %v633_v58, %v544_v56  ;;  %v507_v60 = vpop.f32.mrf.mxu0 }
 0x12f   :  { %v596_v62 = vpop.f32.mrf.mxu1 }
 0x130   :  { %v670_v63 = vadd.f32 %v634_v59, %v172_v57  ;;  %v597_v0 = vadd.f32 %v596_v62, %v507_v60 }
 0x132   :  { %702 = vst [vmem:[#allocation2 + $0xf8] sm:$0xff] %v670_v63  ;;  %v655_v1 = vadd.f32 %v597_v0, %v157_v61 }
 0x134   :  { %687 = vst [vmem:[#allocation2 + $0x8] sm:$0xff] %v655_v1  ;;  %v547_v2 = vpop.f32.mrf.mxu2 }
 0x135   :  { %v636_v4 = vpop.f32.mrf.mxu3 }
 0x136   :  { %v637_v5 = vadd.f32 %v636_v4, %v547_v2  ;;  %v509_v6 = vpop.f32.mrf.mxu0 }
 0x137   :  { %v598_v8 = vpop.f32.mrf.mxu1 }
 0x138   :  { %v671_v9 = vadd.f32 %v637_v5, %v173_v3  ;;  %v599_v10 = vadd.f32 %v598_v8, %v509_v6 }
 0x13a   :  { %703 = vst [vmem:[#allocation2 + $0x20] sm:$0xff] %v671_v9  ;;  %v656_v11 = vadd.f32 %v599_v10, %v158_v7 }
 0x13c   :  { %688 = vst [vmem:[#allocation2 + $0x78] sm:$0xff] %v656_v11  ;;  %v549_v12 = vpop.f32.mrf.mxu2 }
 0x13d   :  { %v638_v14 = vpop.f32.mrf.mxu3 }
 0x13e   :  { %v639_v15 = vadd.f32 %v638_v14, %v549_v12 }
 0x140   :  { %v672_v16 = vadd.f32 %v639_v15, %v174_v13 }
 0x142   :  { %704 = vst [vmem:[#allocation2 + $0x98] sm:$0xff] %v672_v16 }
 0x143 PF:  { %v708_v17 = vld [vmem:[#allocation2 + $0xb0] sm:$0xff]  ;;  %v740_v18 = vld [vmem:[%s1924_s4] sm:$0xff]  ;;  %v741_v24 = vld [vmem:[%s1924_s4 + $0x8] sm:$0xff] }
 0x144   :  { %v1319_v19 = vld [vmem:[%s1925_s5] sm:$0xff]   ;;  %v772_v20 = vadd.f32 %v740_v18, %v708_v17  ;;  %v710_v29 = vld [vmem:[#allocation2 + $0xd8] sm:$0xff]  ;;  %v742_v30 = vld [vmem:[%s1924_s4 + $0x10] sm:$0xff] }
 0x145   :  { %v1320_v21 = vunpack.c.l.bf16 %v1319_v19  ;;  %v1383_v22 = vld [vmem:[%s1926_s6] sm:$0xff]   ;;  %v1321_v25 = vunpack.c.h.bf16 %v1319_v19  ;;  %v1446_v31 = vld [vmem:[%s1925_s5 + $0x8] sm:$0xff]   ;;  %v774_v33 = vadd.f32 %v742_v30, %v710_v29  ;;  %v711_v36 = vld [vmem:[#allocation2 + $0x18] sm:$0xff] }
 0x146   :  { %v709_v23 = vld [vmem:[#allocation2] sm:$0xff]  ;;  %v1384_v26 = vunpack.c.l.bf16 %v1383_v22  ;;  %v1385_v28 = vunpack.c.h.bf16 %v1383_v22  ;;  %v1324_v34 = vunpack.c.l.bf16 %v1446_v31  ;;  %v1461_v35 = vld [vmem:[%s1926_s6 + $0x8] sm:$0xff]   ;;  %v743_v37 = vld [vmem:[%s1924_s4 + $0x18] sm:$0xff]  ;;  %v1325_v38 = vunpack.c.h.bf16 %v1446_v31 }
 0x147   :  { %v773_v27 = vadd.f32 %v741_v24, %v709_v23  ;;  %v868_v32 = vadd.f32 %v1320_v21, %v772_v20  ;;  %v1388_v40 = vunpack.c.l.bf16 %v1461_v35  ;;  %v775_v41 = vadd.f32 %v743_v37, %v711_v36  ;;  %v712_v43 = vld [vmem:[#allocation2 + $0x50] sm:$0xff]  ;;  %v744_v44 = vld [vmem:[%s1924_s4 + $0x20] sm:$0xff]  ;;  %v713_v51 = vld [vmem:[#allocation2 + $0x68] sm:$0xff] }
 0x148   :  { %v1389_v42 = vunpack.c.h.bf16 %v1461_v35  ;;  %v1447_v45 = vld [vmem:[%s1925_s5 + $0x10] sm:$0xff]   ;;  %v870_v47 = vadd.f32 %v1324_v34, %v774_v33  ;;  %v776_v48 = vadd.f32 %v744_v44, %v712_v43  ;;  %v745_v52 = vld [vmem:[%s1924_s4 + $0x28] sm:$0xff]  ;;  %v1448_v59 = vld [vmem:[%s1925_s5 + $0x18] sm:$0xff]  }
 0x149   :  { %v869_v39 = vadd.f32 %v1321_v25, %v773_v27  ;;  %v964_v46 = vadd.f32 %v1384_v26, %v868_v32  ;;  %v1328_v49 = vunpack.c.l.bf16 %v1447_v45  ;;  %v1462_v50 = vld [vmem:[%s1926_s6 + $0x10] sm:$0xff]   ;;  %v871_v54 = vadd.f32 %v1325_v38, %v775_v41  ;;  %v1463_v0 = vld [vmem:[%s1926_s6 + $0x18] sm:$0xff]   ;;  %v715_v1 = vld [vmem:[#allocation2 + $0x48] sm:$0xff] }
 0x14a   :  { %v1392_v55 = vunpack.c.l.bf16 %v1462_v50  ;;  %v777_v56 = vadd.f32 %v745_v52, %v713_v51  ;;  %v714_v57 = vld [vmem:[#allocation2 + $0x30] sm:$0xff]  ;;  %v966_v61 = vadd.f32 %v1388_v40, %v870_v47  ;;  %v1329_v63 = vunpack.c.h.bf16 %v1447_v45  ;;  %v747_v2 = vld [vmem:[%s1924_s4 + $0x38] sm:$0xff]  ;;  %v716_v7 = vld [vmem:[#allocation2 + $0x80] sm:$0xff] }
 0x14b   :  { %v965_v53 = vadd.f32 %v1385_v28, %v869_v39  ;;  %v746_v58 = vld [vmem:[%s1924_s4 + $0x30] sm:$0xff]  ;;  %v996_v60 = vmul.f32 0.25, %v964_v46  ;;  %v872_v62 = vadd.f32 %v1328_v49, %v776_v48  ;;  %v967_v4 = vadd.f32 %v1389_v42, %v871_v54  ;;  %v748_v12 = vld [vmem:[%s1924_s4 + $0x40] sm:$0xff]  ;;  %v717_v19 = vld [vmem:[#allocation2 + $0x88] sm:$0xff] }
 0x14c   :  { %v1393_v5 = vunpack.c.h.bf16 %v1462_v50  ;;  %v778_v6 = vadd.f32 %v746_v58, %v714_v57  ;;  %v998_v8 = vmul.f32 0.25, %v966_v61  ;;  %v873_v10 = vadd.f32 %v1329_v63, %v777_v56  ;;  %v1449_v13 = vld [vmem:[%s1925_s5 + $0x20] sm:$0xff]   ;;  %v749_v20 = vld [vmem:[%s1924_s4 + $0x48] sm:$0xff]  ;;  %v750_v26 = vld [vmem:[%s1924_s4 + $0x50] sm:$0xff] }
 0x14d   :  { %v997_v3 = vmul.f32 0.25, %v965_v53  ;;  %1028 = vst [vmem:[%s1927_s7] sm:$0xff] %v996_v60  ;;  %v968_v9 = vadd.f32 %v1392_v55, %v872_v62  ;;  %v1332_v11 = vunpack.c.l.bf16 %v1448_v59  ;;  %v1464_v14 = vld [vmem:[%s1926_s6 + $0x20] sm:$0xff]   ;;  %v999_v15 = vmul.f32 0.25, %v967_v4  ;;  %v718_v25 = vld [vmem:[#allocation2 + $0xe8] sm:$0xff]  ;;  %v719_v37 = vld [vmem:[#allocation2 + $0xb8] sm:$0xff] }
 0x14e   :  { %v1396_v16 = vunpack.c.l.bf16 %v1463_v0  ;;  %v779_v17 = vadd.f32 %v747_v2, %v715_v1  ;;  %v1333_v18 = vunpack.c.h.bf16 %v1448_v59  ;;  %1030 = vst [vmem:[%s1927_s7 + $0x10] sm:$0xff] %v998_v8  ;;  %v969_v22 = vadd.f32 %v1393_v5, %v873_v10  ;;  %v1450_v31 = vld [vmem:[%s1925_s5 + $0x28] sm:$0xff]   ;;  %v751_v38 = vld [vmem:[%s1924_s4 + $0x58] sm:$0xff]  ;;  %v720_v43 = vld [vmem:[#allocation2 + $0x60] sm:$0xff] }
 0x14f   :  { %1029 = vst [vmem:[%s1927_s7 + $0x8] sm:$0xff] %v997_v3  ;;  %v1000_v21 = vmul.f32 0.25, %v968_v9  ;;  %v874_v23 = vadd.f32 %v1332_v11, %v778_v6  ;;  %v1397_v24 = vunpack.c.h.bf16 %v1463_v0  ;;  %v780_v28 = vadd.f32 %v748_v12, %v716_v7  ;;  %v1465_v32 = vld [vmem:[%s1926_s6 + $0x28] sm:$0xff]   ;;  %v752_v44 = vld [vmem:[%s1924_s4 + $0x60] sm:$0xff]  ;;  %v1451_v49 = vld [vmem:[%s1925_s5 + $0x30] sm:$0xff]  }
 0x150   :  { %1031 = vst [vmem:[%s1927_s7 + $0x18] sm:$0xff] %v999_v15  ;;  %v875_v27 = vadd.f32 %v1333_v18, %v779_v17  ;;  %v1336_v29 = vunpack.c.l.bf16 %v1449_v13  ;;  %v1400_v30 = vunpack.c.l.bf16 %v1464_v14  ;;  %v1001_v33 = vmul.f32 0.25, %v969_v22  ;;  %v1466_v50 = vld [vmem:[%s1926_s6 + $0x30] sm:$0xff]   ;;  %v753_v56 = vld [vmem:[%s1924_s4 + $0x68] sm:$0xff]  ;;  %v1452_v3 = vld [vmem:[%s1925_s5 + $0x38] sm:$0xff]  }
 0x151   :  { %1032 = vst [vmem:[%s1927_s7 + $0x20] sm:$0xff] %v1000_v21  ;;  %v970_v34 = vadd.f32 %v1396_v16, %v874_v23  ;;  %v781_v35 = vadd.f32 %v749_v20, %v717_v19  ;;  %v1337_v36 = vunpack.c.h.bf16 %v1449_v13  ;;  %v1401_v41 = vunpack.c.h.bf16 %v1464_v14  ;;  %v721_v55 = vld [vmem:[#allocation2 + $0xf0] sm:$0xff]  ;;  %v722_v61 = vld [vmem:[#allocation2 + $0x8] sm:$0xff]  ;;  %v1467_v4 = vld [vmem:[%s1926_s6 + $0x38] sm:$0xff]  }
 0x152   :  { %v971_v39 = vadd.f32 %v1397_v24, %v875_v27  ;;  %v876_v40 = vadd.f32 %v1336_v29, %v780_v28  ;;  %v782_v42 = vadd.f32 %v750_v26, %v718_v25  ;;  %1033 = vst [vmem:[%s1927_s7 + $0x28] sm:$0xff] %v1001_v33  ;;  %v1340_v47 = vunpack.c.l.bf16 %v1450_v31  ;;  %v754_v62 = vld [vmem:[%s1924_s4 + $0x70] sm:$0xff]  ;;  %v723_v9 = vld [vmem:[#allocation2 + $0x78] sm:$0xff]  ;;  %v756_v16 = vld [vmem:[%s1924_s4 + $0x80] sm:$0xff] }
 0x153   :  { %v1002_v45 = vmul.f32 0.25, %v970_v34  ;;  %v877_v46 = vadd.f32 %v1337_v36, %v781_v35  ;;  %v1404_v48 = vunpack.c.l.bf16 %v1465_v32  ;;  %v783_v53 = vadd.f32 %v751_v38, %v719_v37  ;;  %v755_v10 = vld [vmem:[%s1924_s4 + $0x78] sm:$0xff]  ;;  %v1453_v21 = vld [vmem:[%s1925_s5 + $0x40] sm:$0xff]   ;;  %v757_v28 = vld [vmem:[%s1924_s4 + $0x88] sm:$0xff] }
 0x154   :  { %v1003_v51 = vmul.f32 0.25, %v971_v39  ;;  %v972_v52 = vadd.f32 %v1400_v30, %v876_v40  ;;  %v1341_v54 = vunpack.c.h.bf16 %v1450_v31  ;;  %v878_v58 = vadd.f32 %v1340_v47, %v782_v42  ;;  %v724_v15 = vld [vmem:[#allocation2 + $0x38] sm:$0xff]  ;;  %v1468_v22 = vld [vmem:[%s1926_s6 + $0x40] sm:$0xff]   ;;  %v758_v34 = vld [vmem:[%s1924_s4 + $0x90] sm:$0xff] }
 0x155   :  { %1034 = vst [vmem:[%s1927_s7 + $0x30] sm:$0xff] %v1002_v45  ;;  %v973_v57 = vadd.f32 %v1401_v41, %v877_v46  ;;  %v1405_v59 = vunpack.c.h.bf16 %v1465_v32  ;;  %v784_v60 = vadd.f32 %v752_v44, %v720_v43  ;;  %v1344_v1 = vunpack.c.l.bf16 %v1451_v49  ;;  %v725_v27 = vld [vmem:[#allocation2 + $0x58] sm:$0xff]  ;;  %v726_v33 = vld [vmem:[#allocation2 + $0x40] sm:$0xff]  ;;  %v1454_v39 = vld [vmem:[%s1925_s5 + $0x48] sm:$0xff]  }
 0x156   :  { %1035 = vst [vmem:[%s1927_s7 + $0x38] sm:$0xff] %v1003_v51  ;;  %v1004_v63 = vmul.f32 0.25, %v972_v52  ;;  %v879_v0 = vadd.f32 %v1341_v54, %v783_v53  ;;  %v1408_v2 = vunpack.c.l.bf16 %v1466_v50  ;;  %v974_v6 = vadd.f32 %v1404_v48, %v878_v58  ;;  %v1469_v40 = vld [vmem:[%s1926_s6 + $0x48] sm:$0xff]   ;;  %v759_v46 = vld [vmem:[%s1924_s4 + $0x98] sm:$0xff]  ;;  %v728_v51 = vld [vmem:[#allocation2 + $0xe0] sm:$0xff] }
 0x157   :  { %v1005_v5 = vmul.f32 0.25, %v973_v57  ;;  %v785_v7 = vadd.f32 %v753_v56, %v721_v55  ;;  %v1345_v8 = vunpack.c.h.bf16 %v1451_v49  ;;  %v880_v12 = vadd.f32 %v1344_v1, %v784_v60  ;;  %v727_v45 = vld [vmem:[#allocation2 + $0xc8] sm:$0xff]  ;;  %v760_v52 = vld [vmem:[%s1924_s4 + $0xa0] sm:$0xff]  ;;  %v1455_v57 = vld [vmem:[%s1925_s5 + $0x50] sm:$0xff]  }
 0x158   :  { %1036 = vst [vmem:[%s1927_s7 + $0x40] sm:$0xff] %v1004_v63  ;;  %v975_v11 = vadd.f32 %v1405_v59, %v879_v0  ;;  %v1409_v13 = vunpack.c.h.bf16 %v1466_v50  ;;  %v786_v14 = vadd.f32 %v754_v62, %v722_v61  ;;  %v1006_v17 = vmul.f32 0.25, %v974_v6  ;;  %v1470_v58 = vld [vmem:[%s1926_s6 + $0x50] sm:$0xff]   ;;  %v761_v0 = vld [vmem:[%s1924_s4 + $0xa8] sm:$0xff] }
 0x159   :  { %1037 = vst [vmem:[%s1927_s7 + $0x48] sm:$0xff] %v1005_v5  ;;  %v881_v18 = vadd.f32 %v1345_v8, %v785_v7  ;;  %v1348_v19 = vunpack.c.l.bf16 %v1452_v3  ;;  %v1412_v20 = vunpack.c.l.bf16 %v1467_v4  ;;  %v976_v24 = vadd.f32 %v1408_v2, %v880_v12  ;;  %v729_v63 = vld [vmem:[#allocation2 + $0x90] sm:$0xff]  ;;  %v1471_v12 = vld [vmem:[%s1926_s6 + $0x58] sm:$0xff]  }
 0x15a   :  { %v1007_v23 = vmul.f32 0.25, %v975_v11  ;;  %v787_v25 = vadd.f32 %v755_v10, %v723_v9  ;;  %v1349_v26 = vunpack.c.h.bf16 %v1452_v3  ;;  %1038 = vst [vmem:[%s1927_s7 + $0x50] sm:$0xff] %v1006_v17  ;;  %v1413_v31 = vunpack.c.h.bf16 %v1467_v4  ;;  %v730_v5 = vld [vmem:[#allocation2 + $0x70] sm:$0xff]  ;;  %v1456_v11 = vld [vmem:[%s1925_s5 + $0x58] sm:$0xff]   ;;  %v731_v17 = vld [vmem:[#allocation2 + $0xc0] sm:$0xff] }
 0x15b   :  { %v977_v29 = vadd.f32 %v1409_v13, %v881_v18  ;;  %v882_v30 = vadd.f32 %v1348_v19, %v786_v14  ;;  %v788_v32 = vadd.f32 %v756_v16, %v724_v15  ;;  %v1008_v35 = vmul.f32 0.25, %v976_v24  ;;  %v762_v6 = vld [vmem:[%s1924_s4 + $0xb0] sm:$0xff]  ;;  %v763_v18 = vld [vmem:[%s1924_s4 + $0xb8] sm:$0xff]  ;;  %v764_v24 = vld [vmem:[%s1924_s4 + $0xc0] sm:$0xff] }
 0x15c   :  { %1039 = vst [vmem:[%s1927_s7 + $0x58] sm:$0xff] %v1007_v23  ;;  %v883_v36 = vadd.f32 %v1349_v26, %v787_v25  ;;  %v1352_v37 = vunpack.c.l.bf16 %v1453_v21  ;;  %v1416_v38 = vunpack.c.l.bf16 %v1468_v22  ;;  %v789_v43 = vadd.f32 %v757_v28, %v725_v27  ;;  %v732_v23 = vld [vmem:[#allocation2 + $0xa8] sm:$0xff] }
 0x15d   :  { %v1009_v41 = vmul.f32 0.25, %v977_v29  ;;  %v978_v42 = vadd.f32 %v1412_v20, %v882_v30  ;;  %v1353_v44 = vunpack.c.h.bf16 %v1453_v21  ;;  %1040 = vst [vmem:[%s1927_s7 + $0x60] sm:$0xff] %v1008_v35  ;;  %v1417_v49 = vunpack.c.h.bf16 %v1468_v22  ;;  %v1457_v29 = vld [vmem:[%s1925_s5 + $0x60] sm:$0xff]   ;;  %v733_v35 = vld [vmem:[#allocation2 + $0xd0] sm:$0xff] }
 0x15e   :  { %v979_v47 = vadd.f32 %v1413_v31, %v883_v36  ;;  %v884_v48 = vadd.f32 %v1352_v37, %v788_v32  ;;  %v790_v50 = vadd.f32 %v758_v34, %v726_v33  ;;  %v1356_v55 = vunpack.c.l.bf16 %v1454_v39  ;;  %v1472_v30 = vld [vmem:[%s1926_s6 + $0x60] sm:$0xff]   ;;  %v765_v36 = vld [vmem:[%s1924_s4 + $0xc8] sm:$0xff] }
 0x15f   :  { %1041 = vst [vmem:[%s1927_s7 + $0x68] sm:$0xff] %v1009_v41  ;;  %v1010_v53 = vmul.f32 0.25, %v978_v42  ;;  %v885_v54 = vadd.f32 %v1353_v44, %v789_v43  ;;  %v1420_v56 = vunpack.c.l.bf16 %v1469_v40  ;;  %v791_v61 = vadd.f32 %v759_v46, %v727_v45  ;;  %v734_v41 = vld [vmem:[#allocation2 + $0x10] sm:$0xff] }
 0x160   :  { %v1011_v59 = vmul.f32 0.25, %v979_v47  ;;  %v980_v60 = vadd.f32 %v1416_v38, %v884_v48  ;;  %v1357_v62 = vunpack.c.h.bf16 %v1454_v39  ;;  %v886_v2 = vadd.f32 %v1356_v55, %v790_v50  ;;  %v766_v42 = vld [vmem:[%s1924_s4 + $0xd0] sm:$0xff]  ;;  %v1458_v47 = vld [vmem:[%s1925_s5 + $0x68] sm:$0xff]  }
 0x161   :  { %1042 = vst [vmem:[%s1927_s7 + $0x70] sm:$0xff] %v1010_v53  ;;  %v981_v1 = vadd.f32 %v1417_v49, %v885_v54  ;;  %v1421_v3 = vunpack.c.h.bf16 %v1469_v40  ;;  %v792_v4 = vadd.f32 %v760_v52, %v728_v51  ;;  %v1360_v9 = vunpack.c.l.bf16 %v1455_v57  ;;  %v1473_v48 = vld [vmem:[%s1926_s6 + $0x68] sm:$0xff]   ;;  %v767_v54 = vld [vmem:[%s1924_s4 + $0xd8] sm:$0xff] }
 0x162   :  { %1043 = vst [vmem:[%s1927_s7 + $0x78] sm:$0xff] %v1011_v59  ;;  %v1012_v7 = vmul.f32 0.25, %v980_v60  ;;  %v887_v8 = vadd.f32 %v1357_v62, %v791_v61  ;;  %v1424_v10 = vunpack.c.l.bf16 %v1470_v58  ;;  %v982_v14 = vadd.f32 %v1420_v56, %v886_v2  ;;  %v735_v53 = vld [vmem:[#allocation2 + $0x28] sm:$0xff]  ;;  %v736_v59 = vld [vmem:[#allocation2 + $0xa0] sm:$0xff]  ;;  %v1474_v2 = vld [vmem:[%s1926_s6 + $0x70] sm:$0xff]  }
 0x163   :  { %v1013_v13 = vmul.f32 0.25, %v981_v1  ;;  %v793_v15 = vadd.f32 %v761_v0, %v729_v63  ;;  %v1361_v16 = vunpack.c.h.bf16 %v1455_v57  ;;  %v888_v20 = vadd.f32 %v1360_v9, %v792_v4  ;;  %v768_v60 = vld [vmem:[%s1924_s4 + $0xe0] sm:$0xff]  ;;  %v1459_v1 = vld [vmem:[%s1925_s5 + $0x70] sm:$0xff]  }
 0x164   :  { %1044 = vst [vmem:[%s1927_s7 + $0x80] sm:$0xff] %v1012_v7  ;;  %v983_v19 = vadd.f32 %v1421_v3, %v887_v8  ;;  %v1425_v21 = vunpack.c.h.bf16 %v1470_v58  ;;  %v794_v22 = vadd.f32 %v762_v6, %v730_v5  ;;  %v1014_v25 = vmul.f32 0.25, %v982_v14  ;;  %v737_v7 = vld [vmem:[#allocation2 + $0xf8] sm:$0xff]  ;;  %v769_v8 = vld [vmem:[%s1924_s4 + $0xe8] sm:$0xff]  ;;  %v770_v14 = vld [vmem:[%s1924_s4 + $0xf0] sm:$0xff] }
 0x165   :  { %1045 = vst [vmem:[%s1927_s7 + $0x88] sm:$0xff] %v1013_v13  ;;  %v889_v26 = vadd.f32 %v1361_v16, %v793_v15  ;;  %v1364_v27 = vunpack.c.l.bf16 %v1456_v11  ;;  %v1428_v28 = vunpack.c.l.bf16 %v1471_v12  ;;  %v984_v32 = vadd.f32 %v1424_v10, %v888_v20  ;;  %v738_v13 = vld [vmem:[#allocation2 + $0x20] sm:$0xff]  ;;  %v1475_v20 = vld [vmem:[%s1926_s6 + $0x78] sm:$0xff]  }
 0x166   :  { %v1015_v31 = vmul.f32 0.25, %v983_v19  ;;  %v795_v33 = vadd.f32 %v763_v18, %v731_v17  ;;  %v1365_v34 = vunpack.c.h.bf16 %v1456_v11  ;;  %1046 = vst [vmem:[%s1927_s7 + $0x90] sm:$0xff] %v1014_v25  ;;  %v1429_v39 = vunpack.c.h.bf16 %v1471_v12  ;;  %v1460_v19 = vld [vmem:[%s1925_s5 + $0x78] sm:$0xff]  }
 0x167   :  { %v985_v37 = vadd.f32 %v1425_v21, %v889_v26  ;;  %v890_v38 = vadd.f32 %v1364_v27, %v794_v22  ;;  %v796_v40 = vadd.f32 %v764_v24, %v732_v23  ;;  %v1016_v43 = vmul.f32 0.25, %v984_v32  ;;  %v739_v25 = vld [vmem:[#allocation2 + $0x98] sm:$0xff] }
 0x168   :  { %1047 = vst [vmem:[%s1927_s7 + $0x98] sm:$0xff] %v1015_v31  ;;  %v891_v44 = vadd.f32 %v1365_v34, %v795_v33  ;;  %v1368_v45 = vunpack.c.l.bf16 %v1457_v29  ;;  %v1432_v46 = vunpack.c.l.bf16 %v1472_v30  ;;  %v797_v51 = vadd.f32 %v765_v36, %v733_v35  ;;  %v771_v26 = vld [vmem:[%s1924_s4 + $0xf8] sm:$0xff] }
 0x169   :  { %v1017_v49 = vmul.f32 0.25, %v985_v37  ;;  %v986_v50 = vadd.f32 %v1428_v28, %v890_v38  ;;  %v1369_v52 = vunpack.c.h.bf16 %v1457_v29  ;;  %1048 = vst [vmem:[%s1927_s7 + $0xa0] sm:$0xff] %v1016_v43  ;;  %v1433_v57 = vunpack.c.h.bf16 %v1472_v30 }
 0x16a   :  { %v987_v55 = vadd.f32 %v1429_v39, %v891_v44  ;;  %v892_v56 = vadd.f32 %v1368_v45, %v796_v40  ;;  %v798_v58 = vadd.f32 %v766_v42, %v734_v41  ;;  %v1372_v63 = vunpack.c.l.bf16 %v1458_v47 }
 0x16b   :  { %1049 = vst [vmem:[%s1927_s7 + $0xa8] sm:$0xff] %v1017_v49  ;;  %v1018_v61 = vmul.f32 0.25, %v986_v50  ;;  %v893_v62 = vadd.f32 %v1369_v52, %v797_v51  ;;  %v1436_v0 = vunpack.c.l.bf16 %v1473_v48  ;;  %v799_v5 = vadd.f32 %v767_v54, %v735_v53 }
 0x16c   :  { %v1019_v3 = vmul.f32 0.25, %v987_v55  ;;  %v988_v4 = vadd.f32 %v1432_v46, %v892_v56  ;;  %v1373_v6 = vunpack.c.h.bf16 %v1458_v47  ;;  %v894_v10 = vadd.f32 %v1372_v63, %v798_v58 }
 0x16d   :  { %1050 = vst [vmem:[%s1927_s7 + $0xb0] sm:$0xff] %v1018_v61  ;;  %v989_v9 = vadd.f32 %v1433_v57, %v893_v62  ;;  %v1437_v11 = vunpack.c.h.bf16 %v1473_v48  ;;  %v800_v12 = vadd.f32 %v768_v60, %v736_v59  ;;  %v1376_v17 = vunpack.c.l.bf16 %v1459_v1 }
 0x16e   :  { %1051 = vst [vmem:[%s1927_s7 + $0xb8] sm:$0xff] %v1019_v3  ;;  %v1020_v15 = vmul.f32 0.25, %v988_v4  ;;  %v895_v16 = vadd.f32 %v1373_v6, %v799_v5  ;;  %v1440_v18 = vunpack.c.l.bf16 %v1474_v2  ;;  %v990_v22 = vadd.f32 %v1436_v0, %v894_v10 }
 0x16f   :  { %v1021_v21 = vmul.f32 0.25, %v989_v9  ;;  %v801_v23 = vadd.f32 %v769_v8, %v737_v7  ;;  %v1377_v24 = vunpack.c.h.bf16 %v1459_v1  ;;  %v896_v28 = vadd.f32 %v1376_v17, %v800_v12 }
 0x170   :  { %1052 = vst [vmem:[%s1927_s7 + $0xc0] sm:$0xff] %v1020_v15  ;;  %v991_v27 = vadd.f32 %v1437_v11, %v895_v16  ;;  %v1441_v29 = vunpack.c.h.bf16 %v1474_v2  ;;  %v802_v30 = vadd.f32 %v770_v14, %v738_v13  ;;  %v1022_v31 = vmul.f32 0.25, %v990_v22 }
 0x171   :  { %1053 = vst [vmem:[%s1927_s7 + $0xc8] sm:$0xff] %v1021_v21  ;;  %v897_v32 = vadd.f32 %v1377_v24, %v801_v23  ;;  %v1380_v33 = vunpack.c.l.bf16 %v1460_v19  ;;  %v1444_v34 = vunpack.c.l.bf16 %v1475_v20  ;;  %v992_v36 = vadd.f32 %v1440_v18, %v896_v28 }
 0x172   :  { %v1023_v35 = vmul.f32 0.25, %v991_v27  ;;  %v803_v37 = vadd.f32 %v771_v26, %v739_v25  ;;  %v1381_v38 = vunpack.c.h.bf16 %v1460_v19  ;;  %1054 = vst [vmem:[%s1927_s7 + $0xd0] sm:$0xff] %v1022_v31  ;;  %v1445_v41 = vunpack.c.h.bf16 %v1475_v20 }
 0x173   :  { %v993_v39 = vadd.f32 %v1441_v29, %v897_v32  ;;  %v898_v40 = vadd.f32 %v1380_v33, %v802_v30  ;;  %v1024_v42 = vmul.f32 0.25, %v992_v36 }
 0x174   :  { %1055 = vst [vmem:[%s1927_s7 + $0xd8] sm:$0xff] %v1023_v35  ;;  %v899_v43 = vadd.f32 %v1381_v38, %v803_v37 }
 0x175   :  { %v1025_v44 = vmul.f32 0.25, %v993_v39  ;;  %v994_v45 = vadd.f32 %v1444_v34, %v898_v40  ;;  %1056 = vst [vmem:[%s1927_s7 + $0xe0] sm:$0xff] %v1024_v42 }
 0x176   :  { %v995_v46 = vadd.f32 %v1445_v41, %v899_v43 }
 0x177   :  { %1057 = vst [vmem:[%s1927_s7 + $0xe8] sm:$0xff] %v1025_v44  ;;  %v1026_v47 = vmul.f32 0.25, %v994_v45 }
 0x178   :  { %v1027_v48 = vmul.f32 0.25, %v995_v46 }
 0x179   :  { %1058 = vst [vmem:[%s1927_s7 + $0xf0] sm:$0xff] %v1026_v47 }
 0x17a   :  { %1059 = vst [vmem:[%s1927_s7 + $0xf8] sm:$0xff] %v1027_v48 }

// kernel: kgcr_forward.12
= control target key start
LH: loop header
LB: loop body
LE: loop exit
PB: predicated region body
PF: predicated region fallthrough
CT: control target
= control target key end

     0   :  { %v1137_v0 = vmov 0.0   ;;  %s1459_s0 = inlined_call_operand.<no memory space> [shape: s32[1,1], index: 0, kind: input, shape index: {}]   ;;  %s1460_s1 = inlined_call_operand.<no memory space> [shape: s32[1], index: 1, kind: input, shape index: {}]   ;;  %s1461_s3 = inlined_call_operand.vmem [shape: bf16[256,128], index: 3, kind: input, shape index: {}]   ;;  %s1462_s4 = inlined_call_operand.vmem [shape: f32[256,128], index: 4, kind: input, shape index: {}]   ;;  %s1463_s5 = inlined_call_operand.vmem [shape: f32[256,128], index: 5, kind: output, shape index: {}]   ;;  %s1464_s2 = inlined_call_operand.vmem [shape: bf16[256,256], index: 2, kind: input, shape index: {}]  }
   0x1   :  { %10 = sst [smem:[#allocation4]] %s1459_s0  ;;  %s874_s22 = sshll.u32 %s1459_s0, 1  ;;  %59 = vst [vmem:[#allocation2 + $0xb0] sm:$0xff] %v1137_v0 }
   0x2   :  { %p46_p0 = scmp.lt.s32.totalorder %s874_s22, 1  ;;  %60 = vst [vmem:[#allocation2] sm:$0xff] %v1137_v0  ;;  %p877_p1 = scmp.le.s32.totalorder %s1460_s1, 0 }
   0x3   :  { %61 = vst [vmem:[#allocation2 + $0xd8] sm:$0xff] %v1137_v0  ;;  %s99_s27 = sld [smem:[#allocation4]] (!%p877_p1) }
   0x4   :  { %s1466_s22 = smov (!%p46_p0, %s874_s22), 1  ;;  %62 = vst [vmem:[#allocation2 + $0x18] sm:$0xff] %v1137_v0 }
   0x5   :  { %63 = vst [vmem:[#allocation2 + $0x50] sm:$0xff] %v1137_v0  ;;  %s875_s23 = sshll.u32 %s1466_s22, 2 }
   0x6   :  { %64 = vst [vmem:[#allocation2 + $0x68] sm:$0xff] %v1137_v0  ;;  %s1177_s26 = scalar_lea.vmem %s1464_s2, %s875_s23 }
   0x7   :  { %65 = vst [vmem:[#allocation2 + $0x30] sm:$0xff] %v1137_v0 }
   0x8   :  { %66 = vst [vmem:[#allocation2 + $0x48] sm:$0xff] %v1137_v0 }
   0x9   :  { %67 = vst [vmem:[#allocation2 + $0x80] sm:$0xff] %v1137_v0  ;;  %s878_s28 = sshll.u32 (!%p877_p1), %s99_s27, 8 }
   0xa   :  { %68 = vst [vmem:[#allocation2 + $0x88] sm:$0xff] %v1137_v0  ;;  %s101_s29 = sshra.s32 (!%p877_p1), %s878_s28, 3 }
   0xb   :  { %69 = vst [vmem:[#allocation2 + $0xe8] sm:$0xff] %v1137_v0  ;;  %s879_s30 = sshll.u32 (!%p877_p1), %s101_s29, 2 }
   0xc   :  { %70 = vst [vmem:[#allocation2 + $0xb8] sm:$0xff] %v1137_v0  ;;  %s1185_s8 = scalar_lea.vmem (!%p877_p1), %s1461_s3, %s879_s30 }
   0xd   :  { %71 = vst [vmem:[#allocation2 + $0x60] sm:$0xff] %v1137_v0 }
   0xe   :  { %72 = vst [vmem:[#allocation2 + $0xf0] sm:$0xff] %v1137_v0 }
   0xf   :  { %73 = vst [vmem:[#allocation2 + $0x8] sm:$0xff] %v1137_v0 }
  0x10   :  { %74 = vst [vmem:[#allocation2 + $0x78] sm:$0xff] %v1137_v0 }
  0x11   :  { %75 = vst [vmem:[#allocation2 + $0x38] sm:$0xff] %v1137_v0 }
  0x12   :  { %76 = vst [vmem:[#allocation2 + $0x58] sm:$0xff] %v1137_v0 }
  0x13   :  { %77 = vst [vmem:[#allocation2 + $0x40] sm:$0xff] %v1137_v0 }
  0x14   :  { %78 = vst [vmem:[#allocation2 + $0xc8] sm:$0xff] %v1137_v0 }
  0x15   :  { %79 = vst [vmem:[#allocation2 + $0xe0] sm:$0xff] %v1137_v0 }
  0x16   :  { %80 = vst [vmem:[#allocation2 + $0x90] sm:$0xff] %v1137_v0 }
  0x17   :  { %81 = vst [vmem:[#allocation2 + $0x70] sm:$0xff] %v1137_v0 }
  0x18   :  { %82 = vst [vmem:[#allocation2 + $0xc0] sm:$0xff] %v1137_v0 }
  0x19   :  { %83 = vst [vmem:[#allocation2 + $0xa8] sm:$0xff] %v1137_v0 }
  0x1a   :  { %84 = vst [vmem:[#allocation2 + $0xd0] sm:$0xff] %v1137_v0 }
  0x1b   :  { %85 = vst [vmem:[#allocation2 + $0x10] sm:$0xff] %v1137_v0 }
  0x1c   :  { %86 = vst [vmem:[#allocation2 + $0x28] sm:$0xff] %v1137_v0  ;;  %95 = sbr.rel (%p877_p1) target bundleno = 323 (0x143), region = 21 }
  0x1d   :  { %87 = vst [vmem:[#allocation2 + $0xa0] sm:$0xff] %v1137_v0 }
  0x1e   :  { %88 = vst [vmem:[#allocation2 + $0xf8] sm:$0xff] %v1137_v0 }
  0x1f   :  { %89 = vst [vmem:[#allocation2 + $0x20] sm:$0xff] %v1137_v0 }
  0x20   :  { %90 = vst [vmem:[#allocation2 + $0x98] sm:$0xff] %v1137_v0 }
  0x21   :  { %v1079_v1 = vld [vmem:[%s1185_s8 + $0x38] sm:$0xff]  ;;  %v1078_v3 = vld [vmem:[%s1185_s8 + $0x30] sm:$0xff]  ;;  %v1077_v5 = vld [vmem:[%s1185_s8 + $0x28] sm:$0xff] }
  0x22   :  { %v1087_v2 = vld [vmem:[%s1185_s8 + $0x78] sm:$0xff]  ;;  %457 = vmatpush.bf16.msra.mxu0 %v1079_v1  ;;  %1120 = vmatpush.bf16.msra.mxu2 %v1079_v1  ;;  %v1086_v4 = vld [vmem:[%s1185_s8 + $0x70] sm:$0xff]  ;;  %v1085_v6 = vld [vmem:[%s1185_s8 + $0x68] sm:$0xff] }
  0x23   :  { %546 = vmatpush.bf16.msra.mxu1 %v1087_v2  ;;  %1128 = vmatpush.bf16.msra.mxu3 %v1087_v2  ;;  %v1076_v7 = vld [vmem:[%s1185_s8 + $0x20] sm:$0xff]  ;;  %v1075_v9 = vld [vmem:[%s1185_s8 + $0x18] sm:$0xff]  ;;  %v1074_v11 = vld [vmem:[%s1185_s8 + $0x10] sm:$0xff] }
  0x24   :  { %v1084_v8 = vld [vmem:[%s1185_s8 + $0x60] sm:$0xff]  ;;  %v1083_v10 = vld [vmem:[%s1185_s8 + $0x58] sm:$0xff]  ;;  %v1082_v12 = vld [vmem:[%s1185_s8 + $0x50] sm:$0xff] }
  0x25   :  { %v1073_v13 = vld [vmem:[%s1185_s8 + $0x8] sm:$0xff]  ;;  %v882_v15 = vld [vmem:[%s1177_s26] sm:$0xf]  ;;  %v1088_v21 = vld [vmem:[%s1177_s26 + $0x4] sm:$0xf] }
  0x26   :  { %458 = vmatpush.bf16.msra.mxu0 %v1078_v3  ;;  %1121 = vmatpush.bf16.msra.mxu2 %v1078_v3  ;;  %v1081_v14 = vld [vmem:[%s1185_s8 + $0x48] sm:$0xff]  ;;  %v1072_v16 = vld [vmem:[%s1185_s8] sm:$0xff]  ;;  %v890_v29 = vld [vmem:[%s1177_s26 + $0x10] sm:$0xf] }
  0x27   :  { %547 = vmatpush.bf16.msra.mxu1 %v1086_v4  ;;  %1129 = vmatpush.bf16.msra.mxu3 %v1086_v4  ;;  %v1089_v17 = vld [vmem:[%s1177_s26 + $0x4] sm:$0xf0]  ;;  %v946_v18 = vld [vmem:[%s1177_s26 + $0x80] sm:$0xf]  ;;  %v884_v22 = vld [vmem:[%s1177_s26 + $0x8] sm:$0xf0] }
  0x28   :  { %v1080_v19 = vld [vmem:[%s1185_s8 + $0x40] sm:$0xff]  ;;  %v1105_v20 = vld [vmem:[%s1177_s26 + $0x84] sm:$0xf0]  ;;  %v948_v24 = vld [vmem:[%s1177_s26 + $0x88] sm:$0xf0]  ;;  %v883_v25 = vor.u32 %v1089_v17, %v882_v15  ;;  %v887_v27 = vor.u32 %v1088_v21, %v884_v22 }
  0x29   :  { %v1104_v23 = vld [vmem:[%s1177_s26 + $0x84] sm:$0xf]  ;;  %v947_v26 = vor.u32 %v1105_v20, %v946_v18  ;;  %v1091_v30 = vld [vmem:[%s1177_s26 + $0x14] sm:$0xf0]  ;;  %v954_v31 = vld [vmem:[%s1177_s26 + $0x90] sm:$0xf] }
  0x2a   :  { %459 = vmatpush.bf16.msra.mxu0 %v1077_v5  ;;  %1122 = vmatpush.bf16.msra.mxu2 %v1077_v5  ;;  %v951_v28 = vor.u32 %v1104_v23, %v948_v24  ;;  %v1107_v32 = vld [vmem:[%s1177_s26 + $0x94] sm:$0xf0]  ;;  %v1090_v33 = vld [vmem:[%s1177_s26 + $0x14] sm:$0xf]  ;;  %v892_v34 = vld [vmem:[%s1177_s26 + $0x18] sm:$0xf0]  ;;  %v891_v37 = vor.u32 %v1091_v30, %v890_v29 }
  0x2b   :  { %548 = vmatpush.bf16.msra.mxu1 %v1085_v6  ;;  %1130 = vmatpush.bf16.msra.mxu3 %v1085_v6  ;;  %v1106_v35 = vld [vmem:[%s1177_s26 + $0x94] sm:$0xf]  ;;  %v956_v36 = vld [vmem:[%s1177_s26 + $0x98] sm:$0xf0]  ;;  %v955_v38 = vor.u32 %v1107_v32, %v954_v31  ;;  %v895_v39 = vor.u32 %v1090_v33, %v892_v34  ;;  %v898_v41 = vld [vmem:[%s1177_s26 + $0x20] sm:$0xf] }
  0x2c   :  { %v959_v40 = vor.u32 %v1106_v35, %v956_v36  ;;  %v1093_v42 = vld [vmem:[%s1177_s26 + $0x24] sm:$0xf0]  ;;  %v962_v43 = vld [vmem:[%s1177_s26 + $0xa0] sm:$0xf]  ;;  %v1092_v45 = vld [vmem:[%s1177_s26 + $0x24] sm:$0xf] }
  0x2d   :  { %v1109_v44 = vld [vmem:[%s1177_s26 + $0xa4] sm:$0xf0]  ;;  %v900_v46 = vld [vmem:[%s1177_s26 + $0x28] sm:$0xf0]  ;;  %v1108_v47 = vld [vmem:[%s1177_s26 + $0xa4] sm:$0xf]  ;;  %v899_v49 = vor.u32 %v1093_v42, %v898_v41 }
  0x2e   :  { %460 = vmatpush.bf16.msra.mxu0 %v1076_v7  ;;  %1123 = vmatpush.bf16.msra.mxu2 %v1076_v7  ;;  %v964_v48 = vld [vmem:[%s1177_s26 + $0xa8] sm:$0xf0]  ;;  %v963_v50 = vor.u32 %v1109_v44, %v962_v43  ;;  %v903_v51 = vor.u32 %v1092_v45, %v900_v46  ;;  %v906_v53 = vld [vmem:[%s1177_s26 + $0x30] sm:$0xf]  ;;  %v1095_v54 = vld [vmem:[%s1177_s26 + $0x34] sm:$0xf0] }
  0x2f   :  { %549 = vmatpush.bf16.msra.mxu1 %v1084_v8  ;;  %1131 = vmatpush.bf16.msra.mxu3 %v1084_v8  ;;  %v967_v52 = vor.u32 %v1108_v47, %v964_v48  ;;  %v970_v55 = vld [vmem:[%s1177_s26 + $0xb0] sm:$0xf]  ;;  %v1111_v56 = vld [vmem:[%s1177_s26 + $0xb4] sm:$0xf0]  ;;  %v1094_v57 = vld [vmem:[%s1177_s26 + $0x34] sm:$0xf]  ;;  %v907_v61 = vor.u32 %v1095_v54, %v906_v53 }
  0x30   :  { %v908_v58 = vld [vmem:[%s1177_s26 + $0x38] sm:$0xf0]  ;;  %v1110_v59 = vld [vmem:[%s1177_s26 + $0xb4] sm:$0xf]  ;;  %v971_v62 = vor.u32 %v1111_v56, %v970_v55  ;;  %v914_v1 = vld [vmem:[%s1177_s26 + $0x40] sm:$0xf] }
  0x31   :  { %v972_v60 = vld [vmem:[%s1177_s26 + $0xb8] sm:$0xf0]  ;;  %v911_v63 = vor.u32 %v1094_v57, %v908_v58  ;;  %v1097_v2 = vld [vmem:[%s1177_s26 + $0x44] sm:$0xf0]  ;;  %v978_v3 = vld [vmem:[%s1177_s26 + $0xc0] sm:$0xf] }
  0x32   :  { %461 = vmatpush.bf16.msra.mxu0 %v1075_v9  ;;  %1124 = vmatpush.bf16.msra.mxu2 %v1075_v9  ;;  %v975_v0 = vor.u32 %v1110_v59, %v972_v60  ;;  %v1113_v4 = vld [vmem:[%s1177_s26 + $0xc4] sm:$0xf0]  ;;  %v1096_v5 = vld [vmem:[%s1177_s26 + $0x44] sm:$0xf]  ;;  %v916_v6 = vld [vmem:[%s1177_s26 + $0x48] sm:$0xf0]  ;;  %v915_v9 = vor.u32 %v1097_v2, %v914_v1 }
  0x33   :  { %550 = vmatpush.bf16.msra.mxu1 %v1083_v10  ;;  %1132 = vmatpush.bf16.msra.mxu3 %v1083_v10  ;;  %v1112_v7 = vld [vmem:[%s1177_s26 + $0xc4] sm:$0xf]  ;;  %v980_v8 = vld [vmem:[%s1177_s26 + $0xc8] sm:$0xf0]  ;;  %v979_v10 = vor.u32 %v1113_v4, %v978_v3  ;;  %v986_v15 = vld [vmem:[%s1177_s26 + $0xd0] sm:$0xf] }
  0x34   :  { %v1098_v17 = vld [vmem:[%s1177_s26 + $0x54] sm:$0xf]  ;;  %v924_v18 = vld [vmem:[%s1177_s26 + $0x58] sm:$0xf0]  ;;  %v1100_v29 = vld [vmem:[%s1177_s26 + $0x64] sm:$0xf] }
  0x35   :  { %v988_v20 = vld [vmem:[%s1177_s26 + $0xd8] sm:$0xf0]  ;;  %v927_v23 = vor.u32 %v1098_v17, %v924_v18  ;;  %v932_v30 = vld [vmem:[%s1177_s26 + $0x68] sm:$0xf0]  ;;  %v1116_v31 = vld [vmem:[%s1177_s26 + $0xe4] sm:$0xf] }
  0x36   :  { %462 = vmatpush.bf16.msra.mxu0 %v1074_v11  ;;  %1125 = vmatpush.bf16.msra.mxu2 %v1074_v11  ;;  %v919_v11 = vor.u32 %v1096_v5, %v916_v6  ;;  %v996_v32 = vld [vmem:[%s1177_s26 + $0xe8] sm:$0xf0]  ;;  %v935_v35 = vor.u32 %v1100_v29, %v932_v30  ;;  %v1102_v41 = vld [vmem:[%s1177_s26 + $0x74] sm:$0xf]  ;;  %v940_v42 = vld [vmem:[%s1177_s26 + $0x78] sm:$0xf0] }
  0x37   :  { %551 = vmatpush.bf16.msra.mxu1 %v1082_v12  ;;  %1133 = vmatpush.bf16.msra.mxu3 %v1082_v12  ;;  %v983_v12 = vor.u32 %v1112_v7, %v980_v8  ;;  %v999_v36 = vor.u32 %v1116_v31, %v996_v32  ;;  %v1118_v43 = vld [vmem:[%s1177_s26 + $0xf4] sm:$0xf]  ;;  %v1004_v44 = vld [vmem:[%s1177_s26 + $0xf8] sm:$0xf0]  ;;  %v943_v47 = vor.u32 %v1102_v41, %v940_v42  ;;  %v138_v59 = vld [vmem:[#allocation2] sm:$0xff] }
  0x38   :  { %v1007_v48 = vor.u32 %v1118_v43, %v1004_v44  ;;  %v153_v55 = vld [vmem:[#allocation2 + $0x38] sm:$0xff]  ;;  %v157_v31 = vld [vmem:[#allocation2 + $0xe0] sm:$0xff]  ;;  %v158_v41 = vld [vmem:[#allocation2 + $0x90] sm:$0xff] }
  0x39   :  { %v154_v1 = vld [vmem:[#allocation2 + $0x58] sm:$0xff] }
  0x3a   :  { %463 = vmatpush.bf16.msra.mxu0 %v1073_v13  ;;  %1126 = vmatpush.bf16.msra.mxu2 %v1073_v13  ;;  %v922_v13 = vld [vmem:[%s1177_s26 + $0x50] sm:$0xf]  ;;  %v139_v5 = vld [vmem:[#allocation2 + $0xd8] sm:$0xff] }
  0x3b   :  { %552 = vmatpush.bf16.msra.mxu1 %v1081_v14  ;;  %1134 = vmatpush.bf16.msra.mxu3 %v1081_v14  ;;  %v1099_v14 = vld [vmem:[%s1177_s26 + $0x54] sm:$0xf0] }
  0x3c   :  { %v923_v21 = vor.u32 %v1099_v14, %v922_v13 }
  0x3e   :  { %464 = vmatpush.bf16.msra.mxu0 %v1072_v16  ;;  %1127 = vmatpush.bf16.msra.mxu2 %v1072_v16  ;;  %v1115_v16 = vld [vmem:[%s1177_s26 + $0xd4] sm:$0xf0] }
  0x3f   :  { %553 = vmatpush.bf16.msra.mxu1 %v1080_v19  ;;  %1135 = vmatpush.bf16.msra.mxu3 %v1080_v19  ;;  %v1114_v19 = vld [vmem:[%s1177_s26 + $0xd4] sm:$0xf]  ;;  %v987_v22 = vor.u32 %v1115_v16, %v986_v15  ;;  %v140_v15 = vld [vmem:[#allocation2 + $0x18] sm:$0xff] }
  0x40   :  { %v991_v24 = vor.u32 %v1114_v19, %v988_v20 }
  0x41   :  { %465 = vmatmul.bf16.vlgmr.msra.gmra.mxu0 %v883_v25  ;;  %505 = vmatmul.bf16.vlgmr.msra.gmra.mxu2 %v947_v26  ;;  %v930_v25 = vld [vmem:[%s1177_s26 + $0x60] sm:$0xf]  ;;  %v1101_v26 = vld [vmem:[%s1177_s26 + $0x64] sm:$0xf0] }
  0x42   :  { %554 = vmatmul.bf16.vlgmr.msra.gmra.mxu1 %v887_v27  ;;  %594 = vmatmul.bf16.vlgmr.msra.gmra.mxu3 %v951_v28  ;;  %v994_v27 = vld [vmem:[%s1177_s26 + $0xe0] sm:$0xf]  ;;  %v1117_v28 = vld [vmem:[%s1177_s26 + $0xe4] sm:$0xf0]  ;;  %v931_v33 = vor.u32 %v1101_v26, %v930_v25  ;;  %v141_v25 = vld [vmem:[#allocation2 + $0x50] sm:$0xff] }
  0x43   :  { %v995_v34 = vor.u32 %v1117_v28, %v994_v27 }
  0x51   :  { %470 = vmatmul.bf16.gmra.mxu0 %v891_v37  ;;  %510 = vmatmul.bf16.gmra.mxu2 %v955_v38  ;;  %v938_v37 = vld [vmem:[%s1177_s26 + $0x70] sm:$0xf]  ;;  %v1103_v38 = vld [vmem:[%s1177_s26 + $0x74] sm:$0xf0] }
  0x52   :  { %559 = vmatmul.bf16.gmra.mxu1 %v895_v39  ;;  %599 = vmatmul.bf16.gmra.mxu3 %v959_v40  ;;  %v1002_v39 = vld [vmem:[%s1177_s26 + $0xf0] sm:$0xf]  ;;  %v1119_v40 = vld [vmem:[%s1177_s26 + $0xf4] sm:$0xf0]  ;;  %v939_v45 = vor.u32 %v1103_v38, %v938_v37 }
  0x53   :  { %v1003_v46 = vor.u32 %v1119_v40, %v1002_v39 }
  0x61   :  { %475 = vmatmul.bf16.gmra.mxu0 %v899_v49  ;;  %515 = vmatmul.bf16.gmra.mxu2 %v963_v50  ;;  %v137_v50 = vld [vmem:[#allocation2 + $0xb0] sm:$0xff] }
  0x62   :  { %564 = vmatmul.bf16.gmra.mxu1 %v903_v51  ;;  %604 = vmatmul.bf16.gmra.mxu3 %v967_v52 }
  0x71   :  { %480 = vmatmul.bf16.gmra.mxu0 %v907_v61  ;;  %520 = vmatmul.bf16.gmra.mxu2 %v971_v62 }
  0x72   :  { %569 = vmatmul.bf16.gmra.mxu1 %v911_v63  ;;  %609 = vmatmul.bf16.gmra.mxu3 %v975_v0 }
  0x81   :  { %485 = vmatmul.bf16.gmra.mxu0 %v915_v9  ;;  %525 = vmatmul.bf16.gmra.mxu2 %v979_v10 }
  0x82   :  { %574 = vmatmul.bf16.gmra.mxu1 %v919_v11  ;;  %614 = vmatmul.bf16.gmra.mxu3 %v983_v12  ;;  %v155_v11 = vld [vmem:[#allocation2 + $0x40] sm:$0xff] }
  0x91   :  { %490 = vmatmul.bf16.gmra.mxu0 %v923_v21  ;;  %530 = vmatmul.bf16.gmra.mxu2 %v987_v22  ;;  %v156_v21 = vld [vmem:[#allocation2 + $0xc8] sm:$0xff] }
  0x92   :  { %579 = vmatmul.bf16.gmra.mxu1 %v927_v23  ;;  %619 = vmatmul.bf16.gmra.mxu3 %v991_v24 }
  0xa1   :  { %495 = vmatmul.bf16.gmra.mxu0 %v931_v33  ;;  %535 = vmatmul.bf16.gmra.mxu2 %v995_v34 }
  0xa2   :  { %584 = vmatmul.bf16.gmra.mxu1 %v935_v35  ;;  %624 = vmatmul.bf16.gmra.mxu3 %v999_v36  ;;  %v142_v35 = vld [vmem:[#allocation2 + $0x68] sm:$0xff] }
  0xb1   :  { %500 = vmatmul.bf16.gmra.mxu0 %v939_v45  ;;  %540 = vmatmul.bf16.gmra.mxu2 %v1003_v46  ;;  %v143_v45 = vld [vmem:[#allocation2 + $0x30] sm:$0xff] }
  0xb2   :  { %589 = vmatmul.bf16.gmra.mxu1 %v943_v47  ;;  %629 = vmatmul.bf16.gmra.mxu3 %v1007_v48 }
  0xbe   :  { %v466_v49 = vpop.f32.mrf.mxu0 }
  0xbf   :  { %v555_v51 = vpop.f32.mrf.mxu1 }
  0xc0   :  { %v556_v52 = vadd.f32 %v555_v51, %v466_v49  ;;  %v159_v51 = vld [vmem:[#allocation2 + $0x70] sm:$0xff] }
  0xc2   :  { %v635_v53 = vadd.f32 %v556_v52, %v137_v50 }
  0xc4   :  { %667 = vst [vmem:[#allocation2 + $0xb0] sm:$0xff] %v635_v53  ;;  %v506_v54 = vpop.f32.mrf.mxu2 }
  0xc5   :  { %v595_v56 = vpop.f32.mrf.mxu3 }
  0xc6   :  { %v596_v57 = vadd.f32 %v595_v56, %v506_v54  ;;  %v468_v58 = vpop.f32.mrf.mxu0 }
  0xc7   :  { %v557_v60 = vpop.f32.mrf.mxu1 }
  0xc8   :  { %v651_v61 = vadd.f32 %v596_v57, %v153_v55  ;;  %v558_v62 = vadd.f32 %v557_v60, %v468_v58  ;;  %v144_v55 = vld [vmem:[#allocation2 + $0x48] sm:$0xff] }
  0xca   :  { %683 = vst [vmem:[#allocation2 + $0x38] sm:$0xff] %v651_v61  ;;  %v636_v63 = vadd.f32 %v558_v62, %v138_v59  ;;  %v160_v61 = vld [vmem:[#allocation2 + $0xc0] sm:$0xff] }
  0xcc   :  { %668 = vst [vmem:[#allocation2] sm:$0xff] %v636_v63  ;;  %v508_v0 = vpop.f32.mrf.mxu2 }
  0xcd   :  { %v597_v2 = vpop.f32.mrf.mxu3 }
  0xce   :  { %v598_v3 = vadd.f32 %v597_v2, %v508_v0  ;;  %v471_v4 = vpop.f32.mrf.mxu0 }
  0xcf   :  { %v560_v6 = vpop.f32.mrf.mxu1 }
  0xd0   :  { %v652_v7 = vadd.f32 %v598_v3, %v154_v1  ;;  %v561_v8 = vadd.f32 %v560_v6, %v471_v4  ;;  %v145_v1 = vld [vmem:[#allocation2 + $0x80] sm:$0xff] }
  0xd2   :  { %684 = vst [vmem:[#allocation2 + $0x58] sm:$0xff] %v652_v7  ;;  %v637_v9 = vadd.f32 %v561_v8, %v139_v5  ;;  %v161_v7 = vld [vmem:[#allocation2 + $0xa8] sm:$0xff] }
  0xd4   :  { %669 = vst [vmem:[#allocation2 + $0xd8] sm:$0xff] %v637_v9  ;;  %v511_v10 = vpop.f32.mrf.mxu2 }
  0xd5   :  { %v600_v12 = vpop.f32.mrf.mxu3 }
  0xd6   :  { %v601_v13 = vadd.f32 %v600_v12, %v511_v10  ;;  %v473_v14 = vpop.f32.mrf.mxu0 }
  0xd7   :  { %v562_v16 = vpop.f32.mrf.mxu1 }
  0xd8   :  { %v653_v17 = vadd.f32 %v601_v13, %v155_v11  ;;  %v563_v18 = vadd.f32 %v562_v16, %v473_v14  ;;  %v146_v11 = vld [vmem:[#allocation2 + $0x88] sm:$0xff] }
  0xda   :  { %685 = vst [vmem:[#allocation2 + $0x40] sm:$0xff] %v653_v17  ;;  %v638_v19 = vadd.f32 %v563_v18, %v140_v15  ;;  %v162_v17 = vld [vmem:[#allocation2 + $0xd0] sm:$0xff] }
  0xdc   :  { %670 = vst [vmem:[#allocation2 + $0x18] sm:$0xff] %v638_v19  ;;  %v513_v20 = vpop.f32.mrf.mxu2 }
  0xdd   :  { %v602_v22 = vpop.f32.mrf.mxu3 }
  0xde   :  { %v603_v23 = vadd.f32 %v602_v22, %v513_v20  ;;  %v476_v24 = vpop.f32.mrf.mxu0 }
  0xdf   :  { %v565_v26 = vpop.f32.mrf.mxu1 }
  0xe0   :  { %v654_v27 = vadd.f32 %v603_v23, %v156_v21  ;;  %v566_v28 = vadd.f32 %v565_v26, %v476_v24  ;;  %v147_v21 = vld [vmem:[#allocation2 + $0xe8] sm:$0xff] }
  0xe2   :  { %686 = vst [vmem:[#allocation2 + $0xc8] sm:$0xff] %v654_v27  ;;  %v639_v29 = vadd.f32 %v566_v28, %v141_v25  ;;  %v163_v27 = vld [vmem:[#allocation2 + $0x10] sm:$0xff] }
  0xe4   :  { %671 = vst [vmem:[#allocation2 + $0x50] sm:$0xff] %v639_v29  ;;  %v516_v30 = vpop.f32.mrf.mxu2 }
  0xe5   :  { %v605_v32 = vpop.f32.mrf.mxu3 }
  0xe6   :  { %v606_v33 = vadd.f32 %v605_v32, %v516_v30  ;;  %v478_v34 = vpop.f32.mrf.mxu0 }
  0xe7   :  { %v567_v36 = vpop.f32.mrf.mxu1 }
  0xe8   :  { %v655_v37 = vadd.f32 %v606_v33, %v157_v31  ;;  %v568_v38 = vadd.f32 %v567_v36, %v478_v34  ;;  %v148_v31 = vld [vmem:[#allocation2 + $0xb8] sm:$0xff] }
  0xea   :  { %687 = vst [vmem:[#allocation2 + $0xe0] sm:$0xff] %v655_v37  ;;  %v640_v39 = vadd.f32 %v568_v38, %v142_v35  ;;  %v164_v37 = vld [vmem:[#allocation2 + $0x28] sm:$0xff] }
  0xec   :  { %672 = vst [vmem:[#allocation2 + $0x68] sm:$0xff] %v640_v39  ;;  %v518_v40 = vpop.f32.mrf.mxu2 }
  0xed   :  { %v607_v42 = vpop.f32.mrf.mxu3 }
  0xee   :  { %v608_v43 = vadd.f32 %v607_v42, %v518_v40  ;;  %v481_v44 = vpop.f32.mrf.mxu0 }
  0xef   :  { %v570_v46 = vpop.f32.mrf.mxu1 }
  0xf0   :  { %v656_v47 = vadd.f32 %v608_v43, %v158_v41  ;;  %v571_v48 = vadd.f32 %v570_v46, %v481_v44  ;;  %v149_v41 = vld [vmem:[#allocation2 + $0x60] sm:$0xff] }
  0xf2   :  { %688 = vst [vmem:[#allocation2 + $0x90] sm:$0xff] %v656_v47  ;;  %v641_v49 = vadd.f32 %v571_v48, %v143_v45  ;;  %v165_v47 = vld [vmem:[#allocation2 + $0xa0] sm:$0xff] }
  0xf4   :  { %673 = vst [vmem:[#allocation2 + $0x30] sm:$0xff] %v641_v49  ;;  %v521_v50 = vpop.f32.mrf.mxu2 }
  0xf5   :  { %v610_v52 = vpop.f32.mrf.mxu3 }
  0xf6   :  { %v611_v53 = vadd.f32 %v610_v52, %v521_v50  ;;  %v483_v54 = vpop.f32.mrf.mxu0 }
  0xf7   :  { %v572_v56 = vpop.f32.mrf.mxu1 }
  0xf8   :  { %v657_v57 = vadd.f32 %v611_v53, %v159_v51  ;;  %v573_v58 = vadd.f32 %v572_v56, %v483_v54  ;;  %v150_v51 = vld [vmem:[#allocation2 + $0xf0] sm:$0xff] }
  0xfa   :  { %689 = vst [vmem:[#allocation2 + $0x70] sm:$0xff] %v657_v57  ;;  %v642_v59 = vadd.f32 %v573_v58, %v144_v55  ;;  %v166_v57 = vld [vmem:[#allocation2 + $0xf8] sm:$0xff] }
  0xfc   :  { %674 = vst [vmem:[#allocation2 + $0x48] sm:$0xff] %v642_v59  ;;  %v523_v60 = vpop.f32.mrf.mxu2 }
  0xfd   :  { %v612_v62 = vpop.f32.mrf.mxu3 }
  0xfe   :  { %v613_v63 = vadd.f32 %v612_v62, %v523_v60  ;;  %v486_v0 = vpop.f32.mrf.mxu0 }
  0xff   :  { %v575_v2 = vpop.f32.mrf.mxu1 }
 0x100   :  { %v658_v3 = vadd.f32 %v613_v63, %v160_v61  ;;  %v576_v4 = vadd.f32 %v575_v2, %v486_v0  ;;  %v151_v61 = vld [vmem:[#allocation2 + $0x8] sm:$0xff] }
 0x102   :  { %690 = vst [vmem:[#allocation2 + $0xc0] sm:$0xff] %v658_v3  ;;  %v643_v5 = vadd.f32 %v576_v4, %v145_v1  ;;  %v167_v3 = vld [vmem:[#allocation2 + $0x20] sm:$0xff] }
 0x104   :  { %675 = vst [vmem:[#allocation2 + $0x80] sm:$0xff] %v643_v5  ;;  %v526_v6 = vpop.f32.mrf.mxu2 }
 0x105   :  { %v615_v8 = vpop.f32.mrf.mxu3 }
 0x106   :  { %v616_v9 = vadd.f32 %v615_v8, %v526_v6  ;;  %v488_v10 = vpop.f32.mrf.mxu0 }
 0x107   :  { %v577_v12 = vpop.f32.mrf.mxu1 }
 0x108   :  { %v659_v13 = vadd.f32 %v616_v9, %v161_v7  ;;  %v578_v14 = vadd.f32 %v577_v12, %v488_v10  ;;  %v152_v7 = vld [vmem:[#allocation2 + $0x78] sm:$0xff] }
 0x10a   :  { %691 = vst [vmem:[#allocation2 + $0xa8] sm:$0xff] %v659_v13  ;;  %v644_v15 = vadd.f32 %v578_v14, %v146_v11  ;;  %v168_v13 = vld [vmem:[#allocation2 + $0x98] sm:$0xff] }
 0x10c   :  { %676 = vst [vmem:[#allocation2 + $0x88] sm:$0xff] %v644_v15  ;;  %v528_v16 = vpop.f32.mrf.mxu2 }
 0x10d   :  { %v617_v18 = vpop.f32.mrf.mxu3 }
 0x10e   :  { %v618_v19 = vadd.f32 %v617_v18, %v528_v16  ;;  %v491_v20 = vpop.f32.mrf.mxu0 }
 0x10f   :  { %v580_v22 = vpop.f32.mrf.mxu1 }
 0x110   :  { %v660_v23 = vadd.f32 %v618_v19, %v162_v17  ;;  %v581_v24 = vadd.f32 %v580_v22, %v491_v20 }
 0x112   :  { %692 = vst [vmem:[#allocation2 + $0xd0] sm:$0xff] %v660_v23  ;;  %v645_v25 = vadd.f32 %v581_v24, %v147_v21 }
 0x114   :  { %677 = vst [vmem:[#allocation2 + $0xe8] sm:$0xff] %v645_v25  ;;  %v531_v26 = vpop.f32.mrf.mxu2 }
 0x115   :  { %v620_v28 = vpop.f32.mrf.mxu3 }
 0x116   :  { %v621_v29 = vadd.f32 %v620_v28, %v531_v26  ;;  %v493_v30 = vpop.f32.mrf.mxu0 }
 0x117   :  { %v582_v32 = vpop.f32.mrf.mxu1 }
 0x118   :  { %v661_v33 = vadd.f32 %v621_v29, %v163_v27  ;;  %v583_v34 = vadd.f32 %v582_v32, %v493_v30 }
 0x11a   :  { %693 = vst [vmem:[#allocation2 + $0x10] sm:$0xff] %v661_v33  ;;  %v646_v35 = vadd.f32 %v583_v34, %v148_v31 }
 0x11c   :  { %678 = vst [vmem:[#allocation2 + $0xb8] sm:$0xff] %v646_v35  ;;  %v533_v36 = vpop.f32.mrf.mxu2 }
 0x11d   :  { %v622_v38 = vpop.f32.mrf.mxu3 }
 0x11e   :  { %v623_v39 = vadd.f32 %v622_v38, %v533_v36  ;;  %v496_v40 = vpop.f32.mrf.mxu0 }
 0x11f   :  { %v585_v42 = vpop.f32.mrf.mxu1 }
 0x120   :  { %v662_v43 = vadd.f32 %v623_v39, %v164_v37  ;;  %v586_v44 = vadd.f32 %v585_v42, %v496_v40 }
 0x122   :  { %694 = vst [vmem:[#allocation2 + $0x28] sm:$0xff] %v662_v43  ;;  %v647_v45 = vadd.f32 %v586_v44, %v149_v41 }
 0x124   :  { %679 = vst [vmem:[#allocation2 + $0x60] sm:$0xff] %v647_v45  ;;  %v536_v46 = vpop.f32.mrf.mxu2 }
 0x125   :  { %v625_v48 = vpop.f32.mrf.mxu3 }
 0x126   :  { %v626_v49 = vadd.f32 %v625_v48, %v536_v46  ;;  %v498_v50 = vpop.f32.mrf.mxu0 }
 0x127   :  { %v587_v52 = vpop.f32.mrf.mxu1 }
 0x128   :  { %v663_v53 = vadd.f32 %v626_v49, %v165_v47  ;;  %v588_v54 = vadd.f32 %v587_v52, %v498_v50 }
 0x12a   :  { %695 = vst [vmem:[#allocation2 + $0xa0] sm:$0xff] %v663_v53  ;;  %v648_v55 = vadd.f32 %v588_v54, %v150_v51 }
 0x12c   :  { %680 = vst [vmem:[#allocation2 + $0xf0] sm:$0xff] %v648_v55  ;;  %v538_v56 = vpop.f32.mrf.mxu2 }
 0x12d   :  { %v627_v58 = vpop.f32.mrf.mxu3 }
 0x12e   :  { %v628_v59 = vadd.f32 %v627_v58, %v538_v56  ;;  %v501_v60 = vpop.f32.mrf.mxu0 }
 0x12f   :  { %v590_v62 = vpop.f32.mrf.mxu1 }
 0x130   :  { %v664_v63 = vadd.f32 %v628_v59, %v166_v57  ;;  %v591_v0 = vadd.f32 %v590_v62, %v501_v60 }
 0x132   :  { %696 = vst [vmem:[#allocation2 + $0xf8] sm:$0xff] %v664_v63  ;;  %v649_v1 = vadd.f32 %v591_v0, %v151_v61 }
 0x134   :  { %681 = vst [vmem:[#allocation2 + $0x8] sm:$0xff] %v649_v1  ;;  %v541_v2 = vpop.f32.mrf.mxu2 }
 0x135   :  { %v630_v4 = vpop.f32.mrf.mxu3 }
 0x136   :  { %v631_v5 = vadd.f32 %v630_v4, %v541_v2  ;;  %v503_v6 = vpop.f32.mrf.mxu0 }
 0x137   :  { %v592_v8 = vpop.f32.mrf.mxu1 }
 0x138   :  { %v665_v9 = vadd.f32 %v631_v5, %v167_v3  ;;  %v593_v10 = vadd.f32 %v592_v8, %v503_v6 }
 0x13a   :  { %697 = vst [vmem:[#allocation2 + $0x20] sm:$0xff] %v665_v9  ;;  %v650_v11 = vadd.f32 %v593_v10, %v152_v7 }
 0x13c   :  { %682 = vst [vmem:[#allocation2 + $0x78] sm:$0xff] %v650_v11  ;;  %v543_v12 = vpop.f32.mrf.mxu2 }
 0x13d   :  { %v632_v14 = vpop.f32.mrf.mxu3 }
 0x13e   :  { %v633_v15 = vadd.f32 %v632_v14, %v543_v12 }
 0x140   :  { %v666_v16 = vadd.f32 %v633_v15, %v168_v13 }
 0x142   :  { %698 = vst [vmem:[#allocation2 + $0x98] sm:$0xff] %v666_v16 }
 0x143 PF:  { %v702_v17 = vld [vmem:[#allocation2 + $0xb0] sm:$0xff]  ;;  %v734_v18 = vld [vmem:[%s1462_s4] sm:$0xff]  ;;  %v735_v21 = vld [vmem:[%s1462_s4 + $0x8] sm:$0xff] }
 0x144   :  { %v703_v19 = vld [vmem:[#allocation2] sm:$0xff]  ;;  %v766_v20 = vadd.f32 %v734_v18, %v702_v17  ;;  %v704_v22 = vld [vmem:[#allocation2 + $0xd8] sm:$0xff]  ;;  %v736_v23 = vld [vmem:[%s1462_s4 + $0x10] sm:$0xff] }
 0x145   :  { %v767_v24 = vadd.f32 %v735_v21, %v703_v19  ;;  %v768_v25 = vadd.f32 %v736_v23, %v704_v22  ;;  %v705_v26 = vld [vmem:[#allocation2 + $0x18] sm:$0xff]  ;;  %v706_v28 = vld [vmem:[#allocation2 + $0x50] sm:$0xff]  ;;  %v738_v31 = vld [vmem:[%s1462_s4 + $0x20] sm:$0xff] }
 0x146   :  { %v737_v27 = vld [vmem:[%s1462_s4 + $0x18] sm:$0xff]  ;;  %v798_v29 = vmul.f32 0.5, %v766_v20  ;;  %v707_v32 = vld [vmem:[#allocation2 + $0x68] sm:$0xff]  ;;  %v770_v36 = vadd.f32 %v738_v31, %v706_v28  ;;  %v708_v38 = vld [vmem:[#allocation2 + $0x30] sm:$0xff] }
 0x147   :  { %v769_v30 = vadd.f32 %v737_v27, %v705_v26  ;;  %v739_v33 = vld [vmem:[%s1462_s4 + $0x28] sm:$0xff]  ;;  %v799_v34 = vmul.f32 0.5, %v767_v24  ;;  %v800_v35 = vmul.f32 0.5, %v768_v25  ;;  %v740_v39 = vld [vmem:[%s1462_s4 + $0x30] sm:$0xff]  ;;  %v741_v43 = vld [vmem:[%s1462_s4 + $0x38] sm:$0xff] }
 0x148   :  { %v771_v37 = vadd.f32 %v739_v33, %v707_v32  ;;  %v709_v40 = vld [vmem:[#allocation2 + $0x48] sm:$0xff]  ;;  %830 = vst [vmem:[%s1463_s5] sm:$0xff] %v798_v29  ;;  %v772_v42 = vadd.f32 %v740_v39, %v708_v38  ;;  %v710_v44 = vld [vmem:[#allocation2 + $0x80] sm:$0xff]  ;;  %v802_v46 = vmul.f32 0.5, %v770_v36  ;;  %v744_v55 = vld [vmem:[%s1462_s4 + $0x50] sm:$0xff] }
 0x149   :  { %v801_v41 = vmul.f32 0.5, %v769_v30  ;;  %v742_v45 = vld [vmem:[%s1462_s4 + $0x40] sm:$0xff]  ;;  %831 = vst [vmem:[%s1463_s5 + $0x8] sm:$0xff] %v799_v34  ;;  %v773_v48 = vadd.f32 %v741_v43, %v709_v40  ;;  %v711_v50 = vld [vmem:[#allocation2 + $0x88] sm:$0xff]  ;;  %v713_v56 = vld [vmem:[#allocation2 + $0xb8] sm:$0xff] }
 0x14a   :  { %v803_v47 = vmul.f32 0.5, %v771_v37  ;;  %v774_v49 = vadd.f32 %v742_v45, %v710_v44  ;;  %v743_v51 = vld [vmem:[%s1462_s4 + $0x48] sm:$0xff]  ;;  %832 = vst [vmem:[%s1463_s5 + $0x10] sm:$0xff] %v800_v35  ;;  %v804_v53 = vmul.f32 0.5, %v772_v42  ;;  %v745_v57 = vld [vmem:[%s1462_s4 + $0x58] sm:$0xff]  ;;  %v714_v61 = vld [vmem:[#allocation2 + $0x60] sm:$0xff] }
 0x14b   :  { %v712_v52 = vld [vmem:[#allocation2 + $0xe8] sm:$0xff]  ;;  %v775_v54 = vadd.f32 %v743_v51, %v711_v50  ;;  %833 = vst [vmem:[%s1463_s5 + $0x18] sm:$0xff] %v801_v41  ;;  %v805_v58 = vmul.f32 0.5, %v773_v48  ;;  %v777_v60 = vadd.f32 %v745_v57, %v713_v56  ;;  %v746_v62 = vld [vmem:[%s1462_s4 + $0x60] sm:$0xff]  ;;  %v715_v63 = vld [vmem:[#allocation2 + $0xf0] sm:$0xff] }
 0x14c   :  { %v776_v59 = vadd.f32 %v744_v55, %v712_v52  ;;  %834 = vst [vmem:[%s1463_s5 + $0x20] sm:$0xff] %v802_v46  ;;  %v806_v0 = vmul.f32 0.5, %v774_v49  ;;  %v778_v1 = vadd.f32 %v746_v62, %v714_v61  ;;  %v747_v2 = vld [vmem:[%s1462_s4 + $0x68] sm:$0xff]  ;;  %v748_v4 = vld [vmem:[%s1462_s4 + $0x70] sm:$0xff]  ;;  %v717_v7 = vld [vmem:[#allocation2 + $0x78] sm:$0xff] }
 0x14d   :  { %v716_v3 = vld [vmem:[#allocation2 + $0x8] sm:$0xff]  ;;  %835 = vst [vmem:[%s1463_s5 + $0x28] sm:$0xff] %v803_v47  ;;  %v807_v5 = vmul.f32 0.5, %v775_v54  ;;  %v779_v6 = vadd.f32 %v747_v2, %v715_v63  ;;  %v749_v8 = vld [vmem:[%s1462_s4 + $0x78] sm:$0xff]  ;;  %v750_v12 = vld [vmem:[%s1462_s4 + $0x80] sm:$0xff]  ;;  %v809_v15 = vmul.f32 0.5, %v777_v60 }
 0x14e   :  { %v718_v9 = vld [vmem:[#allocation2 + $0x38] sm:$0xff]  ;;  %836 = vst [vmem:[%s1463_s5 + $0x30] sm:$0xff] %v804_v53  ;;  %v808_v10 = vmul.f32 0.5, %v776_v59  ;;  %v780_v11 = vadd.f32 %v748_v4, %v716_v3  ;;  %v751_v14 = vld [vmem:[%s1462_s4 + $0x88] sm:$0xff]  ;;  %v781_v16 = vadd.f32 %v749_v8, %v717_v7  ;;  %v720_v17 = vld [vmem:[#allocation2 + $0x40] sm:$0xff]  ;;  %v810_v19 = vmul.f32 0.5, %v778_v1 }
 0x14f   :  { %v719_v13 = vld [vmem:[#allocation2 + $0x58] sm:$0xff]  ;;  %837 = vst [vmem:[%s1463_s5 + $0x38] sm:$0xff] %v805_v58  ;;  %v752_v18 = vld [vmem:[%s1462_s4 + $0x90] sm:$0xff]  ;;  %v782_v20 = vadd.f32 %v750_v12, %v718_v9  ;;  %v721_v21 = vld [vmem:[#allocation2 + $0xc8] sm:$0xff]  ;;  %v811_v23 = vmul.f32 0.5, %v779_v6 }
 0x150   :  { %838 = vst [vmem:[%s1463_s5 + $0x40] sm:$0xff] %v806_v0  ;;  %v753_v22 = vld [vmem:[%s1462_s4 + $0x98] sm:$0xff]  ;;  %v783_v24 = vadd.f32 %v751_v14, %v719_v13  ;;  %v722_v25 = vld [vmem:[#allocation2 + $0xe0] sm:$0xff]  ;;  %v812_v27 = vmul.f32 0.5, %v780_v11  ;;  %v784_v28 = vadd.f32 %v752_v18, %v720_v17  ;;  %v723_v29 = vld [vmem:[#allocation2 + $0x90] sm:$0xff]  ;;  %v813_v31 = vmul.f32 0.5, %v781_v16 }
 0x151   :  { %839 = vst [vmem:[%s1463_s5 + $0x48] sm:$0xff] %v807_v5  ;;  %v754_v26 = vld [vmem:[%s1462_s4 + $0xa0] sm:$0xff]  ;;  %v755_v30 = vld [vmem:[%s1462_s4 + $0xa8] sm:$0xff]  ;;  %v785_v32 = vadd.f32 %v753_v22, %v721_v21  ;;  %v724_v33 = vld [vmem:[#allocation2 + $0x70] sm:$0xff]  ;;  %v814_v35 = vmul.f32 0.5, %v782_v20 }
 0x152   :  { %840 = vst [vmem:[%s1463_s5 + $0x50] sm:$0xff] %v808_v10  ;;  %v756_v34 = vld [vmem:[%s1462_s4 + $0xb0] sm:$0xff]  ;;  %v786_v36 = vadd.f32 %v754_v26, %v722_v25  ;;  %v725_v37 = vld [vmem:[#allocation2 + $0xc0] sm:$0xff]  ;;  %v757_v38 = vld [vmem:[%s1462_s4 + $0xb8] sm:$0xff]  ;;  %v815_v39 = vmul.f32 0.5, %v783_v24  ;;  %v787_v40 = vadd.f32 %v755_v30, %v723_v29  ;;  %v816_v43 = vmul.f32 0.5, %v784_v28 }
 0x153   :  { %841 = vst [vmem:[%s1463_s5 + $0x58] sm:$0xff] %v809_v15  ;;  %v726_v41 = vld [vmem:[#allocation2 + $0xa8] sm:$0xff]  ;;  %v758_v42 = vld [vmem:[%s1462_s4 + $0xc0] sm:$0xff]  ;;  %v788_v44 = vadd.f32 %v756_v34, %v724_v33  ;;  %v727_v45 = vld [vmem:[#allocation2 + $0xd0] sm:$0xff]  ;;  %v817_v47 = vmul.f32 0.5, %v785_v32  ;;  %v789_v48 = vadd.f32 %v757_v38, %v725_v37 }
 0x154   :  { %842 = vst [vmem:[%s1463_s5 + $0x60] sm:$0xff] %v810_v19  ;;  %v759_v46 = vld [vmem:[%s1462_s4 + $0xc8] sm:$0xff]  ;;  %v728_v49 = vld [vmem:[#allocation2 + $0x10] sm:$0xff]  ;;  %v818_v51 = vmul.f32 0.5, %v786_v36  ;;  %v790_v52 = vadd.f32 %v758_v42, %v726_v41  ;;  %v761_v54 = vld [vmem:[%s1462_s4 + $0xd8] sm:$0xff]  ;;  %v819_v55 = vmul.f32 0.5, %v787_v40 }
 0x155   :  { %843 = vst [vmem:[%s1463_s5 + $0x68] sm:$0xff] %v811_v23  ;;  %v760_v50 = vld [vmem:[%s1462_s4 + $0xd0] sm:$0xff]  ;;  %v729_v53 = vld [vmem:[#allocation2 + $0x28] sm:$0xff]  ;;  %v791_v56 = vadd.f32 %v759_v46, %v727_v45  ;;  %v730_v57 = vld [vmem:[#allocation2 + $0xa0] sm:$0xff]  ;;  %v820_v59 = vmul.f32 0.5, %v788_v44  ;;  %v821_v63 = vmul.f32 0.5, %v789_v48 }
 0x156   :  { %844 = vst [vmem:[%s1463_s5 + $0x70] sm:$0xff] %v812_v27  ;;  %v762_v58 = vld [vmem:[%s1462_s4 + $0xe0] sm:$0xff]  ;;  %v792_v60 = vadd.f32 %v760_v50, %v728_v49  ;;  %v731_v61 = vld [vmem:[#allocation2 + $0xf8] sm:$0xff]  ;;  %v763_v62 = vld [vmem:[%s1462_s4 + $0xe8] sm:$0xff]  ;;  %v793_v0 = vadd.f32 %v761_v54, %v729_v53  ;;  %v822_v3 = vmul.f32 0.5, %v790_v52 }
 0x157   :  { %845 = vst [vmem:[%s1463_s5 + $0x78] sm:$0xff] %v813_v31  ;;  %v732_v1 = vld [vmem:[#allocation2 + $0x20] sm:$0xff]  ;;  %v764_v2 = vld [vmem:[%s1462_s4 + $0xf0] sm:$0xff]  ;;  %v794_v4 = vadd.f32 %v762_v58, %v730_v57  ;;  %v733_v5 = vld [vmem:[#allocation2 + $0x98] sm:$0xff]  ;;  %v823_v7 = vmul.f32 0.5, %v791_v56  ;;  %v795_v8 = vadd.f32 %v763_v62, %v731_v61 }
 0x158   :  { %846 = vst [vmem:[%s1463_s5 + $0x80] sm:$0xff] %v814_v35  ;;  %v765_v6 = vld [vmem:[%s1462_s4 + $0xf8] sm:$0xff]  ;;  %v824_v9 = vmul.f32 0.5, %v792_v60  ;;  %v796_v10 = vadd.f32 %v764_v2, %v732_v1  ;;  %v825_v11 = vmul.f32 0.5, %v793_v0 }
 0x159   :  { %847 = vst [vmem:[%s1463_s5 + $0x88] sm:$0xff] %v815_v39  ;;  %v797_v12 = vadd.f32 %v765_v6, %v733_v5  ;;  %v826_v13 = vmul.f32 0.5, %v794_v4  ;;  %v827_v14 = vmul.f32 0.5, %v795_v8 }
 0x15a   :  { %848 = vst [vmem:[%s1463_s5 + $0x90] sm:$0xff] %v816_v43  ;;  %v828_v15 = vmul.f32 0.5, %v796_v10 }
 0x15b   :  { %849 = vst [vmem:[%s1463_s5 + $0x98] sm:$0xff] %v817_v47  ;;  %v829_v16 = vmul.f32 0.5, %v797_v12 }
 0x15c   :  { %850 = vst [vmem:[%s1463_s5 + $0xa0] sm:$0xff] %v818_v51 }
 0x15d   :  { %851 = vst [vmem:[%s1463_s5 + $0xa8] sm:$0xff] %v819_v55 }
 0x15e   :  { %852 = vst [vmem:[%s1463_s5 + $0xb0] sm:$0xff] %v820_v59 }
 0x15f   :  { %853 = vst [vmem:[%s1463_s5 + $0xb8] sm:$0xff] %v821_v63 }
 0x160   :  { %854 = vst [vmem:[%s1463_s5 + $0xc0] sm:$0xff] %v822_v3 }
 0x161   :  { %855 = vst [vmem:[%s1463_s5 + $0xc8] sm:$0xff] %v823_v7 }
 0x162   :  { %856 = vst [vmem:[%s1463_s5 + $0xd0] sm:$0xff] %v824_v9 }
 0x163   :  { %857 = vst [vmem:[%s1463_s5 + $0xd8] sm:$0xff] %v825_v11 }
 0x164   :  { %858 = vst [vmem:[%s1463_s5 + $0xe0] sm:$0xff] %v826_v13 }
 0x165   :  { %859 = vst [vmem:[%s1463_s5 + $0xe8] sm:$0xff] %v827_v14 }
 0x166   :  { %860 = vst [vmem:[%s1463_s5 + $0xf0] sm:$0xff] %v828_v15 }
 0x167   :  { %861 = vst [vmem:[%s1463_s5 + $0xf8] sm:$0xff] %v829_v16 }

// kernel: kgcr_forward.14
= control target key start
LH: loop header
LB: loop body
LE: loop exit
PB: predicated region body
PF: predicated region fallthrough
CT: control target
= control target key end

     0   :  { %s237_s0 = inlined_call_operand.vmem [shape: f32[8,128], index: 0, kind: input, shape index: {}]   ;;  %s238_s1 = inlined_call_operand.vmem [shape: f32[8,128], index: 1, kind: input, shape index: {}]   ;;  %s239_s2 = inlined_call_operand.vmem [shape: f32[8,128], index: 2, kind: input, shape index: {}]   ;;  %s240_s3 = inlined_call_operand.vmem [shape: f32[8,128], index: 3, kind: input, shape index: {}]   ;;  %s241_s4 = inlined_call_operand.vmem [shape: f32[8,128], index: 4, kind: input, shape index: {}]   ;;  %s242_s5 = inlined_call_operand.hbm [shape: f32[1], index: 5, kind: output, shape index: {}]  }
   0x1   :  { %v24_v0 = vld [vmem:[%s240_s3] sm:$0xff] }
   0x2   :  { %v25_v1 = vld [vmem:[%s241_s4] sm:$0xff] }
   0x3   :  { %v32_v2 = vmul.f32 %v25_v1, %v24_v0  ;;  %v21_v3 = vld [vmem:[%s237_s0] sm:$0xff] }
   0x4   :  { %v22_v4 = vld [vmem:[%s238_s1] sm:$0xff] }
   0x5   :  { %10 = vsyncpa [#allocation3], 0  ;;  %v26_v5 = vmul.f32 %v22_v4, %v21_v3  ;;  %33 = vadd.xlane.f32.xlu0 %v32_v2  ;;  %v23_v6 = vld [vmem:[%s239_s2] sm:$0xff]  ;;  %vm82_vm4 = vcmask 3072   ;;  %v185_v51 = vmov 4.0   ;;  %s138_s30 = sshll.u32 %s242_s5, 4  ;;  %s139_s30 = int_to_ptr.hbm [resolvable:$true] %s138_s30 }
   0x6   :  { %v29_v7 = vmul.f32 %v24_v0, %v23_v6  ;;  %s186_s9 = smov [#allocation2]  }
   0x7   :  { %27 = vadd.xlane.f32.xlu1 %v26_v5 }
   0xd   :  { %30 = vadd.xlane.f32.xlu0 %v29_v7 }
  0x78   :  { %v34_v8 = vpop.xlane.xlu0 %33 }
  0x79   :  { %v148_v9 = vmul.f32 -1.442695, %v34_v8 }
  0x7a   :  { %v28_v23 = vpop.xlane.xlu1 %27 }
  0x7b   :  { %159 = vpow2.f32 %v148_v9 }
  0x80   :  { %v31_v20 = vpop.xlane.xlu0 %30 }
  0x81   :  { %v160_v10 = vpop.eup %159 }
  0x82   :  { %v38_v11 = vadd.f32 1.0, %v160_v10 }
  0x84   :  { %161 = vrcp.f32 %v38_v11  ;;  %v50_v15 = vand.u32 2147483648, %v38_v11  ;;  %v48_v17 = vand.u32 2147483647, %v38_v11  ;;  %vm44_vm1 = vweird.f32 %v38_v11 }
  0x86   :  { %v51_v19 = vor.u32 1.1754944e-38, %v50_v15  ;;  %vm49_vm3 = vcmp.eq.f32.partialorder %v48_v17, 8.507059e+37 }
  0x8a   :  { %v162_v12 = vpop.eup %161 }
  0x8b   :  { %v40_v13 = vmul.f32 %v162_v12, %v38_v11  ;;  %vm45_vm0 = vweird.f32 %v162_v12 }
  0x8c   :  { %vm46_vm2 = vmor %vm44_vm1, %vm45_vm0 }
  0x8d   :  { %v41_v14 = vsub.f32 1.0, %v40_v13 }
  0x8f   :  { %v42_v16 = vmul.f32 %v162_v12, %v41_v14 }
  0x91   :  { %v43_v18 = vadd.f32 %v162_v12, %v42_v16 }
  0x93   :  { %v47_v21 = vsel %vm46_vm2, %v162_v12, %v43_v18 }
  0x94   :  { %v52_v22 = vsel %vm49_vm3, %v51_v19, %v47_v21 }
  0x95   :  { %v103_v24 = vmax.f32 %v52_v22, 1e-06  ;;  %v54_v25 = vmul.f32 %v52_v22, %v31_v20 }
  0x97   :  { %v105_v26 = vrot.slane %v103_v24, 4  ;;  %v55_v27 = vadd.f32 %v54_v25, %v28_v23 }
  0x99   :  { %v57_v28 = vrot.slane %v55_v27, 4  ;;  %v107_v29 = vsub.f32 %v103_v24, %v105_v26 }
  0x9b   :  { %v59_v30 = vsub.f32 %v55_v27, %v57_v28  ;;  %v150_v31 = vadd.f32 -0.2, %v107_v29 }
  0x9d   :  { %v149_v32 = vmul.f32 -1.442695, %v59_v30  ;;  %v109_v33 = vmax.f32 %v150_v31, 0.0 }
  0x9f   :  { %163 = vpow2.f32 %v149_v32  ;;  %v110_v34 = vsel %vm82_vm4, %v109_v33, 0.0 }
  0xa0   :  { %111 = vadd.xlane.f32.xlu2 %v110_v34 }
  0xa5   :  { %v164_v35 = vpop.eup %163 }
  0xa6   :  { %v63_v36 = vadd.f32 1.0, %v164_v35 }
  0xa8   :  { %165 = vrcp.f32 %v63_v36  ;;  %v75_v40 = vand.u32 2147483648, %v63_v36  ;;  %v73_v42 = vand.u32 2147483647, %v63_v36  ;;  %vm69_vm6 = vweird.f32 %v63_v36 }
  0xaa   :  { %v76_v44 = vor.u32 1.1754944e-38, %v75_v40  ;;  %vm74_vm8 = vcmp.eq.f32.partialorder %v73_v42, 8.507059e+37 }
  0xae   :  { %v166_v37 = vpop.eup %165 }
  0xaf   :  { %v65_v38 = vmul.f32 %v166_v37, %v63_v36  ;;  %vm70_vm5 = vweird.f32 %v166_v37 }
  0xb0   :  { %vm71_vm7 = vmor %vm69_vm6, %vm70_vm5 }
  0xb1   :  { %v66_v39 = vsub.f32 1.0, %v65_v38 }
  0xb3   :  { %v67_v41 = vmul.f32 %v166_v37, %v66_v39 }
  0xb5   :  { %v68_v43 = vadd.f32 %v166_v37, %v67_v41 }
  0xb7   :  { %v72_v45 = vsel %vm71_vm7, %v166_v37, %v68_v43 }
  0xb8   :  { %v77_v46 = vsel %vm74_vm8, %v76_v44, %v72_v45 }
  0xb9   :  { %v79_v47 = vmax.f32 %v77_v46, 1e-06 }
  0xbb   :  { %167 = vlog2.f32 %v79_v47 }
  0xbc   :  { %169 = vrcp.f32 %v185_v51 }
  0xc1   :  { %v168_v48 = vpop.eup %167 }
  0xc2   :  { %v81_v49 = vmul.f32 0.6931472, %v168_v48  ;;  %v170_v53 = vpop.eup %169 }
  0xc3   :  { %v94_v55 = vmul.f32 4.0, %v170_v53  ;;  %vm98_vm9 = vweird.f32 %v170_v53 }
  0xc4   :  { %v83_v50 = vsel %vm82_vm4, %v81_v49, 0.0 }
  0xc5   :  { %84 = vadd.xlane.f32.xlu1 %v83_v50  ;;  %v95_v57 = vsub.f32 1.0, %v94_v55 }
  0xc7   :  { %v96_v62 = vmul.f32 %v170_v53, %v95_v57 }
  0xc9   :  { %v97_v2 = vadd.f32 %v170_v53, %v96_v62 }
  0xcb   :  { %v99_v6 = vsel %vm98_vm9, %v170_v53, %v97_v2 }
 0x113   :  { %v112_v52 = vpop.xlane.xlu2 %111 }
 0x114   :  { %v113_v54 = vrot.slane %v112_v52, 4 }
 0x116   :  { %v114_v56 = vadd.f32 %v113_v54, %v112_v52 }
 0x118   :  { %v115_v59 = vrot.slane %v114_v56, 2 }
 0x11a   :  { %v116_v63 = vadd.f32 %v115_v59, %v114_v56 }
 0x11c   :  { %v117_v4 = vrot.slane %v116_v63, 1 }
 0x11e   :  { %v118_v7 = vadd.f32 %v117_v4, %v116_v63 }
 0x138   :  { %v85_v58 = vpop.xlane.xlu1 %84 }
 0x139   :  { %v86_v60 = vrot.slane %v85_v58, 4 }
 0x13b   :  { %v87_v61 = vadd.f32 %v86_v60, %v85_v58 }
 0x13d   :  { %v88_v0 = vrot.slane %v87_v61, 2 }
 0x13f   :  { %v89_v1 = vadd.f32 %v88_v0, %v87_v61 }
 0x141   :  { %v90_v3 = vrot.slane %v89_v1, 1 }
 0x143   :  { %v91_v5 = vadd.f32 %v90_v3, %v89_v1 }
 0x145   :  { %151 = vpush %v91_v5 }
 0x146   :  { %153 = vpush %v99_v6 }
 0x147   :  { %155 = vpush %v118_v7 }
 0x176   :  { %s152_s0 = spop %151 }
 0x177   :  { %s154_s1 = spop %153 }
 0x178   :  { %s101_s2 = smul.f32 %s154_s1, %s152_s0  ;;  %s156_s3 = spop %155 }
 0x179   :  { %s128_s4 = smul.f32 %s156_s3, %s154_s1 }
 0x17a   :  { %s102_s6 = ssub.f32 0.0, %s101_s2 }
 0x17b   :  { %s129_s7 = smul.f32 0.5, %s128_s4 }
 0x17d   :  { %s130_s8 = sadd.f32 %s129_s7, %s102_s6 }
 0x17f   :  { %132 = sst [smem:[#allocation2]] %s130_s8 }
 0x180   :  { %141 = dma.smem_to_hbm %s186_s9, 16, %s139_s30, [#allocation3]  }
 0x181   :  { %183 = dma.done.wait [#allocation3], 16  }
 0x182   :  { %184 = vsyncadd [#allocation3], 4294967280 }
 0x183   :  { %146 = sfence }
 0x184   :  { %147 = vsyncpa [#allocation3], 1 }

// kernel: kgcr_forward.13
= control target key start
LH: loop header
LB: loop body
LE: loop exit
PB: predicated region body
PF: predicated region fallthrough
CT: control target
= control target key end

     0   :  { %v1038_v0 = vmov 0.0   ;;  %s1259_s0 = inlined_call_operand.<no memory space> [shape: s32[1,1], index: 0, kind: input, shape index: {}]   ;;  %s1260_s1 = inlined_call_operand.<no memory space> [shape: s32[1], index: 1, kind: input, shape index: {}]   ;;  %s1261_s3 = inlined_call_operand.vmem [shape: bf16[256,128], index: 3, kind: input, shape index: {}]   ;;  %s1262_s4 = inlined_call_operand.vmem [shape: f32[256,128], index: 4, kind: output, shape index: {}]   ;;  %s1263_s2 = inlined_call_operand.vmem [shape: bf16[256,256], index: 2, kind: input, shape index: {}]  }
   0x1   :  { %9 = sst [smem:[#allocation4]] %s1259_s0  ;;  %s775_s19 = sshll.u32 %s1259_s0, 1  ;;  %56 = vst [vmem:[#allocation2 + $0xb0] sm:$0xff] %v1038_v0 }
   0x2   :  { %p43_p0 = scmp.lt.s32.totalorder %s775_s19, 1  ;;  %57 = vst [vmem:[#allocation2] sm:$0xff] %v1038_v0  ;;  %p778_p1 = scmp.le.s32.totalorder %s1260_s1, 0 }
   0x3   :  { %58 = vst [vmem:[#allocation2 + $0xd8] sm:$0xff] %v1038_v0  ;;  %s96_s24 = sld [smem:[#allocation4]] (!%p778_p1) }
   0x4   :  { %s1265_s19 = smov (!%p43_p0, %s775_s19), 1  ;;  %59 = vst [vmem:[#allocation2 + $0x18] sm:$0xff] %v1038_v0 }
   0x5   :  { %60 = vst [vmem:[#allocation2 + $0x50] sm:$0xff] %v1038_v0  ;;  %s776_s20 = sshll.u32 %s1265_s19, 2 }
   0x6   :  { %61 = vst [vmem:[#allocation2 + $0x68] sm:$0xff] %v1038_v0  ;;  %s1073_s23 = scalar_lea.vmem %s1263_s2, %s776_s20 }
   0x7   :  { %62 = vst [vmem:[#allocation2 + $0x30] sm:$0xff] %v1038_v0 }
   0x8   :  { %63 = vst [vmem:[#allocation2 + $0x48] sm:$0xff] %v1038_v0 }
   0x9   :  { %64 = vst [vmem:[#allocation2 + $0x80] sm:$0xff] %v1038_v0  ;;  %s779_s25 = sshll.u32 (!%p778_p1), %s96_s24, 8 }
   0xa   :  { %65 = vst [vmem:[#allocation2 + $0x88] sm:$0xff] %v1038_v0  ;;  %s98_s26 = sshra.s32 (!%p778_p1), %s779_s25, 3 }
   0xb   :  { %66 = vst [vmem:[#allocation2 + $0xe8] sm:$0xff] %v1038_v0  ;;  %s780_s27 = sshll.u32 (!%p778_p1), %s98_s26, 2 }
   0xc   :  { %67 = vst [vmem:[#allocation2 + $0xb8] sm:$0xff] %v1038_v0  ;;  %s1081_s30 = scalar_lea.vmem (!%p778_p1), %s1261_s3, %s780_s27 }
   0xd   :  { %68 = vst [vmem:[#allocation2 + $0x60] sm:$0xff] %v1038_v0 }
   0xe   :  { %69 = vst [vmem:[#allocation2 + $0xf0] sm:$0xff] %v1038_v0 }
   0xf   :  { %70 = vst [vmem:[#allocation2 + $0x8] sm:$0xff] %v1038_v0 }
  0x10   :  { %71 = vst [vmem:[#allocation2 + $0x78] sm:$0xff] %v1038_v0 }
  0x11   :  { %72 = vst [vmem:[#allocation2 + $0x38] sm:$0xff] %v1038_v0 }
  0x12   :  { %73 = vst [vmem:[#allocation2 + $0x58] sm:$0xff] %v1038_v0 }
  0x13   :  { %74 = vst [vmem:[#allocation2 + $0x40] sm:$0xff] %v1038_v0 }
  0x14   :  { %75 = vst [vmem:[#allocation2 + $0xc8] sm:$0xff] %v1038_v0 }
  0x15   :  { %76 = vst [vmem:[#allocation2 + $0xe0] sm:$0xff] %v1038_v0 }
  0x16   :  { %77 = vst [vmem:[#allocation2 + $0x90] sm:$0xff] %v1038_v0 }
  0x17   :  { %78 = vst [vmem:[#allocation2 + $0x70] sm:$0xff] %v1038_v0 }
  0x18   :  { %79 = vst [vmem:[#allocation2 + $0xc0] sm:$0xff] %v1038_v0 }
  0x19   :  { %80 = vst [vmem:[#allocation2 + $0xa8] sm:$0xff] %v1038_v0 }
  0x1a   :  { %81 = vst [vmem:[#allocation2 + $0xd0] sm:$0xff] %v1038_v0 }
  0x1b   :  { %82 = vst [vmem:[#allocation2 + $0x10] sm:$0xff] %v1038_v0 }
  0x1c   :  { %83 = vst [vmem:[#allocation2 + $0x28] sm:$0xff] %v1038_v0  ;;  %92 = sbr.rel (%p778_p1) target bundleno = 323 (0x143), region = 17 }
  0x1d   :  { %84 = vst [vmem:[#allocation2 + $0xa0] sm:$0xff] %v1038_v0 }
  0x1e   :  { %85 = vst [vmem:[#allocation2 + $0xf8] sm:$0xff] %v1038_v0 }
  0x1f   :  { %86 = vst [vmem:[#allocation2 + $0x20] sm:$0xff] %v1038_v0 }
  0x20   :  { %87 = vst [vmem:[#allocation2 + $0x98] sm:$0xff] %v1038_v0 }
  0x21   :  { %v980_v1 = vld [vmem:[%s1081_s30 + $0x38] sm:$0xff]  ;;  %v979_v3 = vld [vmem:[%s1081_s30 + $0x30] sm:$0xff]  ;;  %v978_v5 = vld [vmem:[%s1081_s30 + $0x28] sm:$0xff] }
  0x22   :  { %v988_v2 = vld [vmem:[%s1081_s30 + $0x78] sm:$0xff]  ;;  %454 = vmatpush.bf16.msra.mxu0 %v980_v1  ;;  %1021 = vmatpush.bf16.msra.mxu2 %v980_v1  ;;  %v987_v4 = vld [vmem:[%s1081_s30 + $0x70] sm:$0xff]  ;;  %v986_v6 = vld [vmem:[%s1081_s30 + $0x68] sm:$0xff] }
  0x23   :  { %543 = vmatpush.bf16.msra.mxu1 %v988_v2  ;;  %1029 = vmatpush.bf16.msra.mxu3 %v988_v2  ;;  %v977_v7 = vld [vmem:[%s1081_s30 + $0x20] sm:$0xff]  ;;  %v976_v9 = vld [vmem:[%s1081_s30 + $0x18] sm:$0xff]  ;;  %v975_v11 = vld [vmem:[%s1081_s30 + $0x10] sm:$0xff] }
  0x24   :  { %v985_v8 = vld [vmem:[%s1081_s30 + $0x60] sm:$0xff]  ;;  %v984_v10 = vld [vmem:[%s1081_s30 + $0x58] sm:$0xff]  ;;  %v983_v12 = vld [vmem:[%s1081_s30 + $0x50] sm:$0xff] }
  0x25   :  { %v974_v13 = vld [vmem:[%s1081_s30 + $0x8] sm:$0xff]  ;;  %v783_v15 = vld [vmem:[%s1073_s23] sm:$0xf]  ;;  %v989_v21 = vld [vmem:[%s1073_s23 + $0x4] sm:$0xf] }
  0x26   :  { %455 = vmatpush.bf16.msra.mxu0 %v979_v3  ;;  %1022 = vmatpush.bf16.msra.mxu2 %v979_v3  ;;  %v982_v14 = vld [vmem:[%s1081_s30 + $0x48] sm:$0xff]  ;;  %v973_v16 = vld [vmem:[%s1081_s30] sm:$0xff]  ;;  %v791_v29 = vld [vmem:[%s1073_s23 + $0x10] sm:$0xf] }
  0x27   :  { %544 = vmatpush.bf16.msra.mxu1 %v987_v4  ;;  %1030 = vmatpush.bf16.msra.mxu3 %v987_v4  ;;  %v990_v17 = vld [vmem:[%s1073_s23 + $0x4] sm:$0xf0]  ;;  %v847_v18 = vld [vmem:[%s1073_s23 + $0x80] sm:$0xf]  ;;  %v785_v22 = vld [vmem:[%s1073_s23 + $0x8] sm:$0xf0] }
  0x28   :  { %v981_v19 = vld [vmem:[%s1081_s30 + $0x40] sm:$0xff]  ;;  %v1006_v20 = vld [vmem:[%s1073_s23 + $0x84] sm:$0xf0]  ;;  %v849_v24 = vld [vmem:[%s1073_s23 + $0x88] sm:$0xf0]  ;;  %v784_v25 = vor.u32 %v990_v17, %v783_v15  ;;  %v788_v27 = vor.u32 %v989_v21, %v785_v22 }
  0x29   :  { %v1005_v23 = vld [vmem:[%s1073_s23 + $0x84] sm:$0xf]  ;;  %v848_v26 = vor.u32 %v1006_v20, %v847_v18  ;;  %v992_v30 = vld [vmem:[%s1073_s23 + $0x14] sm:$0xf0]  ;;  %v855_v31 = vld [vmem:[%s1073_s23 + $0x90] sm:$0xf] }
  0x2a   :  { %456 = vmatpush.bf16.msra.mxu0 %v978_v5  ;;  %1023 = vmatpush.bf16.msra.mxu2 %v978_v5  ;;  %v852_v28 = vor.u32 %v1005_v23, %v849_v24  ;;  %v1008_v32 = vld [vmem:[%s1073_s23 + $0x94] sm:$0xf0]  ;;  %v991_v33 = vld [vmem:[%s1073_s23 + $0x14] sm:$0xf]  ;;  %v793_v34 = vld [vmem:[%s1073_s23 + $0x18] sm:$0xf0]  ;;  %v792_v37 = vor.u32 %v992_v30, %v791_v29 }
  0x2b   :  { %545 = vmatpush.bf16.msra.mxu1 %v986_v6  ;;  %1031 = vmatpush.bf16.msra.mxu3 %v986_v6  ;;  %v1007_v35 = vld [vmem:[%s1073_s23 + $0x94] sm:$0xf]  ;;  %v857_v36 = vld [vmem:[%s1073_s23 + $0x98] sm:$0xf0]  ;;  %v856_v38 = vor.u32 %v1008_v32, %v855_v31  ;;  %v796_v39 = vor.u32 %v991_v33, %v793_v34  ;;  %v799_v41 = vld [vmem:[%s1073_s23 + $0x20] sm:$0xf] }
  0x2c   :  { %v860_v40 = vor.u32 %v1007_v35, %v857_v36  ;;  %v994_v42 = vld [vmem:[%s1073_s23 + $0x24] sm:$0xf0]  ;;  %v863_v43 = vld [vmem:[%s1073_s23 + $0xa0] sm:$0xf]  ;;  %v993_v45 = vld [vmem:[%s1073_s23 + $0x24] sm:$0xf] }
  0x2d   :  { %v1010_v44 = vld [vmem:[%s1073_s23 + $0xa4] sm:$0xf0]  ;;  %v801_v46 = vld [vmem:[%s1073_s23 + $0x28] sm:$0xf0]  ;;  %v1009_v47 = vld [vmem:[%s1073_s23 + $0xa4] sm:$0xf]  ;;  %v800_v49 = vor.u32 %v994_v42, %v799_v41 }
  0x2e   :  { %457 = vmatpush.bf16.msra.mxu0 %v977_v7  ;;  %1024 = vmatpush.bf16.msra.mxu2 %v977_v7  ;;  %v865_v48 = vld [vmem:[%s1073_s23 + $0xa8] sm:$0xf0]  ;;  %v864_v50 = vor.u32 %v1010_v44, %v863_v43  ;;  %v804_v51 = vor.u32 %v993_v45, %v801_v46  ;;  %v807_v53 = vld [vmem:[%s1073_s23 + $0x30] sm:$0xf]  ;;  %v996_v54 = vld [vmem:[%s1073_s23 + $0x34] sm:$0xf0] }
  0x2f   :  { %546 = vmatpush.bf16.msra.mxu1 %v985_v8  ;;  %1032 = vmatpush.bf16.msra.mxu3 %v985_v8  ;;  %v868_v52 = vor.u32 %v1009_v47, %v865_v48  ;;  %v871_v55 = vld [vmem:[%s1073_s23 + $0xb0] sm:$0xf]  ;;  %v1012_v56 = vld [vmem:[%s1073_s23 + $0xb4] sm:$0xf0]  ;;  %v995_v57 = vld [vmem:[%s1073_s23 + $0x34] sm:$0xf]  ;;  %v808_v61 = vor.u32 %v996_v54, %v807_v53 }
  0x30   :  { %v809_v58 = vld [vmem:[%s1073_s23 + $0x38] sm:$0xf0]  ;;  %v1011_v59 = vld [vmem:[%s1073_s23 + $0xb4] sm:$0xf]  ;;  %v872_v62 = vor.u32 %v1012_v56, %v871_v55  ;;  %v815_v1 = vld [vmem:[%s1073_s23 + $0x40] sm:$0xf] }
  0x31   :  { %v873_v60 = vld [vmem:[%s1073_s23 + $0xb8] sm:$0xf0]  ;;  %v812_v63 = vor.u32 %v995_v57, %v809_v58  ;;  %v998_v2 = vld [vmem:[%s1073_s23 + $0x44] sm:$0xf0]  ;;  %v879_v3 = vld [vmem:[%s1073_s23 + $0xc0] sm:$0xf] }
  0x32   :  { %458 = vmatpush.bf16.msra.mxu0 %v976_v9  ;;  %1025 = vmatpush.bf16.msra.mxu2 %v976_v9  ;;  %v876_v0 = vor.u32 %v1011_v59, %v873_v60  ;;  %v1014_v4 = vld [vmem:[%s1073_s23 + $0xc4] sm:$0xf0]  ;;  %v997_v5 = vld [vmem:[%s1073_s23 + $0x44] sm:$0xf]  ;;  %v817_v6 = vld [vmem:[%s1073_s23 + $0x48] sm:$0xf0]  ;;  %v816_v9 = vor.u32 %v998_v2, %v815_v1 }
  0x33   :  { %547 = vmatpush.bf16.msra.mxu1 %v984_v10  ;;  %1033 = vmatpush.bf16.msra.mxu3 %v984_v10  ;;  %v1013_v7 = vld [vmem:[%s1073_s23 + $0xc4] sm:$0xf]  ;;  %v881_v8 = vld [vmem:[%s1073_s23 + $0xc8] sm:$0xf0]  ;;  %v880_v10 = vor.u32 %v1014_v4, %v879_v3  ;;  %v887_v15 = vld [vmem:[%s1073_s23 + $0xd0] sm:$0xf] }
  0x34   :  { %v999_v17 = vld [vmem:[%s1073_s23 + $0x54] sm:$0xf]  ;;  %v825_v18 = vld [vmem:[%s1073_s23 + $0x58] sm:$0xf0]  ;;  %v1001_v29 = vld [vmem:[%s1073_s23 + $0x64] sm:$0xf] }
  0x35   :  { %v889_v20 = vld [vmem:[%s1073_s23 + $0xd8] sm:$0xf0]  ;;  %v828_v23 = vor.u32 %v999_v17, %v825_v18  ;;  %v833_v30 = vld [vmem:[%s1073_s23 + $0x68] sm:$0xf0]  ;;  %v1017_v31 = vld [vmem:[%s1073_s23 + $0xe4] sm:$0xf] }
  0x36   :  { %459 = vmatpush.bf16.msra.mxu0 %v975_v11  ;;  %1026 = vmatpush.bf16.msra.mxu2 %v975_v11  ;;  %v820_v11 = vor.u32 %v997_v5, %v817_v6  ;;  %v897_v32 = vld [vmem:[%s1073_s23 + $0xe8] sm:$0xf0]  ;;  %v836_v35 = vor.u32 %v1001_v29, %v833_v30  ;;  %v1003_v41 = vld [vmem:[%s1073_s23 + $0x74] sm:$0xf]  ;;  %v841_v42 = vld [vmem:[%s1073_s23 + $0x78] sm:$0xf0] }
  0x37   :  { %548 = vmatpush.bf16.msra.mxu1 %v983_v12  ;;  %1034 = vmatpush.bf16.msra.mxu3 %v983_v12  ;;  %v884_v12 = vor.u32 %v1013_v7, %v881_v8  ;;  %v900_v36 = vor.u32 %v1017_v31, %v897_v32  ;;  %v1019_v43 = vld [vmem:[%s1073_s23 + $0xf4] sm:$0xf]  ;;  %v905_v44 = vld [vmem:[%s1073_s23 + $0xf8] sm:$0xf0]  ;;  %v844_v47 = vor.u32 %v1003_v41, %v841_v42  ;;  %v135_v59 = vld [vmem:[#allocation2] sm:$0xff] }
  0x38   :  { %v908_v48 = vor.u32 %v1019_v43, %v905_v44  ;;  %v150_v55 = vld [vmem:[#allocation2 + $0x38] sm:$0xff]  ;;  %v154_v31 = vld [vmem:[#allocation2 + $0xe0] sm:$0xff]  ;;  %v155_v41 = vld [vmem:[#allocation2 + $0x90] sm:$0xff] }
  0x39   :  { %v151_v1 = vld [vmem:[#allocation2 + $0x58] sm:$0xff] }
  0x3a   :  { %460 = vmatpush.bf16.msra.mxu0 %v974_v13  ;;  %1027 = vmatpush.bf16.msra.mxu2 %v974_v13  ;;  %v823_v13 = vld [vmem:[%s1073_s23 + $0x50] sm:$0xf]  ;;  %v136_v5 = vld [vmem:[#allocation2 + $0xd8] sm:$0xff] }
  0x3b   :  { %549 = vmatpush.bf16.msra.mxu1 %v982_v14  ;;  %1035 = vmatpush.bf16.msra.mxu3 %v982_v14  ;;  %v1000_v14 = vld [vmem:[%s1073_s23 + $0x54] sm:$0xf0] }
  0x3c   :  { %v824_v21 = vor.u32 %v1000_v14, %v823_v13 }
  0x3e   :  { %461 = vmatpush.bf16.msra.mxu0 %v973_v16  ;;  %1028 = vmatpush.bf16.msra.mxu2 %v973_v16  ;;  %v1016_v16 = vld [vmem:[%s1073_s23 + $0xd4] sm:$0xf0] }
  0x3f   :  { %550 = vmatpush.bf16.msra.mxu1 %v981_v19  ;;  %1036 = vmatpush.bf16.msra.mxu3 %v981_v19  ;;  %v1015_v19 = vld [vmem:[%s1073_s23 + $0xd4] sm:$0xf]  ;;  %v888_v22 = vor.u32 %v1016_v16, %v887_v15  ;;  %v137_v15 = vld [vmem:[#allocation2 + $0x18] sm:$0xff] }
  0x40   :  { %v892_v24 = vor.u32 %v1015_v19, %v889_v20 }
  0x41   :  { %462 = vmatmul.bf16.vlgmr.msra.gmra.mxu0 %v784_v25  ;;  %502 = vmatmul.bf16.vlgmr.msra.gmra.mxu2 %v848_v26  ;;  %v831_v25 = vld [vmem:[%s1073_s23 + $0x60] sm:$0xf]  ;;  %v1002_v26 = vld [vmem:[%s1073_s23 + $0x64] sm:$0xf0] }
  0x42   :  { %551 = vmatmul.bf16.vlgmr.msra.gmra.mxu1 %v788_v27  ;;  %591 = vmatmul.bf16.vlgmr.msra.gmra.mxu3 %v852_v28  ;;  %v895_v27 = vld [vmem:[%s1073_s23 + $0xe0] sm:$0xf]  ;;  %v1018_v28 = vld [vmem:[%s1073_s23 + $0xe4] sm:$0xf0]  ;;  %v832_v33 = vor.u32 %v1002_v26, %v831_v25  ;;  %v138_v25 = vld [vmem:[#allocation2 + $0x50] sm:$0xff] }
  0x43   :  { %v896_v34 = vor.u32 %v1018_v28, %v895_v27 }
  0x51   :  { %467 = vmatmul.bf16.gmra.mxu0 %v792_v37  ;;  %507 = vmatmul.bf16.gmra.mxu2 %v856_v38  ;;  %v839_v37 = vld [vmem:[%s1073_s23 + $0x70] sm:$0xf]  ;;  %v1004_v38 = vld [vmem:[%s1073_s23 + $0x74] sm:$0xf0] }
  0x52   :  { %556 = vmatmul.bf16.gmra.mxu1 %v796_v39  ;;  %596 = vmatmul.bf16.gmra.mxu3 %v860_v40  ;;  %v903_v39 = vld [vmem:[%s1073_s23 + $0xf0] sm:$0xf]  ;;  %v1020_v40 = vld [vmem:[%s1073_s23 + $0xf4] sm:$0xf0]  ;;  %v840_v45 = vor.u32 %v1004_v38, %v839_v37 }
  0x53   :  { %v904_v46 = vor.u32 %v1020_v40, %v903_v39 }
  0x61   :  { %472 = vmatmul.bf16.gmra.mxu0 %v800_v49  ;;  %512 = vmatmul.bf16.gmra.mxu2 %v864_v50  ;;  %v134_v50 = vld [vmem:[#allocation2 + $0xb0] sm:$0xff] }
  0x62   :  { %561 = vmatmul.bf16.gmra.mxu1 %v804_v51  ;;  %601 = vmatmul.bf16.gmra.mxu3 %v868_v52 }
  0x71   :  { %477 = vmatmul.bf16.gmra.mxu0 %v808_v61  ;;  %517 = vmatmul.bf16.gmra.mxu2 %v872_v62 }
  0x72   :  { %566 = vmatmul.bf16.gmra.mxu1 %v812_v63  ;;  %606 = vmatmul.bf16.gmra.mxu3 %v876_v0 }
  0x81   :  { %482 = vmatmul.bf16.gmra.mxu0 %v816_v9  ;;  %522 = vmatmul.bf16.gmra.mxu2 %v880_v10 }
  0x82   :  { %571 = vmatmul.bf16.gmra.mxu1 %v820_v11  ;;  %611 = vmatmul.bf16.gmra.mxu3 %v884_v12  ;;  %v152_v11 = vld [vmem:[#allocation2 + $0x40] sm:$0xff] }
  0x91   :  { %487 = vmatmul.bf16.gmra.mxu0 %v824_v21  ;;  %527 = vmatmul.bf16.gmra.mxu2 %v888_v22  ;;  %v153_v21 = vld [vmem:[#allocation2 + $0xc8] sm:$0xff] }
  0x92   :  { %576 = vmatmul.bf16.gmra.mxu1 %v828_v23  ;;  %616 = vmatmul.bf16.gmra.mxu3 %v892_v24 }
  0xa1   :  { %492 = vmatmul.bf16.gmra.mxu0 %v832_v33  ;;  %532 = vmatmul.bf16.gmra.mxu2 %v896_v34 }
  0xa2   :  { %581 = vmatmul.bf16.gmra.mxu1 %v836_v35  ;;  %621 = vmatmul.bf16.gmra.mxu3 %v900_v36  ;;  %v139_v35 = vld [vmem:[#allocation2 + $0x68] sm:$0xff] }
  0xb1   :  { %497 = vmatmul.bf16.gmra.mxu0 %v840_v45  ;;  %537 = vmatmul.bf16.gmra.mxu2 %v904_v46  ;;  %v140_v45 = vld [vmem:[#allocation2 + $0x30] sm:$0xff] }
  0xb2   :  { %586 = vmatmul.bf16.gmra.mxu1 %v844_v47  ;;  %626 = vmatmul.bf16.gmra.mxu3 %v908_v48 }
  0xbe   :  { %v463_v49 = vpop.f32.mrf.mxu0 }
  0xbf   :  { %v552_v51 = vpop.f32.mrf.mxu1 }
  0xc0   :  { %v553_v52 = vadd.f32 %v552_v51, %v463_v49  ;;  %v156_v51 = vld [vmem:[#allocation2 + $0x70] sm:$0xff] }
  0xc2   :  { %v632_v53 = vadd.f32 %v553_v52, %v134_v50 }
  0xc4   :  { %664 = vst [vmem:[#allocation2 + $0xb0] sm:$0xff] %v632_v53  ;;  %v503_v54 = vpop.f32.mrf.mxu2 }
  0xc5   :  { %v592_v56 = vpop.f32.mrf.mxu3 }
  0xc6   :  { %v593_v57 = vadd.f32 %v592_v56, %v503_v54  ;;  %v465_v58 = vpop.f32.mrf.mxu0 }
  0xc7   :  { %v554_v60 = vpop.f32.mrf.mxu1 }
  0xc8   :  { %v648_v61 = vadd.f32 %v593_v57, %v150_v55  ;;  %v555_v62 = vadd.f32 %v554_v60, %v465_v58  ;;  %v141_v55 = vld [vmem:[#allocation2 + $0x48] sm:$0xff] }
  0xca   :  { %680 = vst [vmem:[#allocation2 + $0x38] sm:$0xff] %v648_v61  ;;  %v633_v63 = vadd.f32 %v555_v62, %v135_v59  ;;  %v157_v61 = vld [vmem:[#allocation2 + $0xc0] sm:$0xff] }
  0xcc   :  { %665 = vst [vmem:[#allocation2] sm:$0xff] %v633_v63  ;;  %v505_v0 = vpop.f32.mrf.mxu2 }
  0xcd   :  { %v594_v2 = vpop.f32.mrf.mxu3 }
  0xce   :  { %v595_v3 = vadd.f32 %v594_v2, %v505_v0  ;;  %v468_v4 = vpop.f32.mrf.mxu0 }
  0xcf   :  { %v557_v6 = vpop.f32.mrf.mxu1 }
  0xd0   :  { %v649_v7 = vadd.f32 %v595_v3, %v151_v1  ;;  %v558_v8 = vadd.f32 %v557_v6, %v468_v4  ;;  %v142_v1 = vld [vmem:[#allocation2 + $0x80] sm:$0xff] }
  0xd2   :  { %681 = vst [vmem:[#allocation2 + $0x58] sm:$0xff] %v649_v7  ;;  %v634_v9 = vadd.f32 %v558_v8, %v136_v5  ;;  %v158_v7 = vld [vmem:[#allocation2 + $0xa8] sm:$0xff] }
  0xd4   :  { %666 = vst [vmem:[#allocation2 + $0xd8] sm:$0xff] %v634_v9  ;;  %v508_v10 = vpop.f32.mrf.mxu2 }
  0xd5   :  { %v597_v12 = vpop.f32.mrf.mxu3 }
  0xd6   :  { %v598_v13 = vadd.f32 %v597_v12, %v508_v10  ;;  %v470_v14 = vpop.f32.mrf.mxu0 }
  0xd7   :  { %v559_v16 = vpop.f32.mrf.mxu1 }
  0xd8   :  { %v650_v17 = vadd.f32 %v598_v13, %v152_v11  ;;  %v560_v18 = vadd.f32 %v559_v16, %v470_v14  ;;  %v143_v11 = vld [vmem:[#allocation2 + $0x88] sm:$0xff] }
  0xda   :  { %682 = vst [vmem:[#allocation2 + $0x40] sm:$0xff] %v650_v17  ;;  %v635_v19 = vadd.f32 %v560_v18, %v137_v15  ;;  %v159_v17 = vld [vmem:[#allocation2 + $0xd0] sm:$0xff] }
  0xdc   :  { %667 = vst [vmem:[#allocation2 + $0x18] sm:$0xff] %v635_v19  ;;  %v510_v20 = vpop.f32.mrf.mxu2 }
  0xdd   :  { %v599_v22 = vpop.f32.mrf.mxu3 }
  0xde   :  { %v600_v23 = vadd.f32 %v599_v22, %v510_v20  ;;  %v473_v24 = vpop.f32.mrf.mxu0 }
  0xdf   :  { %v562_v26 = vpop.f32.mrf.mxu1 }
  0xe0   :  { %v651_v27 = vadd.f32 %v600_v23, %v153_v21  ;;  %v563_v28 = vadd.f32 %v562_v26, %v473_v24  ;;  %v144_v21 = vld [vmem:[#allocation2 + $0xe8] sm:$0xff] }
  0xe2   :  { %683 = vst [vmem:[#allocation2 + $0xc8] sm:$0xff] %v651_v27  ;;  %v636_v29 = vadd.f32 %v563_v28, %v138_v25  ;;  %v160_v27 = vld [vmem:[#allocation2 + $0x10] sm:$0xff] }
  0xe4   :  { %668 = vst [vmem:[#allocation2 + $0x50] sm:$0xff] %v636_v29  ;;  %v513_v30 = vpop.f32.mrf.mxu2 }
  0xe5   :  { %v602_v32 = vpop.f32.mrf.mxu3 }
  0xe6   :  { %v603_v33 = vadd.f32 %v602_v32, %v513_v30  ;;  %v475_v34 = vpop.f32.mrf.mxu0 }
  0xe7   :  { %v564_v36 = vpop.f32.mrf.mxu1 }
  0xe8   :  { %v652_v37 = vadd.f32 %v603_v33, %v154_v31  ;;  %v565_v38 = vadd.f32 %v564_v36, %v475_v34  ;;  %v145_v31 = vld [vmem:[#allocation2 + $0xb8] sm:$0xff] }
  0xea   :  { %684 = vst [vmem:[#allocation2 + $0xe0] sm:$0xff] %v652_v37  ;;  %v637_v39 = vadd.f32 %v565_v38, %v139_v35  ;;  %v161_v37 = vld [vmem:[#allocation2 + $0x28] sm:$0xff] }
  0xec   :  { %669 = vst [vmem:[#allocation2 + $0x68] sm:$0xff] %v637_v39  ;;  %v515_v40 = vpop.f32.mrf.mxu2 }
  0xed   :  { %v604_v42 = vpop.f32.mrf.mxu3 }
  0xee   :  { %v605_v43 = vadd.f32 %v604_v42, %v515_v40  ;;  %v478_v44 = vpop.f32.mrf.mxu0 }
  0xef   :  { %v567_v46 = vpop.f32.mrf.mxu1 }
  0xf0   :  { %v653_v47 = vadd.f32 %v605_v43, %v155_v41  ;;  %v568_v48 = vadd.f32 %v567_v46, %v478_v44  ;;  %v146_v41 = vld [vmem:[#allocation2 + $0x60] sm:$0xff] }
  0xf2   :  { %685 = vst [vmem:[#allocation2 + $0x90] sm:$0xff] %v653_v47  ;;  %v638_v49 = vadd.f32 %v568_v48, %v140_v45  ;;  %v162_v47 = vld [vmem:[#allocation2 + $0xa0] sm:$0xff] }
  0xf4   :  { %670 = vst [vmem:[#allocation2 + $0x30] sm:$0xff] %v638_v49  ;;  %v518_v50 = vpop.f32.mrf.mxu2 }
  0xf5   :  { %v607_v52 = vpop.f32.mrf.mxu3 }
  0xf6   :  { %v608_v53 = vadd.f32 %v607_v52, %v518_v50  ;;  %v480_v54 = vpop.f32.mrf.mxu0 }
  0xf7   :  { %v569_v56 = vpop.f32.mrf.mxu1 }
  0xf8   :  { %v654_v57 = vadd.f32 %v608_v53, %v156_v51  ;;  %v570_v58 = vadd.f32 %v569_v56, %v480_v54  ;;  %v147_v51 = vld [vmem:[#allocation2 + $0xf0] sm:$0xff] }
  0xfa   :  { %686 = vst [vmem:[#allocation2 + $0x70] sm:$0xff] %v654_v57  ;;  %v639_v59 = vadd.f32 %v570_v58, %v141_v55  ;;  %v163_v57 = vld [vmem:[#allocation2 + $0xf8] sm:$0xff] }
  0xfc   :  { %671 = vst [vmem:[#allocation2 + $0x48] sm:$0xff] %v639_v59  ;;  %v520_v60 = vpop.f32.mrf.mxu2 }
  0xfd   :  { %v609_v62 = vpop.f32.mrf.mxu3 }
  0xfe   :  { %v610_v63 = vadd.f32 %v609_v62, %v520_v60  ;;  %v483_v0 = vpop.f32.mrf.mxu0 }
  0xff   :  { %v572_v2 = vpop.f32.mrf.mxu1 }
 0x100   :  { %v655_v3 = vadd.f32 %v610_v63, %v157_v61  ;;  %v573_v4 = vadd.f32 %v572_v2, %v483_v0  ;;  %v148_v61 = vld [vmem:[#allocation2 + $0x8] sm:$0xff] }
 0x102   :  { %687 = vst [vmem:[#allocation2 + $0xc0] sm:$0xff] %v655_v3  ;;  %v640_v5 = vadd.f32 %v573_v4, %v142_v1  ;;  %v164_v3 = vld [vmem:[#allocation2 + $0x20] sm:$0xff] }
 0x104   :  { %672 = vst [vmem:[#allocation2 + $0x80] sm:$0xff] %v640_v5  ;;  %v523_v6 = vpop.f32.mrf.mxu2 }
 0x105   :  { %v612_v8 = vpop.f32.mrf.mxu3 }
 0x106   :  { %v613_v9 = vadd.f32 %v612_v8, %v523_v6  ;;  %v485_v10 = vpop.f32.mrf.mxu0 }
 0x107   :  { %v574_v12 = vpop.f32.mrf.mxu1 }
 0x108   :  { %v656_v13 = vadd.f32 %v613_v9, %v158_v7  ;;  %v575_v14 = vadd.f32 %v574_v12, %v485_v10  ;;  %v149_v7 = vld [vmem:[#allocation2 + $0x78] sm:$0xff] }
 0x10a   :  { %688 = vst [vmem:[#allocation2 + $0xa8] sm:$0xff] %v656_v13  ;;  %v641_v15 = vadd.f32 %v575_v14, %v143_v11  ;;  %v165_v13 = vld [vmem:[#allocation2 + $0x98] sm:$0xff] }
 0x10c   :  { %673 = vst [vmem:[#allocation2 + $0x88] sm:$0xff] %v641_v15  ;;  %v525_v16 = vpop.f32.mrf.mxu2 }
 0x10d   :  { %v614_v18 = vpop.f32.mrf.mxu3 }
 0x10e   :  { %v615_v19 = vadd.f32 %v614_v18, %v525_v16  ;;  %v488_v20 = vpop.f32.mrf.mxu0 }
 0x10f   :  { %v577_v22 = vpop.f32.mrf.mxu1 }
 0x110   :  { %v657_v23 = vadd.f32 %v615_v19, %v159_v17  ;;  %v578_v24 = vadd.f32 %v577_v22, %v488_v20 }
 0x112   :  { %689 = vst [vmem:[#allocation2 + $0xd0] sm:$0xff] %v657_v23  ;;  %v642_v25 = vadd.f32 %v578_v24, %v144_v21 }
 0x114   :  { %674 = vst [vmem:[#allocation2 + $0xe8] sm:$0xff] %v642_v25  ;;  %v528_v26 = vpop.f32.mrf.mxu2 }
 0x115   :  { %v617_v28 = vpop.f32.mrf.mxu3 }
 0x116   :  { %v618_v29 = vadd.f32 %v617_v28, %v528_v26  ;;  %v490_v30 = vpop.f32.mrf.mxu0 }
 0x117   :  { %v579_v32 = vpop.f32.mrf.mxu1 }
 0x118   :  { %v658_v33 = vadd.f32 %v618_v29, %v160_v27  ;;  %v580_v34 = vadd.f32 %v579_v32, %v490_v30 }
 0x11a   :  { %690 = vst [vmem:[#allocation2 + $0x10] sm:$0xff] %v658_v33  ;;  %v643_v35 = vadd.f32 %v580_v34, %v145_v31 }
 0x11c   :  { %675 = vst [vmem:[#allocation2 + $0xb8] sm:$0xff] %v643_v35  ;;  %v530_v36 = vpop.f32.mrf.mxu2 }
 0x11d   :  { %v619_v38 = vpop.f32.mrf.mxu3 }
 0x11e   :  { %v620_v39 = vadd.f32 %v619_v38, %v530_v36  ;;  %v493_v40 = vpop.f32.mrf.mxu0 }
 0x11f   :  { %v582_v42 = vpop.f32.mrf.mxu1 }
 0x120   :  { %v659_v43 = vadd.f32 %v620_v39, %v161_v37  ;;  %v583_v44 = vadd.f32 %v582_v42, %v493_v40 }
 0x122   :  { %691 = vst [vmem:[#allocation2 + $0x28] sm:$0xff] %v659_v43  ;;  %v644_v45 = vadd.f32 %v583_v44, %v146_v41 }
 0x124   :  { %676 = vst [vmem:[#allocation2 + $0x60] sm:$0xff] %v644_v45  ;;  %v533_v46 = vpop.f32.mrf.mxu2 }
 0x125   :  { %v622_v48 = vpop.f32.mrf.mxu3 }
 0x126   :  { %v623_v49 = vadd.f32 %v622_v48, %v533_v46  ;;  %v495_v50 = vpop.f32.mrf.mxu0 }
 0x127   :  { %v584_v52 = vpop.f32.mrf.mxu1 }
 0x128   :  { %v660_v53 = vadd.f32 %v623_v49, %v162_v47  ;;  %v585_v54 = vadd.f32 %v584_v52, %v495_v50 }
 0x12a   :  { %692 = vst [vmem:[#allocation2 + $0xa0] sm:$0xff] %v660_v53  ;;  %v645_v55 = vadd.f32 %v585_v54, %v147_v51 }
 0x12c   :  { %677 = vst [vmem:[#allocation2 + $0xf0] sm:$0xff] %v645_v55  ;;  %v535_v56 = vpop.f32.mrf.mxu2 }
 0x12d   :  { %v624_v58 = vpop.f32.mrf.mxu3 }
 0x12e   :  { %v625_v59 = vadd.f32 %v624_v58, %v535_v56  ;;  %v498_v60 = vpop.f32.mrf.mxu0 }
 0x12f   :  { %v587_v62 = vpop.f32.mrf.mxu1 }
 0x130   :  { %v661_v63 = vadd.f32 %v625_v59, %v163_v57  ;;  %v588_v0 = vadd.f32 %v587_v62, %v498_v60 }
 0x132   :  { %693 = vst [vmem:[#allocation2 + $0xf8] sm:$0xff] %v661_v63  ;;  %v646_v1 = vadd.f32 %v588_v0, %v148_v61 }
 0x134   :  { %678 = vst [vmem:[#allocation2 + $0x8] sm:$0xff] %v646_v1  ;;  %v538_v2 = vpop.f32.mrf.mxu2 }
 0x135   :  { %v627_v4 = vpop.f32.mrf.mxu3 }
 0x136   :  { %v628_v5 = vadd.f32 %v627_v4, %v538_v2  ;;  %v500_v6 = vpop.f32.mrf.mxu0 }
 0x137   :  { %v589_v8 = vpop.f32.mrf.mxu1 }
 0x138   :  { %v662_v9 = vadd.f32 %v628_v5, %v164_v3  ;;  %v590_v10 = vadd.f32 %v589_v8, %v500_v6 }
 0x13a   :  { %694 = vst [vmem:[#allocation2 + $0x20] sm:$0xff] %v662_v9  ;;  %v647_v11 = vadd.f32 %v590_v10, %v149_v7 }
 0x13c   :  { %679 = vst [vmem:[#allocation2 + $0x78] sm:$0xff] %v647_v11  ;;  %v540_v12 = vpop.f32.mrf.mxu2 }
 0x13d   :  { %v629_v14 = vpop.f32.mrf.mxu3 }
 0x13e   :  { %v630_v15 = vadd.f32 %v629_v14, %v540_v12 }
 0x140   :  { %v663_v16 = vadd.f32 %v630_v15, %v165_v13 }
 0x142   :  { %695 = vst [vmem:[#allocation2 + $0x98] sm:$0xff] %v663_v16 }
 0x143 PF:  { %v699_v17 = vld [vmem:[#allocation2 + $0xb0] sm:$0xff]  ;;  %v700_v18 = vld [vmem:[#allocation2] sm:$0xff]  ;;  %v701_v19 = vld [vmem:[#allocation2 + $0xd8] sm:$0xff] }
 0x144   :  { %731 = vst [vmem:[%s1262_s4] sm:$0xff] %v699_v17  ;;  %v702_v20 = vld [vmem:[#allocation2 + $0x18] sm:$0xff]  ;;  %v703_v21 = vld [vmem:[#allocation2 + $0x50] sm:$0xff]  ;;  %v704_v22 = vld [vmem:[#allocation2 + $0x68] sm:$0xff] }
 0x145   :  { %732 = vst [vmem:[%s1262_s4 + $0x8] sm:$0xff] %v700_v18  ;;  %v705_v23 = vld [vmem:[#allocation2 + $0x30] sm:$0xff]  ;;  %v706_v24 = vld [vmem:[#allocation2 + $0x48] sm:$0xff]  ;;  %v707_v25 = vld [vmem:[#allocation2 + $0x80] sm:$0xff] }
 0x146   :  { %733 = vst [vmem:[%s1262_s4 + $0x10] sm:$0xff] %v701_v19  ;;  %v708_v26 = vld [vmem:[#allocation2 + $0x88] sm:$0xff]  ;;  %v710_v28 = vld [vmem:[#allocation2 + $0xb8] sm:$0xff]  ;;  %v711_v29 = vld [vmem:[#allocation2 + $0x60] sm:$0xff] }
 0x147   :  { %734 = vst [vmem:[%s1262_s4 + $0x18] sm:$0xff] %v702_v20  ;;  %v709_v27 = vld [vmem:[#allocation2 + $0xe8] sm:$0xff]  ;;  %v712_v30 = vld [vmem:[#allocation2 + $0xf0] sm:$0xff]  ;;  %v714_v32 = vld [vmem:[#allocation2 + $0x78] sm:$0xff] }
 0x148   :  { %735 = vst [vmem:[%s1262_s4 + $0x20] sm:$0xff] %v703_v21  ;;  %v713_v31 = vld [vmem:[#allocation2 + $0x8] sm:$0xff]  ;;  %v715_v33 = vld [vmem:[#allocation2 + $0x38] sm:$0xff]  ;;  %v717_v35 = vld [vmem:[#allocation2 + $0x40] sm:$0xff] }
 0x149   :  { %736 = vst [vmem:[%s1262_s4 + $0x28] sm:$0xff] %v704_v22  ;;  %v716_v34 = vld [vmem:[#allocation2 + $0x58] sm:$0xff]  ;;  %v718_v36 = vld [vmem:[#allocation2 + $0xc8] sm:$0xff]  ;;  %v719_v37 = vld [vmem:[#allocation2 + $0xe0] sm:$0xff] }
 0x14a   :  { %737 = vst [vmem:[%s1262_s4 + $0x30] sm:$0xff] %v705_v23  ;;  %v720_v38 = vld [vmem:[#allocation2 + $0x90] sm:$0xff]  ;;  %v722_v40 = vld [vmem:[#allocation2 + $0xc0] sm:$0xff]  ;;  %v723_v41 = vld [vmem:[#allocation2 + $0xa8] sm:$0xff] }
 0x14b   :  { %738 = vst [vmem:[%s1262_s4 + $0x38] sm:$0xff] %v706_v24  ;;  %v721_v39 = vld [vmem:[#allocation2 + $0x70] sm:$0xff]  ;;  %v726_v44 = vld [vmem:[#allocation2 + $0x28] sm:$0xff]  ;;  %v727_v45 = vld [vmem:[#allocation2 + $0xa0] sm:$0xff] }
 0x14c   :  { %739 = vst [vmem:[%s1262_s4 + $0x40] sm:$0xff] %v707_v25  ;;  %v724_v42 = vld [vmem:[#allocation2 + $0xd0] sm:$0xff]  ;;  %v728_v46 = vld [vmem:[#allocation2 + $0xf8] sm:$0xff]  ;;  %v729_v47 = vld [vmem:[#allocation2 + $0x20] sm:$0xff] }
 0x14d   :  { %740 = vst [vmem:[%s1262_s4 + $0x48] sm:$0xff] %v708_v26  ;;  %v725_v43 = vld [vmem:[#allocation2 + $0x10] sm:$0xff]  ;;  %v730_v48 = vld [vmem:[#allocation2 + $0x98] sm:$0xff] }
 0x14e   :  { %741 = vst [vmem:[%s1262_s4 + $0x50] sm:$0xff] %v709_v27 }
 0x14f   :  { %742 = vst [vmem:[%s1262_s4 + $0x58] sm:$0xff] %v710_v28 }
 0x150   :  { %743 = vst [vmem:[%s1262_s4 + $0x60] sm:$0xff] %v711_v29 }
 0x151   :  { %744 = vst [vmem:[%s1262_s4 + $0x68] sm:$0xff] %v712_v30 }
 0x152   :  { %745 = vst [vmem:[%s1262_s4 + $0x70] sm:$0xff] %v713_v31 }
 0x153   :  { %746 = vst [vmem:[%s1262_s4 + $0x78] sm:$0xff] %v714_v32 }
 0x154   :  { %747 = vst [vmem:[%s1262_s4 + $0x80] sm:$0xff] %v715_v33 }
 0x155   :  { %748 = vst [vmem:[%s1262_s4 + $0x88] sm:$0xff] %v716_v34 }
 0x156   :  { %749 = vst [vmem:[%s1262_s4 + $0x90] sm:$0xff] %v717_v35 }
 0x157   :  { %750 = vst [vmem:[%s1262_s4 + $0x98] sm:$0xff] %v718_v36 }
 0x158   :  { %751 = vst [vmem:[%s1262_s4 + $0xa0] sm:$0xff] %v719_v37 }
 0x159   :  { %752 = vst [vmem:[%s1262_s4 + $0xa8] sm:$0xff] %v720_v38 }
 0x15a   :  { %753 = vst [vmem:[%s1262_s4 + $0xb0] sm:$0xff] %v721_v39 }
 0x15b   :  { %754 = vst [vmem:[%s1262_s4 + $0xb8] sm:$0xff] %v722_v40 }
 0x15c   :  { %755 = vst [vmem:[%s1262_s4 + $0xc0] sm:$0xff] %v723_v41 }
 0x15d   :  { %756 = vst [vmem:[%s1262_s4 + $0xc8] sm:$0xff] %v724_v42 }
 0x15e   :  { %757 = vst [vmem:[%s1262_s4 + $0xd0] sm:$0xff] %v725_v43 }
 0x15f   :  { %758 = vst [vmem:[%s1262_s4 + $0xd8] sm:$0xff] %v726_v44 }
 0x160   :  { %759 = vst [vmem:[%s1262_s4 + $0xe0] sm:$0xff] %v727_v45 }
 0x161   :  { %760 = vst [vmem:[%s1262_s4 + $0xe8] sm:$0xff] %v728_v46 }
 0x162   :  { %761 = vst [vmem:[%s1262_s4 + $0xf0] sm:$0xff] %v729_v47 }
 0x163   :  { %762 = vst [vmem:[%s1262_s4 + $0xf8] sm:$0xff] %v730_v48 }

// kernel: kgcr_forward.15
= control target key start
LH: loop header
LB: loop body
LE: loop exit
PB: predicated region body
PF: predicated region fallthrough
CT: control target
= control target key end

     0   :  { %s83_s0 = inlined_call_operand.vmem [shape: f32[8,128], index: 0, kind: input, shape index: {}]   ;;  %s84_s1 = inlined_call_operand.hbm [shape: f32[1], index: 1, kind: output, shape index: {}]  }
   0x1   :  { %v14_v0 = vld [vmem:[%s83_s0] sm:$0xff] }
   0x2   :  { %6 = vsyncpa [#allocation4], 0  ;;  %v16_v1 = vmul.f32 %v14_v0, %v14_v0  ;;  %s39_s10 = sshll.u32 %s84_s1, 4  ;;  %s66_s12 = smov [#allocation3]   ;;  %s40_s10 = int_to_ptr.hbm [resolvable:$true] %s39_s10 }
   0x4   :  { %23 = vadd.xlane.f32.xlu0 %v16_v1 }
  0x77   :  { %v24_v2 = vpop.xlane.xlu0 %23 }
  0x78   :  { %v25_v3 = vrot.slane %v24_v2, 4 }
  0x7a   :  { %v26_v4 = vadd.f32 %v25_v3, %v24_v2 }
  0x7c   :  { %v27_v5 = vrot.slane %v26_v4, 2 }
  0x7e   :  { %v28_v6 = vadd.f32 %v27_v5, %v26_v4 }
  0x80   :  { %v29_v7 = vrot.slane %v28_v6, 1 }
  0x82   :  { %v30_v8 = vadd.f32 %v29_v7, %v28_v6 }
  0x84   :  { %49 = vpush %v30_v8 }
  0xb5   :  { %s50_s11 = spop %49 }
  0xb6   :  { %33 = sst [smem:[#allocation3]] %s50_s11 }
  0xb7   :  { %42 = dma.smem_to_hbm %s66_s12, 16, %s40_s10, [#allocation4]  }
  0xb8   :  { %64 = dma.done.wait [#allocation4], 16  }
  0xb9   :  { %65 = vsyncadd [#allocation4], 4294967280 }
  0xba   :  { %47 = sfence }
  0xbb   :  { %48 = vsyncpa [#allocation4], 1 }

</bundles_post_ra>
